<compile_context>
chip_gen: v5e
topology: v5e:2x2
jax: 0.10.0
libtpu: 0.0.40
codegen_flags: <defaults>
</compile_context>

<pallas_src>
import functools

import jax
import jax.numpy as jnp
from jax.experimental import pallas as pl
from jax.experimental.pallas import tpu as pltpu


def _round_up(x, m):
    return (x + m - 1) // m * m


def _layernorm(h, gamma, beta, inv_n):
    # Single-pass LayerNorm in f32 (torch semantics: biased var, eps=1e-5).
    # Padded lanes of h are exactly zero and gamma/beta are zero there, so
    # summing over the full padded width with the REAL-dim divisor is exact.
    s = jnp.sum(h, axis=-1, keepdims=True)
    sq = jnp.sum(h * h, axis=-1, keepdims=True)
    mean = s * inv_n
    var = sq * inv_n - mean * mean
    return (h - mean) * jax.lax.rsqrt(var + 1e-5) * gamma + beta


# ----------------------------- fused Pallas kernel ---------------------------

def ds_layer_kernel(eps_ref,                 # SMEM (2,)  [eps_gnn, eps_gnn_pos]
                    adj_ref,                 # VMEM (tm, tk)   bf16 adjacency tile
                    feats_k_ref,             # VMEM (tk, Dp)   bf16 source-node feats
                    feats_i_ref,             # VMEM (tm, Dp)   bf16 dest-node feats
                    res_ref,                 # VMEM (tm, Ep)   f32 residual (x)
                    w1h_ref, w2h_ref,        # h-branch weights (bf16, resident)
                    w1p_ref, w2p_ref,        # p-branch weights (bf16, resident)
                    vec_ref,                 # VMEM (16, Ep) f32 packed vectors
                    h_out_ref, p_out_ref,    # VMEM (tm, Ep) f32 outputs
                    acc_ref,                 # VMEM (tm, Dp) f32 scratch (agg)
                    *, emb_dim, add_residual):
    k = pl.program_id(1)

    @pl.when(k == 0)
    def _():
        acc_ref[...] = jnp.zeros_like(acc_ref)

    # agg[i] += sum_j A[i, j] * feats[j]   (bf16 MXU operands, f32 accumulate)
    acc_ref[...] += jnp.dot(adj_ref[...], feats_k_ref[...],
                            preferred_element_type=jnp.float32)

    @pl.when(k == pl.num_programs(1) - 1)
    def _():
        inv_e = 1.0 / float(emb_dim)
        feats_i = feats_i_ref[...].astype(jnp.float32)
        agg = acc_ref[...]

        def branch(eps, w1_ref, w2_ref, row):
            # GINConv:  (1+eps)*x + aggregate ;  then MLP:
            #   Linear -> LayerNorm -> ReLU -> Linear ;  then DSLayer-level
            #   LayerNorm -> ReLU.  (dropout = identity in eval mode)
            g = (1.0 + eps) * feats_i + agg
            h = jnp.dot(g.astype(jnp.bfloat16), w1_ref[...],
                        preferred_element_type=jnp.float32)
            h = h + vec_ref[row + 0:row + 1, :]
            h = _layernorm(h, vec_ref[row + 1:row + 2, :],
                           vec_ref[row + 2:row + 3, :], inv_e)
            h = jnp.maximum(h, 0.0)
            h = jnp.dot(h.astype(jnp.bfloat16), w2_ref[...],
                        preferred_element_type=jnp.float32)
            h = h + vec_ref[row + 3:row + 4, :]
            h = _layernorm(h, vec_ref[row + 4:row + 5, :],
                           vec_ref[row + 5:row + 6, :], inv_e)
            return jnp.maximum(h, 0.0)

        h = branch(eps_ref[0], w1h_ref, w2h_ref, 0)
        if add_residual:
            h = h + res_ref[...]
        h_out_ref[...] = h
        # p-branch reuses the same agg: its w1 is zero outside the pos rows.
        p_out_ref[...] = branch(eps_ref[1], w1p_ref, w2p_ref, 8)


# ------------------------------ host-side wrapper ----------------------------

def _pack_weights(prm, d_pad, e_pad, row_off, emb_dim):
    """Zero-embed one branch's weight matrices into lane-dense bf16 buffers."""
    in_real = prm["w1"].shape[0]
    w1 = jnp.zeros((d_pad, e_pad), jnp.float32)
    w1 = w1.at[row_off:row_off + in_real, :emb_dim].set(prm["w1"])
    w2 = jnp.zeros((e_pad, e_pad), jnp.float32)
    w2 = w2.at[:emb_dim, :emb_dim].set(prm["w2"])
    return w1.astype(jnp.bfloat16), w2.astype(jnp.bfloat16)


def _pack_vectors(prm_h, prm_p, e_pad, emb_dim):
    """Pack all 12 per-branch vectors into one (16, E_pad) buffer (one DMA)."""
    vecs = jnp.zeros((16, e_pad), jnp.float32)
    names = ("b1", "ln1_g", "ln1_b", "b2", "bn_g", "bn_b")
    for off, prm in ((0, prm_h), (8, prm_p)):
        for r, name in enumerate(names):
            vecs = vecs.at[off + r, :emb_dim].set(prm[name].reshape(-1))
    return vecs


def ds_layer_forward(x, pos_embeddings, edge_index, params, *,
                     eps_gnn=0.0, eps_gnn_pos=0.0, add_residual=True,
                     tm=128, tk=128):
    """DSLayer.forward (eval mode, LayerNorm variant): returns (h, p)."""
    n, in_dim = x.shape
    pos_dim = pos_embeddings.shape[1]
    emb_dim = params["gnn"]["w2"].shape[1]
    cat_dim = in_dim + pos_dim
    if add_residual:
        assert in_dim == emb_dim, "residual add requires in_dim == emb_dim"
    assert tm % 8 == 0 and tk % 128 == 0 and tk % tm == 0

    d_pad = _round_up(cat_dim, 128)      # lane-dense concat feature dim
    e_pad = _round_up(emb_dim, 128)      # lane-dense embedding dim
    n_pad = _round_up(max(n, tk), tk)    # divisible by both tm and tk

    # Dense adjacency A[dst, src] (bf16 multiplicities are exact small ints).
    src, dst = edge_index[0], edge_index[1]
    adj = jnp.zeros((n_pad, n_pad), jnp.float32).at[dst, src].add(1.0)
    adj = adj.astype(jnp.bfloat16)

    # Concatenated node features, zero-padded, bf16 for the MXU.
    feats = jnp.zeros((n_pad, d_pad), jnp.float32)
    feats = feats.at[:n, :in_dim].set(x)
    feats = feats.at[:n, in_dim:cat_dim].set(pos_embeddings)
    feats = feats.astype(jnp.bfloat16)

    # h-branch weights use rows [0:cat_dim); p-branch only rows [in_dim:cat_dim)
    # of the shared (1+eps)*feats + agg tensor.
    w1h, w2h = _pack_weights(params["gnn"], d_pad, e_pad, 0, emb_dim)
    w1p, w2p = _pack_weights(params["gnn_pos"], d_pad, e_pad, in_dim, emb_dim)
    vecs = _pack_vectors(params["gnn"], params["gnn_pos"], e_pad, emb_dim)

    if add_residual:
        res_arr = jnp.zeros((n_pad, e_pad), jnp.float32).at[:n, :in_dim].set(x)
        res_spec = pl.BlockSpec((tm, e_pad), lambda i, k: (i, 0))
    else:
        res_arr = jnp.zeros((8, 128), jnp.float32)       # tiny unused dummy
        res_spec = pl.BlockSpec((8, 128), lambda i, k: (0, 0))

    eps_arr = jnp.asarray([eps_gnn, eps_gnn_pos], dtype=jnp.float32)

    grid = (n_pad // tm, n_pad // tk)
    smem = pl.BlockSpec(memory_space=pltpu.MemorySpace.SMEM)
    def full(shape):
        return pl.BlockSpec(shape, lambda i, k: (0, 0))

    in_specs = [
        smem,                                              # eps scalars
        pl.BlockSpec((tm, tk), lambda i, k: (i, k)),       # adjacency tile
        pl.BlockSpec((tk, d_pad), lambda i, k: (k, 0)),    # feats: source rows
        pl.BlockSpec((tm, d_pad), lambda i, k: (i, 0)),    # feats: dest rows
        res_spec,                                          # residual
        full((d_pad, e_pad)), full((e_pad, e_pad)),        # h-branch weights
        full((d_pad, e_pad)), full((e_pad, e_pad)),        # p-branch weights
        full((16, e_pad)),                                 # packed vectors
    ]
    out_specs = [
        pl.BlockSpec((tm, e_pad), lambda i, k: (i, 0)),
        pl.BlockSpec((tm, e_pad), lambda i, k: (i, 0)),
    ]

    kernel = functools.partial(ds_layer_kernel, emb_dim=emb_dim,
                               add_residual=add_residual)
    h_pad, p_pad = pl.pallas_call(
        kernel,
        out_shape=(jax.ShapeDtypeStruct((n_pad, e_pad), jnp.float32),
                   jax.ShapeDtypeStruct((n_pad, e_pad), jnp.float32)),
        grid_spec=pltpu.PrefetchScalarGridSpec(
            num_scalar_prefetch=0,
            grid=grid,
            in_specs=in_specs,
            out_specs=out_specs,
            scratch_shapes=[pltpu.VMEM((tm, d_pad), jnp.float32)]),
        compiler_params=pltpu.CompilerParams(
            dimension_semantics=("parallel", "arbitrary")),
    )(eps_arr, adj, feats, feats, res_arr,
      w1h, w2h, w1p, w2p, vecs)

    return h_pad[:n, :emb_dim], p_pad[:n, :emb_dim]


# ------------------------------ params / reference ---------------------------

def make_branch_params(key, in_dim, emb_dim):
    k1, k2 = jax.random.split(key)
    s1 = 1.0 / jnp.sqrt(jnp.float32(in_dim))
    s2 = 1.0 / jnp.sqrt(jnp.float32(emb_dim))
    return {
        "w1": jax.random.normal(k1, (in_dim, emb_dim), jnp.float32) * s1,
        "b1": jnp.zeros((emb_dim,), jnp.float32),
        "ln1_g": jnp.ones((emb_dim,), jnp.float32),
        "ln1_b": jnp.zeros((emb_dim,), jnp.float32),
        "w2": jax.random.normal(k2, (emb_dim, emb_dim), jnp.float32) * s2,
        "b2": jnp.zeros((emb_dim,), jnp.float32),
        "bn_g": jnp.ones((emb_dim,), jnp.float32),
        "bn_b": jnp.zeros((emb_dim,), jnp.float32),
    }


def _ref_forward(x, pos, edge_index, params, eps_h, eps_p, add_residual):
    """Pure-JAX reference with the same bf16 MXU-operand convention."""
    n, in_dim = x.shape
    cat_dim = in_dim + pos.shape[1]
    src, dst = edge_index[0], edge_index[1]
    adj = jnp.zeros((n, n), jnp.float32).at[dst, src].add(1.0).astype(jnp.bfloat16)
    feats = jnp.concatenate([x, pos], axis=-1).astype(jnp.bfloat16)
    agg = jnp.dot(adj, feats, preferred_element_type=jnp.float32)
    feats_f = feats.astype(jnp.float32)

    def layernorm(h, gamma, beta):
        inv = 1.0 / h.shape[-1]
        s = jnp.sum(h, -1, keepdims=True)
        sq = jnp.sum(h * h, -1, keepdims=True)
        mean = s * inv
        var = sq * inv - mean * mean
        return (h - mean) * jax.lax.rsqrt(var + 1e-5) * gamma + beta

    def branch(prm, eps, sl):
        g = (1.0 + eps) * feats_f[:, sl] + agg[:, sl]
        h = jnp.dot(g.astype(jnp.bfloat16), prm["w1"].astype(jnp.bfloat16),
                    preferred_element_type=jnp.float32) + prm["b1"]
        h = layernorm(h, prm["ln1_g"], prm["ln1_b"])
        h = jnp.maximum(h, 0.0)
        h = jnp.dot(h.astype(jnp.bfloat16), prm["w2"].astype(jnp.bfloat16),
                    preferred_element_type=jnp.float32) + prm["b2"]
        h = layernorm(h, prm["bn_g"], prm["bn_b"])
        return jnp.maximum(h, 0.0)

    h = branch(params["gnn"], eps_h, slice(0, cat_dim))
    if add_residual:
        h = h + x
    p = branch(params["gnn_pos"], eps_p, slice(in_dim, cat_dim))
    return h, p


# ----------------------------------- main ------------------------------------

if __name__ == "__main__":
    N, IN_DIM, POS_IN_DIM, EMB_DIM, NUM_EDGES = 16, 32, 16, 32, 48

    key = jax.random.PRNGKey(0)
    kx, kp, ke, kg1, kg2 = jax.random.split(key, 5)

    x = jax.random.normal(kx, (N, IN_DIM), jnp.float32)
    pos = jax.random.normal(kp, (N, POS_IN_DIM), jnp.float32)

    # deterministic edge set: ring + random extra edges
    ring_src = jnp.arange(N, dtype=jnp.int32)
    ring_dst = (ring_src + 1) % N
    rnd = jax.random.randint(ke, (2, NUM_EDGES - N), 0, N, dtype=jnp.int32)
    edge_index = jnp.stack(
        [jnp.concatenate([ring_src, rnd[0]]),
         jnp.concatenate([ring_dst, rnd[1]])], axis=0)

    params = {
        "gnn": make_branch_params(kg1, IN_DIM + POS_IN_DIM, EMB_DIM),
        "gnn_pos": make_branch_params(kg2, POS_IN_DIM, EMB_DIM),
    }

    h, p = ds_layer_forward(x, pos, edge_index, params,
                            eps_gnn=0.0, eps_gnn_pos=0.0, add_residual=True)
    jax.block_until_ready((h, p))

    h_ref, p_ref = _ref_forward(x, pos, edge_index, params, 0.0, 0.0, True)
    assert h.shape == (N, EMB_DIM) and p.shape == (N, EMB_DIM)
    assert jnp.allclose(h, h_ref, atol=1e-2, rtol=1e-2)
    assert jnp.allclose(p, p_ref, atol=1e-2, rtol=1e-2)

    print("KERNEL_OK")
</pallas_src>

<mosaic_0001>
module attributes {stable_mosaic.version = 11 : i64} {
  func.func @ds_layer_kernel(%arg0: i32, %arg1: i32, %arg2: memref<2xf32, #tpu.memory_space<smem>>, %arg3: memref<128x128xbf16, #tpu.memory_space<vmem>>, %arg4: memref<128x128xbf16, #tpu.memory_space<vmem>>, %arg5: memref<128x128xbf16, #tpu.memory_space<vmem>>, %arg6: memref<128x128xf32, #tpu.memory_space<vmem>>, %arg7: memref<128x128xbf16, #tpu.memory_space<vmem>>, %arg8: memref<128x128xbf16, #tpu.memory_space<vmem>>, %arg9: memref<128x128xbf16, #tpu.memory_space<vmem>>, %arg10: memref<128x128xbf16, #tpu.memory_space<vmem>>, %arg11: memref<16x128xf32, #tpu.memory_space<vmem>>, %arg12: memref<128x128xf32, #tpu.memory_space<vmem>>, %arg13: memref<128x128xf32, #tpu.memory_space<vmem>>, %arg14: memref<128x128xf32, #tpu.memory_space<vmem>>) attributes {dimension_semantics = [#tpu.dimension_semantics<parallel>, #tpu.dimension_semantics<arbitrary>], iteration_bounds = array<i64: 1, 1>, scalar_prefetch = 0 : i64, scratch_operands = 1 : i64, tpu.core_type = #tpu.core_type<tc>, window_params = [{transform_indices = @transform_0, window_bounds = array<i64: 2>}, {transform_indices = @transform_1, window_bounds = array<i64: 128, 128>}, {transform_indices = @transform_2, window_bounds = array<i64: 128, 128>}, {transform_indices = @transform_3, window_bounds = array<i64: 128, 128>}, {transform_indices = @transform_4, window_bounds = array<i64: 128, 128>}, {pipeline_mode = #tpu.pipeline_mode<synchronous>, transform_indices = @transform_5, window_bounds = array<i64: 128, 128>}, {pipeline_mode = #tpu.pipeline_mode<synchronous>, transform_indices = @transform_6, window_bounds = array<i64: 128, 128>}, {pipeline_mode = #tpu.pipeline_mode<synchronous>, transform_indices = @transform_7, window_bounds = array<i64: 128, 128>}, {pipeline_mode = #tpu.pipeline_mode<synchronous>, transform_indices = @transform_8, window_bounds = array<i64: 128, 128>}, {pipeline_mode = #tpu.pipeline_mode<synchronous>, transform_indices = @transform_9, window_bounds = array<i64: 16, 128>}, {transform_indices = @transform_10, window_bounds = array<i64: 128, 128>}, {transform_indices = @transform_11, window_bounds = array<i64: 128, 128>}]} {
    %c0_i32 = arith.constant 0 : i32
    %0 = arith.cmpi eq, %arg1, %c0_i32 : i32
    %1 = arith.extui %0 : i1 to i32
    %c0_i32_0 = arith.constant 0 : i32
    %2 = arith.cmpi ne, %1, %c0_i32_0 : i32
    scf.if %2 {
      %cst_10 = arith.constant 0.000000e+00 : f32
      %12 = vector.broadcast %cst_10 : f32 to vector<128x128xf32>
      %c0_11 = arith.constant 0 : index
      %c0_12 = arith.constant 0 : index
      %13 = vector.load %arg14[%c0_11, %c0_12] : memref<128x128xf32, #tpu.memory_space<vmem>>, vector<128x128xf32>
      tpu.vector_store %arg14[%c0_11, %c0_12], %12 {strides = array<i32>} : memref<128x128xf32, #tpu.memory_space<vmem>>, vector<128x128xf32>,
    } else {
    }
    %c0 = arith.constant 0 : index
    %c0_1 = arith.constant 0 : index
    %3 = vector.load %arg14[%c0, %c0_1] : memref<128x128xf32, #tpu.memory_space<vmem>>, vector<128x128xf32>
    %c0_2 = arith.constant 0 : index
    %c0_3 = arith.constant 0 : index
    %4 = vector.load %arg3[%c0_2, %c0_3] : memref<128x128xbf16, #tpu.memory_space<vmem>>, vector<128x128xbf16>
    %c0_4 = arith.constant 0 : index
    %c0_5 = arith.constant 0 : index
    %5 = vector.load %arg4[%c0_4, %c0_5] : memref<128x128xbf16, #tpu.memory_space<vmem>>, vector<128x128xbf16>
    %cst = arith.constant dense<0.000000e+00> : vector<128x128xf32>
    %6 = tpu.matmul %4, %5, %cst {dimension_numbers = #tpu.dot_dimension_numbers<[1], [0], [0], [1], [0, 0, 1, 1], [], []>} : vector<128x128xbf16>, vector<128x128xbf16>, vector<128x128xf32> -> vector<128x128xf32>
    %7 = arith.addf %3, %6 : vector<128x128xf32>
    %c0_6 = arith.constant 0 : index
    %c0_7 = arith.constant 0 : index
    %8 = vector.load %arg14[%c0_6, %c0_7] : memref<128x128xf32, #tpu.memory_space<vmem>>, vector<128x128xf32>
    tpu.vector_store %arg14[%c0_6, %c0_7], %7 {strides = array<i32>} : memref<128x128xf32, #tpu.memory_space<vmem>>, vector<128x128xf32>,
    %c0_i32_8 = arith.constant 0 : i32
    %9 = arith.cmpi eq, %arg1, %c0_i32_8 : i32
    %10 = arith.extui %9 : i1 to i32
    %c0_i32_9 = arith.constant 0 : i32
    %11 = arith.cmpi ne, %10, %c0_i32_9 : i32
    scf.if %11 {
      %c0_10 = arith.constant 0 : index
      %c0_11 = arith.constant 0 : index
      %12 = vector.load %arg5[%c0_10, %c0_11] : memref<128x128xbf16, #tpu.memory_space<vmem>>, vector<128x128xbf16>
      %13 = arith.extf %12 : vector<128x128xbf16> to vector<128x128xf32>
      %c0_12 = arith.constant 0 : index
      %c0_13 = arith.constant 0 : index
      %14 = vector.load %arg14[%c0_12, %c0_13] : memref<128x128xf32, #tpu.memory_space<vmem>>, vector<128x128xf32>
      %c0_14 = arith.constant 0 : index
      %15 = memref.load %arg2[%c0_14] : memref<2xf32, #tpu.memory_space<smem>>
      %cst_15 = arith.constant 1.000000e+00 : f32
      %16 = arith.addf %cst_15, %15 : f32
      %17 = vector.broadcast %16 : f32 to vector<128x128xf32>
      %18 = arith.mulf %17, %13 : vector<128x128xf32>
      %19 = arith.addf %18, %14 : vector<128x128xf32>
      %20 = arith.truncf %19 : vector<128x128xf32> to vector<128x128xbf16>
      %c0_16 = arith.constant 0 : index
      %c0_17 = arith.constant 0 : index
      %21 = vector.load %arg7[%c0_16, %c0_17] : memref<128x128xbf16, #tpu.memory_space<vmem>>, vector<128x128xbf16>
      %cst_18 = arith.constant dense<0.000000e+00> : vector<128x128xf32>
      %22 = tpu.matmul %20, %21, %cst_18 {dimension_numbers = #tpu.dot_dimension_numbers<[1], [0], [0], [1], [0, 0, 1, 1], [], []>} : vector<128x128xbf16>, vector<128x128xbf16>, vector<128x128xf32> -> vector<128x128xf32>
      %c0_19 = arith.constant 0 : index
      %c0_20 = arith.constant 0 : index
      %23 = vector.load %arg11[%c0_19, %c0_20] : memref<16x128xf32, #tpu.memory_space<vmem>>, vector<1x128xf32>
      %24 = vector.broadcast %23 : vector<1x128xf32> to vector<128x128xf32>
      %25 = arith.addf %22, %24 : vector<128x128xf32>
      %c1 = arith.constant 1 : index
      %c0_21 = arith.constant 0 : index
      %26 = vector.load %arg11[%c1, %c0_21] : memref<16x128xf32, #tpu.memory_space<vmem>>, vector<1x128xf32>
      %c2 = arith.constant 2 : index
      %c0_22 = arith.constant 0 : index
      %27 = vector.load %arg11[%c2, %c0_22] : memref<16x128xf32, #tpu.memory_space<vmem>>, vector<1x128xf32>
      %cst_23 = arith.constant dense<0.000000e+00> : vector<128xf32>
      %28 = vector.multi_reduction <add>, %25, %cst_23 [1] : vector<128x128xf32> to vector<128xf32>
      %29 = vector.shape_cast %28 : vector<128xf32> to vector<128x1xf32>
      %30 = arith.mulf %25, %25 : vector<128x128xf32>
      %cst_24 = arith.constant dense<0.000000e+00> : vector<128xf32>
      %31 = vector.multi_reduction <add>, %30, %cst_24 [1] : vector<128x128xf32> to vector<128xf32>
      %32 = vector.shape_cast %31 : vector<128xf32> to vector<128x1xf32>
      %cst_25 = arith.constant 3.125000e-02 : f32
      %33 = vector.broadcast %cst_25 : f32 to vector<128x1xf32>
      %34 = arith.mulf %29, %33 : vector<128x1xf32>
      %cst_26 = arith.constant 3.125000e-02 : f32
      %35 = vector.broadcast %cst_26 : f32 to vector<128x1xf32>
      %36 = arith.mulf %32, %35 : vector<128x1xf32>
      %37 = arith.mulf %34, %34 : vector<128x1xf32>
      %38 = arith.subf %36, %37 : vector<128x1xf32>
      %39 = vector.broadcast %34 : vector<128x1xf32> to vector<128x128xf32>
      %40 = arith.subf %25, %39 : vector<128x128xf32>
      %cst_27 = arith.constant 9.99999974E-6 : f32
      %41 = vector.broadcast %cst_27 : f32 to vector<128x1xf32>
      %42 = arith.addf %38, %41 : vector<128x1xf32>
      %43 = math.rsqrt %42 : vector<128x1xf32>
      %44 = vector.broadcast %43 : vector<128x1xf32> to vector<128x128xf32>
      %45 = arith.mulf %40, %44 : vector<128x128xf32>
      %46 = vector.broadcast %26 : vector<1x128xf32> to vector<128x128xf32>
      %47 = arith.mulf %45, %46 : vector<128x128xf32>
      %48 = vector.broadcast %27 : vector<1x128xf32> to vector<128x128xf32>
      %49 = arith.addf %47, %48 : vector<128x128xf32>
      %cst_28 = arith.constant 0.000000e+00 : f32
      %50 = vector.broadcast %cst_28 : f32 to vector<128x128xf32>
      %51 = arith.maximumf %49, %50 : vector<128x128xf32>
      %52 = arith.truncf %51 : vector<128x128xf32> to vector<128x128xbf16>
      %c0_29 = arith.constant 0 : index
      %c0_30 = arith.constant 0 : index
      %53 = vector.load %arg8[%c0_29, %c0_30] : memref<128x128xbf16, #tpu.memory_space<vmem>>, vector<128x128xbf16>
      %cst_31 = arith.constant dense<0.000000e+00> : vector<128x128xf32>
      %54 = tpu.matmul %52, %53, %cst_31 {dimension_numbers = #tpu.dot_dimension_numbers<[1], [0], [0], [1], [0, 0, 1, 1], [], []>} : vector<128x128xbf16>, vector<128x128xbf16>, vector<128x128xf32> -> vector<128x128xf32>
      %c3 = arith.constant 3 : index
      %c0_32 = arith.constant 0 : index
      %55 = vector.load %arg11[%c3, %c0_32] : memref<16x128xf32, #tpu.memory_space<vmem>>, vector<1x128xf32>
      %56 = vector.broadcast %55 : vector<1x128xf32> to vector<128x128xf32>
      %57 = arith.addf %54, %56 : vector<128x128xf32>
      %c4 = arith.constant 4 : index
      %c0_33 = arith.constant 0 : index
      %58 = vector.load %arg11[%c4, %c0_33] : memref<16x128xf32, #tpu.memory_space<vmem>>, vector<1x128xf32>
      %c5 = arith.constant 5 : index
      %c0_34 = arith.constant 0 : index
      %59 = vector.load %arg11[%c5, %c0_34] : memref<16x128xf32, #tpu.memory_space<vmem>>, vector<1x128xf32>
      %cst_35 = arith.constant dense<0.000000e+00> : vector<128xf32>
      %60 = vector.multi_reduction <add>, %57, %cst_35 [1] : vector<128x128xf32> to vector<128xf32>
      %61 = vector.shape_cast %60 : vector<128xf32> to vector<128x1xf32>
      %62 = arith.mulf %57, %57 : vector<128x128xf32>
      %cst_36 = arith.constant dense<0.000000e+00> : vector<128xf32>
      %63 = vector.multi_reduction <add>, %62, %cst_36 [1] : vector<128x128xf32> to vector<128xf32>
      %64 = vector.shape_cast %63 : vector<128xf32> to vector<128x1xf32>
      %cst_37 = arith.constant 3.125000e-02 : f32
      %65 = vector.broadcast %cst_37 : f32 to vector<128x1xf32>
      %66 = arith.mulf %61, %65 : vector<128x1xf32>
      %cst_38 = arith.constant 3.125000e-02 : f32
      %67 = vector.broadcast %cst_38 : f32 to vector<128x1xf32>
      %68 = arith.mulf %64, %67 : vector<128x1xf32>
      %69 = arith.mulf %66, %66 : vector<128x1xf32>
      %70 = arith.subf %68, %69 : vector<128x1xf32>
      %71 = vector.broadcast %66 : vector<128x1xf32> to vector<128x128xf32>
      %72 = arith.subf %57, %71 : vector<128x128xf32>
      %cst_39 = arith.constant 9.99999974E-6 : f32
      %73 = vector.broadcast %cst_39 : f32 to vector<128x1xf32>
      %74 = arith.addf %70, %73 : vector<128x1xf32>
      %75 = math.rsqrt %74 : vector<128x1xf32>
      %76 = vector.broadcast %75 : vector<128x1xf32> to vector<128x128xf32>
      %77 = arith.mulf %72, %76 : vector<128x128xf32>
      %78 = vector.broadcast %58 : vector<1x128xf32> to vector<128x128xf32>
      %79 = arith.mulf %77, %78 : vector<128x128xf32>
      %80 = vector.broadcast %59 : vector<1x128xf32> to vector<128x128xf32>
      %81 = arith.addf %79, %80 : vector<128x128xf32>
      %cst_40 = arith.constant 0.000000e+00 : f32
      %82 = vector.broadcast %cst_40 : f32 to vector<128x128xf32>
      %83 = arith.maximumf %81, %82 : vector<128x128xf32>
      %c0_41 = arith.constant 0 : index
      %c0_42 = arith.constant 0 : index
      %84 = vector.load %arg6[%c0_41, %c0_42] : memref<128x128xf32, #tpu.memory_space<vmem>>, vector<128x128xf32>
      %85 = arith.addf %83, %84 : vector<128x128xf32>
      %c0_43 = arith.constant 0 : index
      %c0_44 = arith.constant 0 : index
      %86 = vector.load %arg12[%c0_43, %c0_44] : memref<128x128xf32, #tpu.memory_space<vmem>>, vector<128x128xf32>
      tpu.vector_store %arg12[%c0_43, %c0_44], %85 {strides = array<i32>} : memref<128x128xf32, #tpu.memory_space<vmem>>, vector<128x128xf32>,
      %c1_45 = arith.constant 1 : index
      %87 = memref.load %arg2[%c1_45] : memref<2xf32, #tpu.memory_space<smem>>
      %cst_46 = arith.constant 1.000000e+00 : f32
      %88 = arith.addf %cst_46, %87 : f32
      %89 = vector.broadcast %88 : f32 to vector<128x128xf32>
      %90 = arith.mulf %89, %13 : vector<128x128xf32>
      %91 = arith.addf %90, %14 : vector<128x128xf32>
      %92 = arith.truncf %91 : vector<128x128xf32> to vector<128x128xbf16>
      %c0_47 = arith.constant 0 : index
      %c0_48 = arith.constant 0 : index
      %93 = vector.load %arg9[%c0_47, %c0_48] : memref<128x128xbf16, #tpu.memory_space<vmem>>, vector<128x128xbf16>
      %cst_49 = arith.constant dense<0.000000e+00> : vector<128x128xf32>
      %94 = tpu.matmul %92, %93, %cst_49 {dimension_numbers = #tpu.dot_dimension_numbers<[1], [0], [0], [1], [0, 0, 1, 1], [], []>} : vector<128x128xbf16>, vector<128x128xbf16>, vector<128x128xf32> -> vector<128x128xf32>
      %c8 = arith.constant 8 : index
      %c0_50 = arith.constant 0 : index
      %95 = vector.load %arg11[%c8, %c0_50] : memref<16x128xf32, #tpu.memory_space<vmem>>, vector<1x128xf32>
      %96 = vector.broadcast %95 : vector<1x128xf32> to vector<128x128xf32>
      %97 = arith.addf %94, %96 : vector<128x128xf32>
      %c9 = arith.constant 9 : index
      %c0_51 = arith.constant 0 : index
      %98 = vector.load %arg11[%c9, %c0_51] : memref<16x128xf32, #tpu.memory_space<vmem>>, vector<1x128xf32>
      %c10 = arith.constant 10 : index
      %c0_52 = arith.constant 0 : index
      %99 = vector.load %arg11[%c10, %c0_52] : memref<16x128xf32, #tpu.memory_space<vmem>>, vector<1x128xf32>
      %cst_53 = arith.constant dense<0.000000e+00> : vector<128xf32>
      %100 = vector.multi_reduction <add>, %97, %cst_53 [1] : vector<128x128xf32> to vector<128xf32>
      %101 = vector.shape_cast %100 : vector<128xf32> to vector<128x1xf32>
      %102 = arith.mulf %97, %97 : vector<128x128xf32>
      %cst_54 = arith.constant dense<0.000000e+00> : vector<128xf32>
      %103 = vector.multi_reduction <add>, %102, %cst_54 [1] : vector<128x128xf32> to vector<128xf32>
      %104 = vector.shape_cast %103 : vector<128xf32> to vector<128x1xf32>
      %cst_55 = arith.constant 3.125000e-02 : f32
      %105 = vector.broadcast %cst_55 : f32 to vector<128x1xf32>
      %106 = arith.mulf %101, %105 : vector<128x1xf32>
      %cst_56 = arith.constant 3.125000e-02 : f32
      %107 = vector.broadcast %cst_56 : f32 to vector<128x1xf32>
      %108 = arith.mulf %104, %107 : vector<128x1xf32>
      %109 = arith.mulf %106, %106 : vector<128x1xf32>
      %110 = arith.subf %108, %109 : vector<128x1xf32>
      %111 = vector.broadcast %106 : vector<128x1xf32> to vector<128x128xf32>
      %112 = arith.subf %97, %111 : vector<128x128xf32>
      %cst_57 = arith.constant 9.99999974E-6 : f32
      %113 = vector.broadcast %cst_57 : f32 to vector<128x1xf32>
      %114 = arith.addf %110, %113 : vector<128x1xf32>
      %115 = math.rsqrt %114 : vector<128x1xf32>
      %116 = vector.broadcast %115 : vector<128x1xf32> to vector<128x128xf32>
      %117 = arith.mulf %112, %116 : vector<128x128xf32>
      %118 = vector.broadcast %98 : vector<1x128xf32> to vector<128x128xf32>
      %119 = arith.mulf %117, %118 : vector<128x128xf32>
      %120 = vector.broadcast %99 : vector<1x128xf32> to vector<128x128xf32>
      %121 = arith.addf %119, %120 : vector<128x128xf32>
      %cst_58 = arith.constant 0.000000e+00 : f32
      %122 = vector.broadcast %cst_58 : f32 to vector<128x128xf32>
      %123 = arith.maximumf %121, %122 : vector<128x128xf32>
      %124 = arith.truncf %123 : vector<128x128xf32> to vector<128x128xbf16>
      %c0_59 = arith.constant 0 : index
      %c0_60 = arith.constant 0 : index
      %125 = vector.load %arg10[%c0_59, %c0_60] : memref<128x128xbf16, #tpu.memory_space<vmem>>, vector<128x128xbf16>
      %cst_61 = arith.constant dense<0.000000e+00> : vector<128x128xf32>
      %126 = tpu.matmul %124, %125, %cst_61 {dimension_numbers = #tpu.dot_dimension_numbers<[1], [0], [0], [1], [0, 0, 1, 1], [], []>} : vector<128x128xbf16>, vector<128x128xbf16>, vector<128x128xf32> -> vector<128x128xf32>
      %c11 = arith.constant 11 : index
      %c0_62 = arith.constant 0 : index
      %127 = vector.load %arg11[%c11, %c0_62] : memref<16x128xf32, #tpu.memory_space<vmem>>, vector<1x128xf32>
      %128 = vector.broadcast %127 : vector<1x128xf32> to vector<128x128xf32>
      %129 = arith.addf %126, %128 : vector<128x128xf32>
      %c12 = arith.constant 12 : index
      %c0_63 = arith.constant 0 : index
      %130 = vector.load %arg11[%c12, %c0_63] : memref<16x128xf32, #tpu.memory_space<vmem>>, vector<1x128xf32>
      %c13 = arith.constant 13 : index
      %c0_64 = arith.constant 0 : index
      %131 = vector.load %arg11[%c13, %c0_64] : memref<16x128xf32, #tpu.memory_space<vmem>>, vector<1x128xf32>
      %cst_65 = arith.constant dense<0.000000e+00> : vector<128xf32>
      %132 = vector.multi_reduction <add>, %129, %cst_65 [1] : vector<128x128xf32> to vector<128xf32>
      %133 = vector.shape_cast %132 : vector<128xf32> to vector<128x1xf32>
      %134 = arith.mulf %129, %129 : vector<128x128xf32>
      %cst_66 = arith.constant dense<0.000000e+00> : vector<128xf32>
      %135 = vector.multi_reduction <add>, %134, %cst_66 [1] : vector<128x128xf32> to vector<128xf32>
      %136 = vector.shape_cast %135 : vector<128xf32> to vector<128x1xf32>
      %cst_67 = arith.constant 3.125000e-02 : f32
      %137 = vector.broadcast %cst_67 : f32 to vector<128x1xf32>
      %138 = arith.mulf %133, %137 : vector<128x1xf32>
      %cst_68 = arith.constant 3.125000e-02 : f32
      %139 = vector.broadcast %cst_68 : f32 to vector<128x1xf32>
      %140 = arith.mulf %136, %139 : vector<128x1xf32>
      %141 = arith.mulf %138, %138 : vector<128x1xf32>
      %142 = arith.subf %140, %141 : vector<128x1xf32>
      %143 = vector.broadcast %138 : vector<128x1xf32> to vector<128x128xf32>
      %144 = arith.subf %129, %143 : vector<128x128xf32>
      %cst_69 = arith.constant 9.99999974E-6 : f32
      %145 = vector.broadcast %cst_69 : f32 to vector<128x1xf32>
      %146 = arith.addf %142, %145 : vector<128x1xf32>
      %147 = math.rsqrt %146 : vector<128x1xf32>
      %148 = vector.broadcast %147 : vector<128x1xf32> to vector<128x128xf32>
      %149 = arith.mulf %144, %148 : vector<128x128xf32>
      %150 = vector.broadcast %130 : vector<1x128xf32> to vector<128x128xf32>
      %151 = arith.mulf %149, %150 : vector<128x128xf32>
      %152 = vector.broadcast %131 : vector<1x128xf32> to vector<128x128xf32>
      %153 = arith.addf %151, %152 : vector<128x128xf32>
      %cst_70 = arith.constant 0.000000e+00 : f32
      %154 = vector.broadcast %cst_70 : f32 to vector<128x128xf32>
      %155 = arith.maximumf %153, %154 : vector<128x128xf32>
      %c0_71 = arith.constant 0 : index
      %c0_72 = arith.constant 0 : index
      %156 = vector.load %arg13[%c0_71, %c0_72] : memref<128x128xf32, #tpu.memory_space<vmem>>, vector<128x128xf32>
      tpu.vector_store %arg13[%c0_71, %c0_72], %155 {strides = array<i32>} : memref<128x128xf32, #tpu.memory_space<vmem>>, vector<128x128xf32>,
    } else {
    }
    return
  }
  func.func @transform_0(%arg0: i32, %arg1: i32) -> i32 {
    %c0_i32 = arith.constant 0 : i32
    %c0_i32_0 = arith.constant 0 : i32
    return %c0_i32 : i32
  }
  func.func @transform_1(%arg0: i32, %arg1: i32) -> (i32, i32) {
    %c0_i32 = arith.constant 0 : i32
    return %arg0, %arg1 : i32, i32
  }
  func.func @transform_2(%arg0: i32, %arg1: i32) -> (i32, i32) {
    %c0_i32 = arith.constant 0 : i32
    %c0_i32_0 = arith.constant 0 : i32
    return %arg1, %c0_i32 : i32, i32
  }
  func.func @transform_3(%arg0: i32, %arg1: i32) -> (i32, i32) {
    %c0_i32 = arith.constant 0 : i32
    %c0_i32_0 = arith.constant 0 : i32
    return %arg0, %c0_i32 : i32, i32
  }
  func.func @transform_4(%arg0: i32, %arg1: i32) -> (i32, i32) {
    %c0_i32 = arith.constant 0 : i32
    %c0_i32_0 = arith.constant 0 : i32
    return %arg0, %c0_i32 : i32, i32
  }
  func.func @transform_5(%arg0: i32, %arg1: i32) -> (i32, i32) {
    %c0_i32 = arith.constant 0 : i32
    %c0_i32_0 = arith.constant 0 : i32
    %c0_i32_1 = arith.constant 0 : i32
    return %c0_i32, %c0_i32_0 : i32, i32
  }
  func.func @transform_6(%arg0: i32, %arg1: i32) -> (i32, i32) {
    %c0_i32 = arith.constant 0 : i32
    %c0_i32_0 = arith.constant 0 : i32
    %c0_i32_1 = arith.constant 0 : i32
    return %c0_i32, %c0_i32_0 : i32, i32
  }
  func.func @transform_7(%arg0: i32, %arg1: i32) -> (i32, i32) {
    %c0_i32 = arith.constant 0 : i32
    %c0_i32_0 = arith.constant 0 : i32
    %c0_i32_1 = arith.constant 0 : i32
    return %c0_i32, %c0_i32_0 : i32, i32
  }
  func.func @transform_8(%arg0: i32, %arg1: i32) -> (i32, i32) {
    %c0_i32 = arith.constant 0 : i32
    %c0_i32_0 = arith.constant 0 : i32
    %c0_i32_1 = arith.constant 0 : i32
    return %c0_i32, %c0_i32_0 : i32, i32
  }
  func.func @transform_9(%arg0: i32, %arg1: i32) -> (i32, i32) {
    %c0_i32 = arith.constant 0 : i32
    %c0_i32_0 = arith.constant 0 : i32
    %c0_i32_1 = arith.constant 0 : i32
    return %c0_i32, %c0_i32_0 : i32, i32
  }
  func.func @transform_10(%arg0: i32, %arg1: i32) -> (i32, i32) {
    %c0_i32 = arith.constant 0 : i32
    %c0_i32_0 = arith.constant 0 : i32
    return %arg0, %c0_i32 : i32, i32
  }
  func.func @transform_11(%arg0: i32, %arg1: i32) -> (i32, i32) {
    %c0_i32 = arith.constant 0 : i32
    %c0_i32_0 = arith.constant 0 : i32
    return %arg0, %c0_i32 : i32, i32
  }
}

</mosaic_0001>

<bundles_post_ra>
// kernel: tpu_custom_call.1
= control target key start
LH: loop header
LB: loop body
LE: loop exit
PB: predicated region body
PF: predicated region fallthrough
CT: control target
= control target key end

     0   :  { %17 = vsyncpa [#allocation6], 0  ;;  %s5321_s0 = inlined_call_operand.hbm [shape: f32[2], index: 0, kind: input, shape index: {}]   ;;  %s5322_s1 = inlined_call_operand.hbm [shape: bf16[128,128], index: 1, kind: input, shape index: {}]   ;;  %s5323_s2 = inlined_call_operand.hbm [shape: bf16[128,128], index: 2, kind: input, shape index: {}]   ;;  %s5324_s3 = inlined_call_operand.hbm [shape: bf16[128,128], index: 3, kind: input, shape index: {}]   ;;  %s5325_s4 = inlined_call_operand.hbm [shape: f32[128,128], index: 4, kind: input, shape index: {}]   ;;  %s5326_s5 = inlined_call_operand.hbm [shape: bf16[128,128], index: 5, kind: input, shape index: {}]   ;;  %s5327_s6 = inlined_call_operand.hbm [shape: bf16[128,128], index: 6, kind: input, shape index: {}]   ;;  %s5328_s7 = inlined_call_operand.hbm [shape: bf16[128,128], index: 7, kind: input, shape index: {}]   ;;  %s5329_s8 = inlined_call_operand.hbm [shape: bf16[128,128], index: 8, kind: input, shape index: {}]   ;;  %s5330_s9 = inlined_call_operand.hbm [shape: f32[16,128], index: 9, kind: input, shape index: {}]   ;;  %s5331_s10 = inlined_call_operand.hbm [shape: f32[128,128], index: 10, kind: output, shape index: {0}]   ;;  %s5332_s11 = inlined_call_operand.hbm [shape: f32[128,128], index: 11, kind: output, shape index: {1}]  }
   0x1   :  { %18 = vsyncpa [#allocation4], 0 }
   0x2   :  { %19 = vsyncpa [#allocation9], 0 }
   0x3   :  { %20 = vsyncpa [#allocation12], 0 }
   0x4   :  { %21 = vsyncpa [#allocation15], 0 }
   0x5   :  { %22 = vsyncpa [#allocation18], 0 }
   0x6   :  { %23 = vsyncpa [#allocation5], 0 }
   0x7   :  { %24 = vsyncpa [#allocation22], 0  ;;  %s51_s19 = sshll.u32 %s5323_s2, 4  ;;  %s3532_s20 = smov [#allocation8]   ;;  %s52_s19 = int_to_ptr.hbm [resolvable:$true] %s51_s19 }
   0x8   :  { %s53_s21 = sshll.u32 %s3532_s20, 4  ;;  %s77_s24 = sshll.u32 %s5325_s4, 4  ;;  %s54_s21 = int_to_ptr.vmem [resolvable:$true] %s53_s21  ;;  %s78_s24 = int_to_ptr.hbm [resolvable:$true] %s77_s24 }
   0x9   :  { %s3533_s25 = smov 64   ;;  %s3534_s26 = smov 4  }
   0xa   :  { %59 = dma.hbm_to_vmem [thread:$0]  %s52_s19, 1024, %s54_s21, [#allocation9], %s3533_s25, %s3533_s25, %s3534_s26  }
   0xb   :  { %s3535_s27 = smov [#allocation11]   ;;  %s3536_s29 = smov 128  }
   0xc   :  { %s79_s28 = sshll.u32 %s3535_s27, 4  ;;  %s3537_s2 = smov 8   ;;  %s80_s28 = int_to_ptr.vmem [resolvable:$true] %s79_s28 }
   0xd   :  { %85 = dma.hbm_to_vmem [thread:$0]  %s78_s24, 2048, %s80_s28, [#allocation12], %s3536_s29, %s3536_s29, %s3537_s2  }
   0xe   :  { %s103_s4 = sshll.u32 %s5327_s6, 4  ;;  %s3538_s13 = smov [#allocation14]   ;;  %s104_s4 = int_to_ptr.hbm [resolvable:$true] %s103_s4 }
   0xf   :  { %s105_s14 = sshll.u32 %s3538_s13, 4  ;;  %s129_s17 = sshll.u32 %s5329_s8, 4  ;;  %s106_s14 = int_to_ptr.vmem [resolvable:$true] %s105_s14  ;;  %s130_s17 = int_to_ptr.hbm [resolvable:$true] %s129_s17 }
  0x10   :  { %111 = dma.hbm_to_vmem [thread:$0]  %s104_s4, 1024, %s106_s14, [#allocation15], %s3533_s25, %s3533_s25, %s3534_s26  }
  0x11   :  { %s3539_s18 = smov [#allocation17]   ;;  %s30_s22 = sshll.u32 %s5321_s0, 4  ;;  %s31_s22 = int_to_ptr.hbm [resolvable:$true] %s30_s22 }
  0x12   :  { %s131_s19 = sshll.u32 %s3539_s18, 4  ;;  %s38_s8 = sshll.u32 %s5322_s1, 4  ;;  %s132_s19 = int_to_ptr.vmem [resolvable:$true] %s131_s19  ;;  %s39_s8 = int_to_ptr.hbm [resolvable:$true] %s38_s8 }
  0x13   :  { %137 = dma.hbm_to_vmem [thread:$0]  %s130_s17, 1024, %s132_s19, [#allocation18], %s3533_s25, %s3533_s25, %s3534_s26  }
  0x14   :  { %s3540_s24 = smov [#allocation3]   ;;  %s3541_s27 = smov [#allocation7]  }
  0x15   :  { %33 = dma.hbm_to_smem %s31_s22, 16, %s3540_s24, [#allocation6]  }
  0x16   :  { %s40_s28 = sshll.u32 %s3541_s27, 4  ;;  %s64_s4 = sshll.u32 %s5324_s3, 4  ;;  %s41_s28 = int_to_ptr.vmem [resolvable:$true] %s40_s28  ;;  %s65_s4 = int_to_ptr.hbm [resolvable:$true] %s64_s4 }
  0x17   :  { %46 = dma.hbm_to_vmem [thread:$0]  %s39_s8, 1024, %s41_s28, [#allocation4], %s3533_s25, %s3533_s25, %s3534_s26  }
  0x18   :  { %s90_s14 = sshll.u32 %s5326_s5, 4  ;;  %s3542_s1 = smov [#allocation10]   ;;  %s91_s14 = int_to_ptr.hbm [resolvable:$true] %s90_s14 }
  0x19   :  { %s66_s15 = sshll.u32 %s3542_s1, 4  ;;  %s3543_s16 = smov [#allocation13]   ;;  %s67_s15 = int_to_ptr.vmem [resolvable:$true] %s66_s15 }
  0x1a   :  { %72 = dma.hbm_to_vmem [thread:$0]  %s65_s4, 1024, %s67_s15, [#allocation9], %s3533_s25, %s3533_s25, %s3534_s26  }
  0x1b   :  { %s92_s3 = sshll.u32 %s3543_s16, 4  ;;  %s116_s19 = sshll.u32 %s5328_s7, 4  ;;  %s93_s3 = int_to_ptr.vmem [resolvable:$true] %s92_s3  ;;  %s117_s19 = int_to_ptr.hbm [resolvable:$true] %s116_s19 }
  0x1c   :  { %98 = dma.hbm_to_vmem [thread:$0]  %s91_s14, 1024, %s93_s3, [#allocation12], %s3533_s25, %s3533_s25, %s3534_s26  }
  0x1d   :  { %s142_s21 = sshll.u32 %s5330_s9, 4  ;;  %s3544_s22 = smov [#allocation16]   ;;  %s143_s21 = int_to_ptr.hbm [resolvable:$true] %s142_s21 }
  0x1e   :  { %s118_s6 = sshll.u32 %s3544_s22, 4  ;;  %s3545_s23 = smov [#allocation19]   ;;  %s119_s6 = int_to_ptr.vmem [resolvable:$true] %s118_s6 }
  0x1f   :  { %124 = dma.hbm_to_vmem [thread:$0]  %s117_s19, 1024, %s119_s6, [#allocation15], %s3533_s25, %s3533_s25, %s3534_s26  }
  0x20   :  { %s144_s7 = sshll.u32 %s3545_s23, 4  ;;  %s145_s7 = int_to_ptr.vmem [resolvable:$true] %s144_s7 }
  0x21   :  { %150 = dma.hbm_to_vmem [thread:$0]  %s143_s21, 256, %s145_s7, [#allocation18], %s3536_s29, %s3536_s29, %s3537_s2  }
  0x22   :  { %3516 = dma.done.wait [#allocation6], 16  }
  0x23   :  { %3517 = vsyncadd [#allocation6], 4294967280 }
  0x24   :  { %3518 = dma.done.wait [#allocation4], 1024  }
  0x25   :  { %3519 = vsyncadd [#allocation4], 4294966272 }
  0x26   :  { %3520 = dma.done.wait [#allocation9], 2048  }
  0x27   :  { %3521 = vsyncadd [#allocation9], 4294965248 }
  0x28   :  { %3522 = dma.done.wait [#allocation12], 3072  }
  0x29   :  { %3523 = vsyncadd [#allocation12], 4294964224 }
  0x2a   :  { %3524 = dma.done.wait [#allocation15], 2048  }
  0x2b   :  { %3525 = vsyncadd [#allocation15], 4294965248 }
  0x2c   :  { %3526 = dma.done.wait [#allocation18], 1280  }
  0x2d   :  { %3527 = vsyncadd [#allocation18], 4294966016 }
  0x2e   :  { %191 = sfence }
  0x2f   :  { %v2980_v0 = vld [vmem:[#allocation8 + $0x38] sm:$0xff]  ;;  %v2979_v1 = vld [vmem:[#allocation8 + $0x30] sm:$0xff]  ;;  %v2978_v2 = vld [vmem:[#allocation8 + $0x28] sm:$0xff]  ;;  %s488_s9 = sld [smem:[#allocation3]]  ;;  %s3546_s24 = smov [#allocation20]  }
  0x30   :  { %356 = vmatpush.bf16.msra.mxu0 %v2980_v0  ;;  %3052 = vmatpush.bf16.msra.mxu1 %v2980_v0  ;;  %v2977_v3 = vld [vmem:[#allocation8 + $0x20] sm:$0xff]  ;;  %v2976_v4 = vld [vmem:[#allocation8 + $0x18] sm:$0xff]  ;;  %v2975_v5 = vld [vmem:[#allocation8 + $0x10] sm:$0xff]  ;;  %s2900_s25 = sld [smem:[#allocation3 + $0x1]]  ;;  %s2734_s27 = sshll.u32 %s3546_s24, 4  ;;  %s2735_s27 = int_to_ptr.vmem [resolvable:$true] %s2734_s27 }
  0x31   :  { %3053 = vmatpush.bf16.msra.mxu2 %v2980_v0  ;;  %3054 = vmatpush.bf16.msra.mxu3 %v2980_v0  ;;  %v2974_v6 = vld [vmem:[#allocation8 + $0x8] sm:$0xff]  ;;  %v2973_v7 = vld [vmem:[#allocation8] sm:$0xff]  ;;  %v2988_v8 = vld [vmem:[#allocation13 + $0x38] sm:$0xff]  ;;  %s2736_s12 = sshll.u32 %s5331_s10, 4  ;;  %s3547_s10 = smov [#allocation21]   ;;  %s2737_s12 = int_to_ptr.hbm [resolvable:$true] %s2736_s12 }
  0x32   :  { %v3004_v9 = vld [vmem:[#allocation16 + $0x38] sm:$0xff]  ;;  %v2965_v10 = vld [vmem:[#allocation7] sm:$0xff]  ;;  %v2967_v11 = vld [vmem:[#allocation7 + $0x10] sm:$0xff]  ;;  %s2747_s4 = sshll.u32 %s3547_s10, 4  ;;  %s2749_s14 = sshll.u32 %s5332_s11, 4  ;;  %s2748_s4 = int_to_ptr.vmem [resolvable:$true] %s2747_s4  ;;  %s2750_s14 = int_to_ptr.hbm [resolvable:$true] %s2749_s14 }
  0x33   :  { %v2969_v12 = vld [vmem:[#allocation7 + $0x20] sm:$0xff]  ;;  %v2971_v13 = vld [vmem:[#allocation7 + $0x30] sm:$0xff]  ;;  %v2986_v16 = vld [vmem:[#allocation13 + $0x28] sm:$0xff] }
  0x34   :  { %357 = vmatpush.bf16.msra.mxu0 %v2979_v1  ;;  %3055 = vmatpush.bf16.msra.mxu1 %v2979_v1  ;;  %v2987_v14 = vld [vmem:[#allocation13 + $0x30] sm:$0xff]  ;;  %v3002_v17 = vld [vmem:[#allocation16 + $0x28] sm:$0xff]  ;;  %v2985_v18 = vld [vmem:[#allocation13 + $0x20] sm:$0xff] }
  0x35   :  { %3056 = vmatpush.bf16.msra.mxu2 %v2979_v1  ;;  %3057 = vmatpush.bf16.msra.mxu3 %v2979_v1  ;;  %v3003_v15 = vld [vmem:[#allocation16 + $0x30] sm:$0xff]  ;;  %v3001_v19 = vld [vmem:[#allocation16 + $0x20] sm:$0xff]  ;;  %v2984_v20 = vld [vmem:[#allocation13 + $0x18] sm:$0xff]  ;;  %s489_s26 = sadd.f32 1.0, %s488_s9 }
  0x36   :  { %v3000_v21 = vld [vmem:[#allocation16 + $0x18] sm:$0xff]  ;;  %v2966_v22 = vld [vmem:[#allocation7 + $0x8] sm:$0xff]  ;;  %v2983_v26 = vld [vmem:[#allocation13 + $0x10] sm:$0xff]  ;;  %s1626_s8 = sadd.f32 1.0, %s2900_s25 }
  0x37   :  { %v2968_v23 = vld [vmem:[#allocation7 + $0x18] sm:$0xff]  ;;  %v2970_v24 = vld [vmem:[#allocation7 + $0x28] sm:$0xff]  ;;  %v2999_v27 = vld [vmem:[#allocation16 + $0x10] sm:$0xff]  ;;  %v3665_v36 = vstv %s489_s26 }
  0x38   :  { %358 = vmatpush.bf16.msra.mxu0 %v2978_v2  ;;  %3058 = vmatpush.bf16.msra.mxu1 %v2978_v2  ;;  %v2972_v25 = vld [vmem:[#allocation7 + $0x38] sm:$0xff]  ;;  %v2982_v28 = vld [vmem:[#allocation13 + $0x8] sm:$0xff]  ;;  %v2981_v30 = vld [vmem:[#allocation13] sm:$0xff]  ;;  %v3667_v37 = vstv %s1626_s8 }
  0x39   :  { %3059 = vmatpush.bf16.msra.mxu2 %v2978_v2  ;;  %3060 = vmatpush.bf16.msra.mxu3 %v2978_v2  ;;  %v2998_v29 = vld [vmem:[#allocation16 + $0x8] sm:$0xff]  ;;  %v2997_v31 = vld [vmem:[#allocation16] sm:$0xff]  ;;  %v3046_v63 = vld [vmem:[#allocation10 + $0x10] sm:$0xff]  }
  0x3a   :  { %v3014_v32 = vld [vmem:[#allocation10] sm:$0xff]   ;;  %v3045_v49 = vld [vmem:[#allocation10 + $0x8] sm:$0xff]   ;;  %v3023_v2 = vunpack.c.l.bf16 %v3046_v63 }
  0x3b   :  { %v3015_v34 = vunpack.c.l.bf16 %v3014_v32  ;;  %v3016_v35 = vunpack.c.h.bf16 %v3014_v32  ;;  %v3019_v51 = vunpack.c.l.bf16 %v3045_v49  ;;  %v3020_v52 = vunpack.c.h.bf16 %v3045_v49 }
  0x3c   :  { %359 = vmatpush.bf16.msra.mxu0 %v2977_v3  ;;  %3061 = vmatpush.bf16.msra.mxu1 %v2977_v3 }
  0x3d   :  { %3062 = vmatpush.bf16.msra.mxu2 %v2977_v3  ;;  %3063 = vmatpush.bf16.msra.mxu3 %v2977_v3  ;;  %v491_v38 = vmul.f32 %v3015_v34, %v3665_v36  ;;  %v1628_v39 = vmul.f32 %v3015_v34, %v3667_v37  ;;  %v492_v40 = vmul.f32 %v3016_v35, %v3665_v36  ;;  %v3024_v3 = vunpack.c.h.bf16 %v3046_v63  ;;  %v3050_v63 = vld [vmem:[#allocation10 + $0x30] sm:$0xff]  }
  0x3e   :  { %v1629_v41 = vmul.f32 %v3016_v35, %v3667_v37  ;;  %v493_v54 = vmul.f32 %v3019_v51, %v3665_v36  ;;  %v1630_v55 = vmul.f32 %v3019_v51, %v3667_v37  ;;  %v494_v56 = vmul.f32 %v3020_v52, %v3665_v36 }
  0x3f   :  { %v1631_v57 = vmul.f32 %v3020_v52, %v3667_v37 }
  0x40   :  { %360 = vmatpush.bf16.msra.mxu0 %v2976_v4  ;;  %3064 = vmatpush.bf16.msra.mxu1 %v2976_v4 }
  0x41   :  { %3065 = vmatpush.bf16.msra.mxu2 %v2976_v4  ;;  %3066 = vmatpush.bf16.msra.mxu3 %v2976_v4 }
  0x44   :  { %361 = vmatpush.bf16.msra.mxu0 %v2975_v5  ;;  %3067 = vmatpush.bf16.msra.mxu1 %v2975_v5 }
  0x45   :  { %3068 = vmatpush.bf16.msra.mxu2 %v2975_v5  ;;  %3069 = vmatpush.bf16.msra.mxu3 %v2975_v5  ;;  %v495_v5 = vmul.f32 %v3023_v2, %v3665_v36 }
  0x48   :  { %362 = vmatpush.bf16.msra.mxu0 %v2974_v6  ;;  %3070 = vmatpush.bf16.msra.mxu1 %v2974_v6 }
  0x49   :  { %3071 = vmatpush.bf16.msra.mxu2 %v2974_v6  ;;  %3072 = vmatpush.bf16.msra.mxu3 %v2974_v6  ;;  %v1632_v6 = vmul.f32 %v3023_v2, %v3667_v37 }
  0x4c   :  { %363 = vmatpush.bf16.msra.mxu0 %v2973_v7  ;;  %3073 = vmatpush.bf16.msra.mxu1 %v2973_v7 }
  0x4d   :  { %3074 = vmatpush.bf16.msra.mxu2 %v2973_v7  ;;  %3075 = vmatpush.bf16.msra.mxu3 %v2973_v7  ;;  %v496_v7 = vmul.f32 %v3024_v3, %v3665_v36 }
  0x4f   :  { %364 = vmatmul.bf16.vlgmr.msra.gmra.mxu0 %v2965_v10  ;;  %374 = vmatmul.bf16.vlgmr.msra.gmra.mxu1 %v2967_v11 }
  0x50   :  { %597 = vmatpush.bf16.msrb.mxu1 %v2988_v8  ;;  %384 = vmatmul.bf16.vlgmr.msra.gmra.mxu2 %v2969_v12  ;;  %v1633_v8 = vmul.f32 %v3024_v3, %v3667_v37 }
  0x51   :  { %1734 = vmatpush.bf16.msrb.mxu3 %v3004_v9 }
  0x52   :  { %394 = vmatmul.bf16.vlgmr.msra.gmra.mxu3 %v2971_v13 }
  0x54   :  { %598 = vmatpush.bf16.msrb.mxu1 %v2987_v14 }
  0x55   :  { %1735 = vmatpush.bf16.msrb.mxu3 %v3003_v15 }
  0x58   :  { %599 = vmatpush.bf16.msrb.mxu1 %v2986_v16  ;;  %v3047_v16 = vld [vmem:[#allocation10 + $0x18] sm:$0xff]  }
  0x59   :  { %1736 = vmatpush.bf16.msrb.mxu3 %v3002_v17  ;;  %v3027_v17 = vunpack.c.l.bf16 %v3047_v16 }
  0x5c   :  { %600 = vmatpush.bf16.msrb.mxu1 %v2985_v18  ;;  %v3028_v18 = vunpack.c.h.bf16 %v3047_v16 }
  0x5d   :  { %1737 = vmatpush.bf16.msrb.mxu3 %v3001_v19  ;;  %v497_v19 = vmul.f32 %v3027_v17, %v3665_v36 }
  0x5f   :  { %369 = vmatmul.bf16.gmra.mxu0 %v2966_v22  ;;  %379 = vmatmul.bf16.gmra.mxu1 %v2968_v23  ;;  %v1635_v22 = vmul.f32 %v3028_v18, %v3667_v37 }
  0x60   :  { %601 = vmatpush.bf16.msrb.mxu1 %v2984_v20  ;;  %389 = vmatmul.bf16.gmra.mxu2 %v2970_v24  ;;  %v1634_v20 = vmul.f32 %v3027_v17, %v3667_v37 }
  0x61   :  { %1738 = vmatpush.bf16.msrb.mxu3 %v3000_v21  ;;  %v498_v21 = vmul.f32 %v3028_v18, %v3665_v36 }
  0x62   :  { %399 = vmatmul.bf16.gmra.mxu3 %v2972_v25 }
  0x64   :  { %602 = vmatpush.bf16.msrb.mxu1 %v2983_v26 }
  0x65   :  { %1739 = vmatpush.bf16.msrb.mxu3 %v2999_v27 }
  0x68   :  { %603 = vmatpush.bf16.msrb.mxu1 %v2982_v28 }
  0x69   :  { %1740 = vmatpush.bf16.msrb.mxu3 %v2998_v29 }
  0x6c   :  { %604 = vmatpush.bf16.msrb.mxu1 %v2981_v30 }
  0x6d   :  { %1741 = vmatpush.bf16.msrb.mxu3 %v2997_v31  ;;  %v3048_v31 = vld [vmem:[#allocation10 + $0x20] sm:$0xff]  }
  0x6e   :  { %v3031_v32 = vunpack.c.l.bf16 %v3048_v31 }
  0x70   :  { %v499_v35 = vmul.f32 %v3031_v32, %v3665_v36 }
  0xcc   :  { %v365_v33 = vpop.f32.mrf.mxu0  ;;  %v375_v53 = vpop.f32.mrf.mxu1 }
  0xcd   :  { %v507_v43 = vadd.f32 %v491_v38, %v365_v33  ;;  %v1644_v44 = vadd.f32 %v1628_v39, %v365_v33  ;;  %v511_v9 = vadd.f32 %v495_v5, %v375_v53  ;;  %v1648_v10 = vadd.f32 %v1632_v6, %v375_v53 }
  0xce   :  { %v3032_v33 = vunpack.c.h.bf16 %v3048_v31  ;;  %v1636_v38 = vmul.f32 %v3031_v32, %v3667_v37 }
  0xd0   :  { %v500_v39 = vmul.f32 %v3032_v33, %v3665_v36 }
  0xd3   :  { %v385_v24 = vpop.f32.mrf.mxu2 }
  0xd4   :  { %v367_v42 = vpop.f32.mrf.mxu0  ;;  %v377_v4 = vpop.f32.mrf.mxu1 }
  0xd5   :  { %v508_v45 = vadd.f32 %v492_v40, %v367_v42  ;;  %v1645_v46 = vadd.f32 %v1629_v41, %v367_v42  ;;  %v512_v11 = vadd.f32 %v496_v7, %v377_v4  ;;  %v1649_v12 = vadd.f32 %v1633_v8, %v377_v4 }
  0xd6   :  { %v1637_v40 = vmul.f32 %v3032_v33, %v3667_v37  ;;  %v515_v41 = vadd.f32 %v499_v35, %v385_v24  ;;  %v1652_v42 = vadd.f32 %v1636_v38, %v385_v24 }
  0xd7   :  { %v523_v47 = vpack.c.bf16 %v508_v45, %v507_v43  ;;  %v1660_v48 = vpack.c.bf16 %v1645_v46, %v1644_v44  ;;  %v525_v14 = vpack.c.bf16 %v512_v11, %v511_v9  ;;  %v1662_v15 = vpack.c.bf16 %v1649_v12, %v1648_v10 }
  0xd9   :  { %605 = vmatmul.bf16.vlgmr.msrb.gmra.mxu1 %v523_v47  ;;  %1742 = vmatmul.bf16.vlgmr.msrb.gmra.mxu3 %v1660_v48  ;;  %v3049_v48 = vld [vmem:[#allocation10 + $0x28] sm:$0xff]  }
  0xda   :  { %v3035_v49 = vunpack.c.l.bf16 %v3049_v48 }
  0xdb   :  { %v387_v34 = vpop.f32.mrf.mxu2 }
  0xdc   :  { %v370_v50 = vpop.f32.mrf.mxu0  ;;  %v380_v13 = vpop.f32.mrf.mxu1  ;;  %v516_v43 = vadd.f32 %v500_v39, %v387_v34  ;;  %v1653_v44 = vadd.f32 %v1637_v40, %v387_v34  ;;  %v501_v51 = vmul.f32 %v3035_v49, %v3665_v36  ;;  %v1638_v52 = vmul.f32 %v3035_v49, %v3667_v37 }
  0xdd   :  { %v509_v59 = vadd.f32 %v493_v54, %v370_v50  ;;  %v1646_v60 = vadd.f32 %v1630_v55, %v370_v50  ;;  %v513_v25 = vadd.f32 %v497_v19, %v380_v13  ;;  %v1650_v26 = vadd.f32 %v1634_v20, %v380_v13 }
  0xde   :  { %v527_v46 = vpack.c.bf16 %v516_v43, %v515_v41  ;;  %v1664_v47 = vpack.c.bf16 %v1653_v44, %v1652_v42  ;;  %v3036_v50 = vunpack.c.h.bf16 %v3049_v48 }
  0xe0   :  { %v502_v53 = vmul.f32 %v3036_v50, %v3665_v36  ;;  %v1639_v54 = vmul.f32 %v3036_v50, %v3667_v37 }
  0xe3   :  { %v390_v45 = vpop.f32.mrf.mxu2 }
  0xe4   :  { %v372_v58 = vpop.f32.mrf.mxu0  ;;  %v382_v23 = vpop.f32.mrf.mxu1 }
  0xe5   :  { %v510_v61 = vadd.f32 %v494_v56, %v372_v58  ;;  %v1647_v62 = vadd.f32 %v1631_v57, %v372_v58  ;;  %v514_v27 = vadd.f32 %v498_v21, %v382_v23  ;;  %v1651_v28 = vadd.f32 %v1635_v22, %v382_v23  ;;  %v395_v56 = vpop.f32.mrf.mxu3 }
  0xe6   :  { %v517_v57 = vadd.f32 %v501_v51, %v390_v45  ;;  %v1654_v58 = vadd.f32 %v1638_v52, %v390_v45 }
  0xe7   :  { %v524_v0 = vpack.c.bf16 %v510_v61, %v509_v59  ;;  %v1661_v1 = vpack.c.bf16 %v1647_v62, %v1646_v60  ;;  %v526_v29 = vpack.c.bf16 %v514_v27, %v513_v25  ;;  %v1663_v30 = vpack.c.bf16 %v1651_v28, %v1650_v26  ;;  %v3701_v28 = vld [vmem:[#allocation19] ss:$0 sm:$0xff] }
  0xe9   :  { %610 = vmatmul.bf16.gmra.mxu1 %v524_v0  ;;  %1747 = vmatmul.bf16.gmra.mxu3 %v1661_v1  ;;  %v3039_v0 = vunpack.c.l.bf16 %v3050_v63  ;;  %v3040_v1 = vunpack.c.h.bf16 %v3050_v63 }
  0xeb   :  { %v392_v55 = vpop.f32.mrf.mxu2  ;;  %v503_v3 = vmul.f32 %v3039_v0, %v3665_v36  ;;  %v1640_v4 = vmul.f32 %v3039_v0, %v3667_v37  ;;  %v504_v5 = vmul.f32 %v3040_v1, %v3665_v36  ;;  %v1641_v6 = vmul.f32 %v3040_v1, %v3667_v37 }
  0xec   :  { %v518_v59 = vadd.f32 %v502_v53, %v392_v55  ;;  %v1655_v60 = vadd.f32 %v1639_v54, %v392_v55 }
  0xed   :  { %v397_v2 = vpop.f32.mrf.mxu3  ;;  %v519_v7 = vadd.f32 %v503_v3, %v395_v56  ;;  %v1656_v8 = vadd.f32 %v1640_v4, %v395_v56 }
  0xee   :  { %v528_v61 = vpack.c.bf16 %v518_v59, %v517_v57  ;;  %v1665_v62 = vpack.c.bf16 %v1655_v60, %v1654_v58  ;;  %v520_v9 = vadd.f32 %v504_v5, %v397_v2  ;;  %v1657_v10 = vadd.f32 %v1641_v6, %v397_v2 }
  0xf0   :  { %v529_v12 = vpack.c.bf16 %v520_v9, %v519_v7  ;;  %v1666_v13 = vpack.c.bf16 %v1657_v10, %v1656_v8 }
  0xf5   :  { %v400_v11 = vpop.f32.mrf.mxu3 }
  0xf9   :  { %615 = vmatmul.bf16.gmra.mxu1 %v525_v14  ;;  %1752 = vmatmul.bf16.gmra.mxu3 %v1662_v15  ;;  %v3051_v14 = vld [vmem:[#allocation10 + $0x38] sm:$0xff]  }
  0xfa   :  { %v3043_v15 = vunpack.c.l.bf16 %v3051_v14  ;;  %v3044_v16 = vunpack.c.h.bf16 %v3051_v14 }
  0xfc   :  { %v505_v17 = vmul.f32 %v3043_v15, %v3665_v36  ;;  %v1642_v18 = vmul.f32 %v3043_v15, %v3667_v37  ;;  %v506_v19 = vmul.f32 %v3044_v16, %v3665_v36  ;;  %v1643_v20 = vmul.f32 %v3044_v16, %v3667_v37  ;;  %v3709_v37 = vld [vmem:[#allocation19 + $0x8] ss:$0 sm:$0xff] }
  0xfd   :  { %v402_v21 = vpop.f32.mrf.mxu3 }
  0xfe   :  { %v521_v22 = vadd.f32 %v505_v17, %v400_v11  ;;  %v1658_v23 = vadd.f32 %v1642_v18, %v400_v11  ;;  %v522_v24 = vadd.f32 %v506_v19, %v402_v21  ;;  %v1659_v25 = vadd.f32 %v1643_v20, %v402_v21 }
 0x100   :  { %v530_v26 = vpack.c.bf16 %v522_v24, %v521_v22  ;;  %v1667_v27 = vpack.c.bf16 %v1659_v25, %v1658_v23  ;;  %v2996_v24 = vld [vmem:[#allocation14 + $0x38] sm:$0xff] }
 0x101   :  { %1124 = vmatpush.bf16.msrb.mxu2 %v2996_v24 }
 0x109   :  { %620 = vmatmul.bf16.gmra.mxu1 %v526_v29  ;;  %1757 = vmatmul.bf16.gmra.mxu3 %v1663_v30 }
 0x119   :  { %625 = vmatmul.bf16.gmra.mxu1 %v527_v46  ;;  %1762 = vmatmul.bf16.gmra.mxu3 %v1664_v47 }
 0x129   :  { %630 = vmatmul.bf16.gmra.mxu1 %v528_v61  ;;  %1767 = vmatmul.bf16.gmra.mxu3 %v1665_v62 }
 0x139   :  { %635 = vmatmul.bf16.gmra.mxu1 %v529_v12  ;;  %1772 = vmatmul.bf16.gmra.mxu3 %v1666_v13 }
 0x149   :  { %640 = vmatmul.bf16.gmra.mxu1 %v530_v26  ;;  %1777 = vmatmul.bf16.gmra.mxu3 %v1667_v27  ;;  %v2995_v27 = vld [vmem:[#allocation14 + $0x30] sm:$0xff] }
 0x14a   :  { %1125 = vmatpush.bf16.msrb.mxu2 %v2995_v27 }
 0x156   :  { %v606_v29 = vpop.f32.mrf.mxu1 }
 0x157   :  { %v3704_v30 = vadd.f32 %v3701_v28, %v606_v29 }
 0x159   :  { %648 = vadd.xlane.f32.xlu0 %v3704_v30  ;;  %v680_v36 = vmul.f32 %v3704_v30, %v3704_v30 }
 0x15b   :  { %696 = vadd.xlane.f32.xlu1 %v680_v36 }
 0x15c   :  { %v1743_v31 = vpop.f32.mrf.mxu3 }
 0x15d   :  { %v3712_v32 = vadd.f32 %v3709_v37, %v1743_v31  ;;  %v2994_v31 = vld [vmem:[#allocation14 + $0x28] sm:$0xff] }
 0x15e   :  { %v608_v33 = vpop.f32.mrf.mxu1  ;;  %1126 = vmatpush.bf16.msrb.mxu2 %v2994_v31 }
 0x15f   :  { %v3715_v34 = vadd.f32 %v3701_v28, %v608_v33  ;;  %1785 = vadd.xlane.f32.xlu2 %v3712_v32  ;;  %v1817_v40 = vmul.f32 %v3712_v32, %v3712_v32  ;;  %v3012_v33 = vld [vmem:[#allocation17 + $0x38] sm:$0xff] }
 0x160   :  { %2261 = vmatpush.bf16.msrb.mxu0 %v3012_v33 }
 0x161   :  { %650 = vadd.xlane.f32.xlu0 %v3715_v34  ;;  %v681_v35 = vmul.f32 %v3715_v34, %v3715_v34 }
 0x163   :  { %698 = vadd.xlane.f32.xlu1 %v681_v35 }
 0x164   :  { %v1745_v38 = vpop.f32.mrf.mxu3 }
 0x165   :  { %v3722_v39 = vadd.f32 %v3709_v37, %v1745_v38 }
 0x166   :  { %v611_v42 = vpop.f32.mrf.mxu1 }
 0x167   :  { %1787 = vadd.xlane.f32.xlu2 %v3722_v39  ;;  %v1818_v41 = vmul.f32 %v3722_v39, %v3722_v39  ;;  %v3730_v44 = vadd.f32 %v3701_v28, %v611_v42  ;;  %v3011_v42 = vld [vmem:[#allocation17 + $0x30] sm:$0xff] }
 0x168   :  { %2262 = vmatpush.bf16.msrb.mxu0 %v3011_v42 }
 0x169   :  { %1833 = vadd.xlane.f32.xlu0 %v1817_v40  ;;  %v682_v46 = vmul.f32 %v3730_v44, %v3730_v44 }
 0x16b   :  { %1835 = vadd.xlane.f32.xlu1 %v1818_v41  ;;  %v2993_v41 = vld [vmem:[#allocation14 + $0x20] sm:$0xff] }
 0x16c   :  { %v1748_v43 = vpop.f32.mrf.mxu3  ;;  %1127 = vmatpush.bf16.msrb.mxu2 %v2993_v41 }
 0x16d   :  { %v3733_v45 = vadd.f32 %v3709_v37, %v1748_v43 }
 0x16e   :  { %v613_v47 = vpop.f32.mrf.mxu1 }
 0x16f   :  { %652 = vadd.xlane.f32.xlu2 %v3730_v44  ;;  %v1819_v48 = vmul.f32 %v3733_v45, %v3733_v45  ;;  %v3742_v50 = vadd.f32 %v3701_v28, %v613_v47  ;;  %v2992_v47 = vld [vmem:[#allocation14 + $0x18] sm:$0xff] }
 0x170   :  { %1128 = vmatpush.bf16.msrb.mxu2 %v2992_v47 }
 0x171   :  { %1789 = vadd.xlane.f32.xlu0 %v3733_v45  ;;  %v683_v52 = vmul.f32 %v3742_v50, %v3742_v50 }
 0x173   :  { %700 = vadd.xlane.f32.xlu1 %v682_v46 }
 0x174   :  { %v1750_v49 = vpop.f32.mrf.mxu3 }
 0x175   :  { %v3745_v51 = vadd.f32 %v3709_v37, %v1750_v49 }
 0x176   :  { %v616_v53 = vpop.f32.mrf.mxu1 }
 0x177   :  { %1837 = vadd.xlane.f32.xlu2 %v1819_v48  ;;  %v1820_v54 = vmul.f32 %v3745_v51, %v3745_v51  ;;  %v3754_v55 = vadd.f32 %v3701_v28, %v616_v53  ;;  %v3010_v48 = vld [vmem:[#allocation17 + $0x28] sm:$0xff] }
 0x178   :  { %2263 = vmatpush.bf16.msrb.mxu0 %v3010_v48 }
 0x179   :  { %654 = vadd.xlane.f32.xlu0 %v3742_v50  ;;  %v684_v58 = vmul.f32 %v3754_v55, %v3754_v55 }
 0x17b   :  { %1791 = vadd.xlane.f32.xlu1 %v3745_v51 }
 0x17c   :  { %v1753_v56 = vpop.f32.mrf.mxu3 }
 0x17d   :  { %v3758_v57 = vadd.f32 %v3709_v37, %v1753_v56  ;;  %v2991_v56 = vld [vmem:[#allocation14 + $0x10] sm:$0xff] }
 0x17e   :  { %v618_v59 = vpop.f32.mrf.mxu1  ;;  %1129 = vmatpush.bf16.msrb.mxu2 %v2991_v56 }
 0x17f   :  { %702 = vadd.xlane.f32.xlu2 %v683_v52  ;;  %v1821_v60 = vmul.f32 %v3758_v57, %v3758_v57  ;;  %v3766_v62 = vadd.f32 %v3701_v28, %v618_v59 }
 0x181   :  { %1839 = vadd.xlane.f32.xlu0 %v1820_v54  ;;  %v685_v0 = vmul.f32 %v3766_v62, %v3766_v62 }
 0x183   :  { %656 = vadd.xlane.f32.xlu1 %v3754_v55 }
 0x184   :  { %v1755_v61 = vpop.f32.mrf.mxu3 }
 0x185   :  { %v3769_v63 = vadd.f32 %v3709_v37, %v1755_v61 }
 0x186   :  { %v621_v1 = vpop.f32.mrf.mxu1 }
 0x187   :  { %1793 = vadd.xlane.f32.xlu2 %v3758_v57  ;;  %v1822_v2 = vmul.f32 %v3769_v63, %v3769_v63  ;;  %v3778_v3 = vadd.f32 %v3701_v28, %v621_v1 }
 0x189   :  { %704 = vadd.xlane.f32.xlu0 %v684_v58  ;;  %v686_v7 = vmul.f32 %v3778_v3, %v3778_v3  ;;  %v3009_v58 = vld [vmem:[#allocation17 + $0x20] sm:$0xff] }
 0x18a   :  { %2264 = vmatpush.bf16.msrb.mxu0 %v3009_v58 }
 0x18b   :  { %1841 = vadd.xlane.f32.xlu1 %v1821_v60 }
 0x18c   :  { %v1758_v4 = vpop.f32.mrf.mxu3 }
 0x18d   :  { %v3781_v5 = vadd.f32 %v3709_v37, %v1758_v4 }
 0x18e   :  { %v623_v6 = vpop.f32.mrf.mxu1 }
 0x18f   :  { %658 = vadd.xlane.f32.xlu2 %v3766_v62  ;;  %v1823_v8 = vmul.f32 %v3781_v5, %v3781_v5  ;;  %v3790_v9 = vadd.f32 %v3701_v28, %v623_v6  ;;  %v2990_v6 = vld [vmem:[#allocation14 + $0x8] sm:$0xff] }
 0x190   :  { %1130 = vmatpush.bf16.msrb.mxu2 %v2990_v6 }
 0x191   :  { %1795 = vadd.xlane.f32.xlu0 %v3769_v63  ;;  %v687_v13 = vmul.f32 %v3790_v9, %v3790_v9 }
 0x193   :  { %706 = vadd.xlane.f32.xlu1 %v685_v0 }
 0x194   :  { %v1760_v10 = vpop.f32.mrf.mxu3 }
 0x195   :  { %v3794_v11 = vadd.f32 %v3709_v37, %v1760_v10 }
 0x196   :  { %v626_v12 = vpop.f32.mrf.mxu1 }
 0x197   :  { %1843 = vadd.xlane.f32.xlu2 %v1822_v2  ;;  %v1824_v14 = vmul.f32 %v3794_v11, %v3794_v11  ;;  %v3802_v15 = vadd.f32 %v3701_v28, %v626_v12 }
 0x199   :  { %660 = vadd.xlane.f32.xlu0 %v3778_v3  ;;  %v688_v19 = vmul.f32 %v3802_v15, %v3802_v15 }
 0x19b   :  { %1797 = vadd.xlane.f32.xlu1 %v3781_v5 }
 0x19c   :  { %v1763_v16 = vpop.f32.mrf.mxu3 }
 0x19d   :  { %v3805_v17 = vadd.f32 %v3709_v37, %v1763_v16  ;;  %v3007_v16 = vld [vmem:[#allocation17 + $0x10] sm:$0xff] }
 0x19e   :  { %v628_v18 = vpop.f32.mrf.mxu1 }
 0x19f   :  { %708 = vadd.xlane.f32.xlu2 %v686_v7  ;;  %v1825_v20 = vmul.f32 %v3805_v17, %v3805_v17  ;;  %v3814_v21 = vadd.f32 %v3701_v28, %v628_v18  ;;  %v3008_v7 = vld [vmem:[#allocation17 + $0x18] sm:$0xff] }
 0x1a0   :  { %2265 = vmatpush.bf16.msrb.mxu0 %v3008_v7 }
 0x1a1   :  { %1845 = vadd.xlane.f32.xlu0 %v1823_v8  ;;  %v689_v26 = vmul.f32 %v3814_v21, %v3814_v21 }
 0x1a3   :  { %662 = vadd.xlane.f32.xlu1 %v3790_v9 }
 0x1a4   :  { %v1765_v22 = vpop.f32.mrf.mxu3  ;;  %2266 = vmatpush.bf16.msrb.mxu0 %v3007_v16 }
 0x1a5   :  { %v3817_v23 = vadd.f32 %v3709_v37, %v1765_v22 }
 0x1a6   :  { %v631_v25 = vpop.f32.mrf.mxu1 }
 0x1a7   :  { %1799 = vadd.xlane.f32.xlu2 %v3794_v11  ;;  %v1826_v29 = vmul.f32 %v3817_v23, %v3817_v23  ;;  %v3826_v36 = vadd.f32 %v3701_v28, %v631_v25 }
 0x1a9   :  { %710 = vadd.xlane.f32.xlu0 %v687_v13  ;;  %v690_v43 = vmul.f32 %v3826_v36, %v3826_v36 }
 0x1ab   :  { %1847 = vadd.xlane.f32.xlu1 %v1824_v14  ;;  %v2989_v14 = vld [vmem:[#allocation14] sm:$0xff] }
 0x1ac   :  { %v1768_v35 = vpop.f32.mrf.mxu3  ;;  %1131 = vmatpush.bf16.msrb.mxu2 %v2989_v14 }
 0x1ad   :  { %v3830_v40 = vadd.f32 %v3709_v37, %v1768_v35 }
 0x1ae   :  { %v633_v38 = vpop.f32.mrf.mxu1 }
 0x1af   :  { %664 = vadd.xlane.f32.xlu2 %v3802_v15  ;;  %v1827_v46 = vmul.f32 %v3830_v40, %v3830_v40  ;;  %v3838_v52 = vadd.f32 %v3701_v28, %v633_v38 }
 0x1b1   :  { %1801 = vadd.xlane.f32.xlu0 %v3805_v17  ;;  %v691_v4 = vmul.f32 %v3838_v52, %v3838_v52 }
 0x1b3   :  { %712 = vadd.xlane.f32.xlu1 %v688_v19 }
 0x1b4   :  { %v1770_v53 = vpop.f32.mrf.mxu3 }
 0x1b5   :  { %v3843_v61 = vadd.f32 %v3709_v37, %v1770_v53 }
 0x1b6   :  { %v636_v59 = vpop.f32.mrf.mxu1 }
 0x1b7   :  { %1849 = vadd.xlane.f32.xlu2 %v1825_v20  ;;  %v1828_v13 = vmul.f32 %v3843_v61, %v3843_v61  ;;  %v3859_v20 = vadd.f32 %v3701_v28, %v636_v59 }
 0x1b9   :  { %666 = vadd.xlane.f32.xlu0 %v3814_v21  ;;  %v692_v48 = vmul.f32 %v3859_v20, %v3859_v20 }
 0x1bb   :  { %1803 = vadd.xlane.f32.xlu1 %v3817_v23 }
 0x1bc   :  { %v1773_v22 = vpop.f32.mrf.mxu3 }
 0x1bd   :  { %v3864_v27 = vadd.f32 %v3709_v37, %v1773_v22 }
 0x1be   :  { %v638_v25 = vpop.f32.mrf.mxu1 }
 0x1bf   :  { %714 = vadd.xlane.f32.xlu2 %v689_v26 }
 0x1c1   :  { %1851 = vadd.xlane.f32.xlu0 %v1826_v29 }
 0x1c3   :  { %668 = vadd.xlane.f32.xlu1 %v3826_v36 }
 0x1c7   :  { %1805 = vadd.xlane.f32.xlu2 %v3830_v40 }
 0x1c9   :  { %716 = vadd.xlane.f32.xlu0 %v690_v43 }
 0x1cb   :  { %1853 = vadd.xlane.f32.xlu1 %v1827_v46 }
 0x1cc   :  { %v649_v49 = vpop.xlane.xlu0 %648 }
 0x1cd   :  { %v3840_v54 = vmul.f32 0.03125, %v649_v49  ;;  %v3006_v49 = vld [vmem:[#allocation17 + $0x8] sm:$0xff] }
 0x1ce   :  { %v697_v60 = vpop.xlane.xlu1 %696  ;;  %2267 = vmatpush.bf16.msrb.mxu0 %v3006_v49 }
 0x1cf   :  { %v760_v0 = vmul.f32 %v3840_v54, %v3840_v54  ;;  %v744_v1 = vmul.f32 0.03125, %v697_v60  ;;  %670 = vadd.xlane.f32.xlu2 %v3838_v52 }
 0x1d1   :  { %v776_v2 = vsub.f32 %v744_v1, %v760_v0  ;;  %1807 = vadd.xlane.f32.xlu0 %v3843_v61  ;;  %v1829_v0 = vmul.f32 %v3864_v27, %v3864_v27 }
 0x1d2   :  { %v1786_v8 = vpop.xlane.xlu2 %1785 }
 0x1d3   :  { %v3851_v10 = vadd.f32 1e-05, %v776_v2  ;;  %718 = vadd.xlane.f32.xlu1 %v691_v4  ;;  %v3866_v29 = vmul.f32 0.03125, %v1786_v8  ;;  %v3889_v2 = vadd.f32 %v3701_v28, %v638_v25  ;;  %v1775_v4 = vpop.f32.mrf.mxu3  ;;  %v3005_v8 = vld [vmem:[#allocation17] sm:$0xff] }
 0x1d4   :  { %v651_v12 = vpop.xlane.xlu0 %650  ;;  %2268 = vmatpush.bf16.msrb.mxu0 %v3005_v8  ;;  %v3902_v25 = vadd.f32 %v3709_v37, %v1775_v4 }
 0x1d5   :  { %3104 = vrsqrt.f32 %v3851_v10  ;;  %v3856_v18 = vmul.f32 0.03125, %v651_v12  ;;  %v1897_v46 = vmul.f32 %v3866_v29, %v3866_v29  ;;  %v641_v12 = vpop.f32.mrf.mxu1  ;;  %vm830_vm1 = vweird.f32 %v3851_v10 }
 0x1d6   :  { %v699_v19 = vpop.xlane.xlu1 %698 }
 0x1d7   :  { %v745_v24 = vmul.f32 0.03125, %v699_v19  ;;  %1855 = vadd.xlane.f32.xlu2 %v1828_v13  ;;  %v761_v26 = vmul.f32 %v3856_v18, %v3856_v18 }
 0x1d9   :  { %672 = vadd.xlane.f32.xlu0 %v3859_v20  ;;  %v777_v31 = vsub.f32 %v745_v24, %v761_v26 }
 0x1da   :  { %v1788_v33 = vpop.xlane.xlu2 %1787 }
 0x1db   :  { %v3869_v35 = vpop.eup %3104  ;;  %v3871_v38 = vmul.f32 0.03125, %v1788_v33  ;;  %1809 = vadd.xlane.f32.xlu1 %v3864_v27  ;;  %v3876_v42 = vadd.f32 1e-05, %v777_v31  ;;  %v1778_v8 = vpop.f32.mrf.mxu3 }
 0x1dc   :  { %v825_v41 = vmul.f32 %v3869_v35, %v3851_v10  ;;  %v1834_v43 = vpop.xlane.xlu0 %1833  ;;  %vm831_vm0 = vweird.f32 %v3869_v35 }
 0x1dd   :  { %v1881_v47 = vmul.f32 0.03125, %v1834_v43  ;;  %3106 = vrsqrt.f32 %v3876_v42  ;;  %v1898_v58 = vmul.f32 %v3871_v38, %v3871_v38  ;;  %vm3923_vm2 = vmor %vm830_vm1, %vm831_vm0  ;;  %vm840_vm4 = vweird.f32 %v3876_v42 }
 0x1de   :  { %v826_v53 = vmul.f32 %v3869_v35, %v825_v41  ;;  %v1836_v56 = vpop.xlane.xlu1 %1835  ;;  %v693_v41 = vmul.f32 %v3889_v2, %v3889_v2 }
 0x1df   :  { %v1913_v59 = vsub.f32 %v1881_v47, %v1897_v46  ;;  %v1882_v60 = vmul.f32 0.03125, %v1836_v56  ;;  %720 = vadd.xlane.f32.xlu2 %v692_v48 }
 0x1e0   :  { %v827_v1 = vmul.f32 0.5, %v826_v53  ;;  %v3921_v53 = vadd.f32 %v3701_v28, %v641_v12 }
 0x1e1   :  { %v3891_v6 = vadd.f32 1e-05, %v1913_v59  ;;  %v1914_v7 = vsub.f32 %v1882_v60, %v1898_v58  ;;  %1857 = vadd.xlane.f32.xlu0 %v1829_v0  ;;  %v1830_v60 = vmul.f32 %v3902_v25, %v3902_v25  ;;  %v792_v0 = vsub.f32 %v3704_v30, %v3840_v54  ;;  %v643_v54 = vpop.f32.mrf.mxu1 }
 0x1e2   :  { %v828_v13 = vsub.f32 1.5, %v827_v1  ;;  %v653_v14 = vpop.xlane.xlu2 %652 }
 0x1e3   :  { %3108 = vrsqrt.f32 %v3891_v6  ;;  %v3894_v16 = vadd.f32 1e-05, %v1914_v7  ;;  %v3896_v19 = vmul.f32 0.03125, %v653_v14  ;;  %674 = vadd.xlane.f32.xlu1 %v3889_v2  ;;  %v3899_v22 = vpop.eup %3106  ;;  %vm1967_vm7 = vweird.f32 %v3891_v6 }
 0x1e4   :  { %v1790_v24 = vpop.xlane.xlu0 %1789  ;;  %v835_v26 = vmul.f32 %v3899_v22, %v3876_v42  ;;  %v829_v31 = vmul.f32 %v3869_v35, %v828_v13  ;;  %vm841_vm3 = vweird.f32 %v3899_v22 }
 0x1e5   :  { %3110 = vrsqrt.f32 %v3894_v16  ;;  %v762_v46 = vmul.f32 %v3896_v19, %v3896_v19  ;;  %v3914_v47 = vmul.f32 0.03125, %v1790_v24  ;;  %vm3956_vm5 = vmor %vm840_vm4, %vm841_vm3  ;;  %vm1977_vm10 = vweird.f32 %v3894_v16 }
 0x1e6   :  { %v701_v33 = vpop.xlane.xlu1 %700  ;;  %v836_v43 = vmul.f32 %v3899_v22, %v835_v26  ;;  %v833_v10 = vsel %vm3923_vm2, %v3869_v35, %v829_v31 }
 0x1e7   :  { %v746_v48 = vmul.f32 0.03125, %v701_v33  ;;  %1811 = vadd.xlane.f32.xlu2 %v3902_v25  ;;  %v1899_v13 = vmul.f32 %v3914_v47, %v3914_v47 }
 0x1e8   :  { %v837_v58 = vmul.f32 0.5, %v836_v43  ;;  %v3949_v43 = vld [vmem:[#allocation19 + $0x1] ss:$0 sm:$0xff] }
 0x1e9   :  { %v3918_v49 = vpop.eup %3108  ;;  %v778_v59 = vsub.f32 %v746_v48, %v762_v46  ;;  %722 = vadd.xlane.f32.xlu0 %v693_v41  ;;  %v984_v41 = vmul.f32 %v833_v10, %v792_v0  ;;  %v3952_v46 = vadd.f32 %v3709_v37, %v1778_v8 }
 0x1ea   :  { %v1962_v1 = vmul.f32 %v3918_v49, %v3891_v6  ;;  %v1838_v4 = vpop.xlane.xlu2 %1837  ;;  %v838_v12 = vsub.f32 1.5, %v837_v58  ;;  %vm1968_vm6 = vweird.f32 %v3918_v49  ;;  %v1929_v6 = vsub.f32 %v3712_v32, %v3866_v29 }
 0x1eb   :  { %v3937_v7 = vpop.eup %3110  ;;  %v3941_v14 = vadd.f32 1e-05, %v778_v59  ;;  %v1883_v30 = vmul.f32 0.03125, %v1838_v4  ;;  %1859 = vadd.xlane.f32.xlu1 %v1830_v60  ;;  %v694_v59 = vmul.f32 %v3921_v53, %v3921_v53  ;;  %v3964_v60 = vadd.f32 %v3701_v28, %v643_v54  ;;  %v3985_v54 = vld [vmem:[#allocation19 + $0x2] ss:$0 sm:$0xff]  ;;  %vm3993_vm9 = vmor %vm1967_vm7, %vm1968_vm6 }
 0x1ec   :  { %v1963_v35 = vmul.f32 %v3918_v49, %v1962_v1  ;;  %v1972_v24 = vmul.f32 %v3937_v7, %v3894_v16  ;;  %v655_v26 = vpop.xlane.xlu0 %654  ;;  %v839_v31 = vmul.f32 %v3899_v22, %v838_v12  ;;  %v793_v4 = vsub.f32 %v3715_v34, %v3856_v18 }
 0x1ed   :  { %3112 = vrsqrt.f32 %v3941_v14  ;;  %v1915_v33 = vsub.f32 %v1883_v30, %v1899_v13  ;;  %v3971_v1 = vmul.f32 0.03125, %v655_v26  ;;  %vm1978_vm8 = vweird.f32 %v3937_v7 }
 0x1ee   :  { %v1964_v48 = vmul.f32 0.5, %v1963_v35  ;;  %v1973_v56 = vmul.f32 %v3937_v7, %v1972_v24  ;;  %v1792_v58 = vpop.xlane.xlu1 %1791  ;;  %v843_v0 = vsel %vm3956_vm5, %v3899_v22, %v839_v31  ;;  %v1001_v22 = vmul.f32 %v3949_v43, %v984_v41  ;;  %vm4010_vm11 = vmor %vm1977_vm10, %vm1978_vm8 }
 0x1ef   :  { %v3969_v10 = vadd.f32 1e-05, %v1915_v33  ;;  %676 = vadd.xlane.f32.xlu2 %v3921_v53  ;;  %v3979_v28 = vmul.f32 0.03125, %v1792_v58  ;;  %v985_v18 = vmul.f32 %v843_v0, %v793_v4  ;;  %v763_v26 = vmul.f32 %v3971_v1, %v3971_v1  ;;  %v1780_v0 = vpop.f32.mrf.mxu3 }
 0x1f0   :  { %v1965_v8 = vsub.f32 1.5, %v1964_v48  ;;  %v1974_v12 = vmul.f32 0.5, %v1973_v56  ;;  %v695_v33 = vmul.f32 %v3964_v60, %v3964_v60  ;;  %v1930_v16 = vsub.f32 %v3722_v39, %v3871_v38 }
 0x1f1   :  { %3114 = vrsqrt.f32 %v3969_v10  ;;  %678 = vadd.xlane.f32.xlu0 %v3964_v60  ;;  %v1900_v56 = vmul.f32 %v3979_v28, %v3979_v28  ;;  %vm850_vm13 = vweird.f32 %v3941_v14  ;;  %vm1987_vm0 = vweird.f32 %v3969_v10 }
 0x1f2   :  { %v1966_v13 = vmul.f32 %v3918_v49, %v1965_v8  ;;  %v1975_v30 = vsub.f32 1.5, %v1974_v12  ;;  %v703_v34 = vpop.xlane.xlu2 %702 }
 0x1f3   :  { %v3987_v35 = vpop.eup %3112  ;;  %v747_v31 = vmul.f32 0.03125, %v703_v34  ;;  %724 = vadd.xlane.f32.xlu1 %v694_v59 }
 0x1f4   :  { %v1970_v41 = vsel %vm3993_vm9, %v3918_v49, %v1966_v13  ;;  %v1976_v32 = vmul.f32 %v3937_v7, %v1975_v30  ;;  %v845_v29 = vmul.f32 %v3987_v35, %v3941_v14  ;;  %v1840_v42 = vpop.xlane.xlu0 %1839  ;;  %v1002_v49 = vmul.f32 %v3949_v43, %v985_v18 }
 0x1f5   :  { %v779_v58 = vsub.f32 %v747_v31, %v763_v26  ;;  %v1884_v59 = vmul.f32 0.03125, %v1840_v42  ;;  %v1018_v13 = vadd.f32 %v3985_v54, %v1001_v22  ;;  %v2121_v26 = vmul.f32 %v1970_v41, %v1929_v6  ;;  %v4029_v31 = vld [vmem:[#allocation19 + $0x9] ss:$0 sm:$0xff] }
 0x1f6   :  { %v1980_v4 = vsel %vm4010_vm11, %v3937_v7, %v1976_v32  ;;  %v846_v8 = vmul.f32 %v3987_v35, %v845_v29  ;;  %v657_v12 = vpop.xlane.xlu1 %656  ;;  %v1019_v18 = vadd.f32 %v3985_v54, %v1002_v49  ;;  %v4034_v32 = vadd.f32 %v3709_v37, %v1780_v0 }
 0x1f7   :  { %v4024_v30 = vpop.eup %3114  ;;  %v4026_v34 = vadd.f32 1e-05, %v779_v58  ;;  %v1916_v24 = vsub.f32 %v1884_v59, %v1900_v56  ;;  %726 = vadd.xlane.f32.xlu2 %v695_v33  ;;  %v2122_v7 = vmul.f32 %v1980_v4, %v1930_v16  ;;  %v4039_v29 = vmul.f32 0.03125, %v657_v12  ;;  %v4042_v33 = vld [vmem:[#allocation19 + $0xa] ss:$0 sm:$0xff] }
 0x1f8   :  { %v847_v39 = vmul.f32 0.5, %v846_v8  ;;  %v1982_v38 = vmul.f32 %v4024_v30, %v3969_v10  ;;  %v1034_v42 = vmax.f32 %v1018_v13, 0.0  ;;  %v1035_v48 = vmax.f32 %v1019_v18, 0.0 }
 0x1f9   :  { %3116 = vrsqrt.f32 %v4026_v34  ;;  %v4037_v22 = vadd.f32 1e-05, %v1916_v24  ;;  %1813 = vadd.xlane.f32.xlu0 %v3952_v46  ;;  %v1831_v58 = vmul.f32 %v3952_v46, %v3952_v46  ;;  %v2138_v59 = vmul.f32 %v4029_v31, %v2121_v26 }
 0x1fa   :  { %v848_v6 = vsub.f32 1.5, %v847_v39  ;;  %v1983_v41 = vmul.f32 %v4024_v30, %v1982_v38  ;;  %v1794_v56 = vpop.xlane.xlu2 %1793  ;;  %vm851_vm12 = vweird.f32 %v3987_v35  ;;  %v1050_v0 = vpack.c.bf16 %v1035_v48, %v1034_v42 }
 0x1fb   :  { %3118 = vrsqrt.f32 %v4037_v22  ;;  %v4046_v37 = vmul.f32 0.03125, %v1794_v56  ;;  %1815 = vadd.xlane.f32.xlu1 %v4034_v32  ;;  %v2139_v4 = vmul.f32 %v4029_v31, %v2122_v7  ;;  %v764_v12 = vmul.f32 %v4039_v29, %v4039_v29  ;;  %vm4068_vm14 = vmor %vm850_vm13, %vm851_vm12 }
 0x1fc   :  { %v1984_v49 = vmul.f32 0.5, %v1983_v41  ;;  %v705_v16 = vpop.xlane.xlu0 %704  ;;  %v849_v8 = vmul.f32 %v3987_v35, %v848_v6  ;;  %v2155_v24 = vadd.f32 %v4042_v33, %v2138_v59  ;;  %1132 = vmatmul.bf16.vlgmr.msrb.gmra.mxu2 %v1050_v0  ;;  %v1832_v38 = vmul.f32 %v4034_v32, %v4034_v32 }
 0x1fd   :  { %v748_v13 = vmul.f32 0.03125, %v705_v16  ;;  %v2156_v26 = vadd.f32 %v4042_v33, %v2139_v4  ;;  %v1901_v7 = vmul.f32 %v4046_v37, %v4046_v37  ;;  %vm1988_vm15 = vweird.f32 %v4024_v30 }
 0x1fe   :  { %v1985_v18 = vsub.f32 1.5, %v1984_v49  ;;  %v1842_v39 = vpop.xlane.xlu1 %1841  ;;  %v2171_v59 = vmax.f32 %v2155_v24, 0.0  ;;  %vm4097_vm1 = vmor %vm1987_vm0, %vm1988_vm15  ;;  %vm860_vm3 = vweird.f32 %v4026_v34  ;;  %vm1997_vm6 = vweird.f32 %v4037_v22 }
 0x1ff   :  { %v4061_v41 = vpop.eup %3116  ;;  %v780_v6 = vsub.f32 %v748_v13, %v764_v12  ;;  %v1885_v42 = vmul.f32 0.03125, %v1842_v39  ;;  %1861 = vadd.xlane.f32.xlu2 %v1831_v58  ;;  %v2172_v49 = vmax.f32 %v2156_v26, 0.0  ;;  %v853_v58 = vsel %vm4068_vm14, %v3987_v35, %v849_v8 }
 0x200   :  { %v855_v56 = vmul.f32 %v4061_v41, %v4026_v34  ;;  %v1986_v4 = vmul.f32 %v4024_v30, %v1985_v18  ;;  %v794_v26 = vsub.f32 %v3730_v44, %v3896_v19  ;;  %vm861_vm2 = vweird.f32 %v4061_v41 }
 0x201   :  { %v4074_v0 = vpop.eup %3118  ;;  %v4077_v14 = vadd.f32 1e-05, %v780_v6  ;;  %v1917_v16 = vsub.f32 %v1885_v42, %v1901_v7  ;;  %1863 = vadd.xlane.f32.xlu0 %v1832_v38  ;;  %v2187_v24 = vpack.c.bf16 %v2172_v49, %v2171_v59  ;;  %vm862_vm5 = vmor %vm860_vm3, %vm861_vm2 }
 0x202   :  { %v856_v12 = vmul.f32 %v4061_v41, %v855_v56  ;;  %v1992_v13 = vmul.f32 %v4074_v0, %v4037_v22  ;;  %v659_v39 = vpop.xlane.xlu2 %658  ;;  %v986_v44 = vmul.f32 %v853_v58, %v794_v26  ;;  %v1990_v10 = vsel %vm4097_vm1, %v4024_v30, %v1986_v4 }
 0x203   :  { %3120 = vrsqrt.f32 %v4077_v14  ;;  %v4089_v7 = vadd.f32 1e-05, %v1917_v16  ;;  %v4091_v38 = vmul.f32 0.03125, %v659_v39  ;;  %2269 = vmatmul.bf16.vlgmr.msrb.gmra.mxu0 %v2187_v24  ;;  %v1931_v56 = vsub.f32 %v3733_v45, %v3914_v47 }
 0x204   :  { %v857_v35 = vmul.f32 0.5, %v856_v12  ;;  %v1993_v8 = vmul.f32 %v4074_v0, %v1992_v13  ;;  %v1796_v18 = vpop.xlane.xlu0 %1795  ;;  %vm1998_vm4 = vweird.f32 %v4074_v0  ;;  %v795_v30 = vsub.f32 %v3742_v50, %v3971_v1 }
 0x205   :  { %3122 = vrsqrt.f32 %v4089_v7  ;;  %v765_v59 = vmul.f32 %v4091_v38, %v4091_v38  ;;  %v4110_v49 = vmul.f32 0.03125, %v1796_v18  ;;  %v1003_v47 = vmul.f32 %v3949_v43, %v986_v44  ;;  %vm4127_vm7 = vmor %vm1997_vm6, %vm1998_vm4 }
 0x206   :  { %v858_v19 = vsub.f32 1.5, %v857_v35  ;;  %v1994_v42 = vmul.f32 0.5, %v1993_v8  ;;  %v707_v48 = vpop.xlane.xlu1 %706  ;;  %v2123_v4 = vmul.f32 %v1990_v10, %v1931_v56  ;;  %v1932_v22 = vsub.f32 %v3745_v51, %v3979_v28 }
 0x207   :  { %v749_v16 = vmul.f32 0.03125, %v707_v48  ;;  %v1902_v50 = vmul.f32 %v4110_v49, %v4110_v49  ;;  %v1020_v10 = vadd.f32 %v3985_v54, %v1003_v47  ;;  %vm870_vm9 = vweird.f32 %v4077_v14 }
 0x208   :  { %v859_v58 = vmul.f32 %v4061_v41, %v858_v19  ;;  %v1995_v12 = vsub.f32 1.5, %v1994_v42  ;;  %v2140_v56 = vmul.f32 %v4029_v31, %v2123_v4  ;;  %vm2007_vm12 = vweird.f32 %v4089_v7 }
 0x209   :  { %v4115_v13 = vpop.eup %3120  ;;  %v781_v45 = vsub.f32 %v749_v16, %v765_v59  ;;  %v1036_v8 = vmax.f32 %v1020_v10, 0.0 }
 0x20a   :  { %v1996_v24 = vmul.f32 %v4074_v0, %v1995_v12  ;;  %v865_v34 = vmul.f32 %v4115_v13, %v4077_v14  ;;  %v1844_v39 = vpop.xlane.xlu2 %1843  ;;  %v863_v26 = vsel %vm862_vm5, %v4061_v41, %v859_v58  ;;  %v2157_v4 = vadd.f32 %v4042_v33, %v2140_v56 }
 0x20b   :  { %v4125_v35 = vpop.eup %3122  ;;  %v4133_v1 = vadd.f32 1e-05, %v781_v45  ;;  %v1886_v18 = vmul.f32 0.03125, %v1844_v39  ;;  %v987_v6 = vmul.f32 %v863_v26, %v795_v30  ;;  %vm871_vm8 = vweird.f32 %v4115_v13 }
 0x20c   :  { %v866_v44 = vmul.f32 %v4115_v13, %v865_v34  ;;  %v2002_v41 = vmul.f32 %v4125_v35, %v4089_v7  ;;  %v661_v19 = vpop.xlane.xlu0 %660  ;;  %v2000_v42 = vsel %vm4127_vm7, %v4074_v0, %v1996_v24  ;;  %vm4167_vm10 = vmor %vm870_vm9, %vm871_vm8  ;;  %vm2008_vm11 = vweird.f32 %v4125_v35 }
 0x20d   :  { %3124 = vrsqrt.f32 %v4133_v1  ;;  %v1918_v48 = vsub.f32 %v1886_v18, %v1902_v50  ;;  %v1004_v16 = vmul.f32 %v3949_v43, %v987_v6  ;;  %v2124_v58 = vmul.f32 %v2000_v42, %v1932_v22  ;;  %vm4192_vm13 = vmor %vm2007_vm12, %vm2008_vm11 }
 0x20e   :  { %v867_v59 = vmul.f32 0.5, %v866_v44  ;;  %v2003_v51 = vmul.f32 %v4125_v35, %v2002_v41  ;;  %v1798_v28 = vpop.xlane.xlu1 %1797  ;;  %v4150_v30 = vmul.f32 0.03125, %v661_v19  ;;  %vm880_vm15 = vweird.f32 %v4133_v1 }
 0x20f   :  { %v4148_v12 = vadd.f32 1e-05, %v1918_v48  ;;  %v4152_v45 = vmul.f32 0.03125, %v1798_v28  ;;  %v1021_v34 = vadd.f32 %v3985_v54, %v1004_v16  ;;  %v2141_v47 = vmul.f32 %v4029_v31, %v2124_v58 }
 0x210   :  { %v868_v0 = vsub.f32 1.5, %v867_v59  ;;  %v2004_v24 = vmul.f32 0.5, %v2003_v51  ;;  %v766_v44 = vmul.f32 %v4150_v30, %v4150_v30  ;;  %v2173_v51 = vmax.f32 %v2157_v4, 0.0 }
 0x211   :  { %3126 = vrsqrt.f32 %v4148_v12  ;;  %v1037_v50 = vmax.f32 %v1021_v34, 0.0  ;;  %v2158_v18 = vadd.f32 %v4042_v33, %v2141_v47  ;;  %v1903_v42 = vmul.f32 %v4152_v45, %v4152_v45 }
 0x212   :  { %v2005_v39 = vsub.f32 1.5, %v2004_v24  ;;  %v709_v26 = vpop.xlane.xlu2 %708  ;;  %v869_v22 = vmul.f32 %v4115_v13, %v868_v0  ;;  %vm2017_vm2 = vweird.f32 %v4148_v12 }
 0x213   :  { %v3125_v6 = vpop.eup %3124  ;;  %v750_v41 = vmul.f32 0.03125, %v709_v26  ;;  %v1051_v10 = vpack.c.bf16 %v1037_v50, %v1036_v8  ;;  %v2174_v28 = vmax.f32 %v2158_v18, 0.0  ;;  %v796_v8 = vsub.f32 %v3754_v55, %v4039_v29 }
 0x214   :  { %v875_v19 = vmul.f32 %v3125_v6, %v4133_v1  ;;  %v1846_v48 = vpop.xlane.xlu0 %1845  ;;  %v2006_v58 = vmul.f32 %v4125_v35, %v2005_v39  ;;  %v873_v4 = vsel %vm4167_vm10, %v4115_v13, %v869_v22  ;;  %vm881_vm14 = vweird.f32 %v3125_v6 }
 0x215   :  { %v782_v56 = vsub.f32 %v750_v41, %v766_v44  ;;  %v1887_v59 = vmul.f32 0.03125, %v1846_v48  ;;  %1137 = vmatmul.bf16.gmra.mxu2 %v1051_v10  ;;  %v2188_v26 = vpack.c.bf16 %v2174_v28, %v2173_v51  ;;  %v988_v41 = vmul.f32 %v873_v4, %v796_v8  ;;  %vm882_vm0 = vmor %vm880_vm15, %vm881_vm14 }
 0x216   :  { %v876_v14 = vmul.f32 %v3125_v6, %v875_v19  ;;  %v663_v0 = vpop.xlane.xlu1 %662  ;;  %v2010_v19 = vsel %vm4192_vm13, %v4125_v35, %v2006_v58 }
 0x217   :  { %v4173_v24 = vpop.eup %3126  ;;  %v4175_v34 = vadd.f32 1e-05, %v782_v56  ;;  %v1919_v47 = vsub.f32 %v1887_v59, %v1903_v42  ;;  %v4188_v44 = vmul.f32 0.03125, %v663_v0  ;;  %2274 = vmatmul.bf16.gmra.mxu0 %v2188_v26  ;;  %v1933_v42 = vsub.f32 %v3758_v57, %v4046_v37 }
 0x218   :  { %v877_v50 = vmul.f32 0.5, %v876_v14  ;;  %v2012_v39 = vmul.f32 %v4173_v24, %v4148_v12  ;;  %v797_v59 = vsub.f32 %v3766_v62, %v4091_v38  ;;  %vm2018_vm1 = vweird.f32 %v4173_v24 }
 0x219   :  { %3128 = vrsqrt.f32 %v4175_v34  ;;  %v4186_v18 = vadd.f32 1e-05, %v1919_v47  ;;  %v767_v51 = vmul.f32 %v4188_v44, %v4188_v44  ;;  %v1005_v57 = vmul.f32 %v3949_v43, %v988_v41  ;;  %vm4226_vm3 = vmor %vm2017_vm2, %vm2018_vm1 }
 0x21a   :  { %v878_v55 = vsub.f32 1.5, %v877_v50  ;;  %v2013_v29 = vmul.f32 %v4173_v24, %v2012_v39  ;;  %v1800_v22 = vpop.xlane.xlu2 %1799  ;;  %v2125_v37 = vmul.f32 %v2010_v19, %v1933_v42  ;;  %vm890_vm5 = vweird.f32 %v4175_v34 }
 0x21b   :  { %3130 = vrsqrt.f32 %v4186_v18  ;;  %v4198_v7 = vmul.f32 0.03125, %v1800_v22  ;;  %v1022_v22 = vadd.f32 %v3985_v54, %v1005_v57  ;;  %vm2027_vm8 = vweird.f32 %v4186_v18 }
 0x21c   :  { %v879_v48 = vmul.f32 %v3125_v6, %v878_v55  ;;  %v2014_v10 = vmul.f32 0.5, %v2013_v29  ;;  %v711_v56 = vpop.xlane.xlu0 %710  ;;  %v2142_v19 = vmul.f32 %v4029_v31, %v2125_v37 }
 0x21d   :  { %v751_v28 = vmul.f32 0.03125, %v711_v56  ;;  %v1904_v1 = vmul.f32 %v4198_v7, %v4198_v7  ;;  %v1038_v37 = vmax.f32 %v1022_v22, 0.0 }
 0x21e   :  { %v2015_v16 = vsub.f32 1.5, %v2014_v10  ;;  %v1848_v35 = vpop.xlane.xlu1 %1847  ;;  %v883_v58 = vsel %vm882_vm0, %v3125_v6, %v879_v48  ;;  %v1934_v6 = vsub.f32 %v3769_v63, %v4110_v49 }
 0x21f   :  { %v4212_v14 = vpop.eup %3128  ;;  %v783_v0 = vsub.f32 %v751_v28, %v767_v51  ;;  %v1888_v62 = vmul.f32 0.03125, %v1848_v35  ;;  %v989_v38 = vmul.f32 %v883_v58, %v797_v59 }
 0x220   :  { %v2016_v47 = vmul.f32 %v4173_v24, %v2015_v16  ;;  %v885_v26 = vmul.f32 %v4212_v14, %v4175_v34  ;;  %vm891_vm4 = vweird.f32 %v4212_v14 }
 0x221   :  { %v4220_v4 = vpop.eup %3130  ;;  %v4230_v50 = vadd.f32 1e-05, %v783_v0  ;;  %v1920_v39 = vsub.f32 %v1888_v62, %v1904_v1  ;;  %v1006_v13 = vmul.f32 %v3949_v43, %v989_v38  ;;  %v2159_v62 = vadd.f32 %v4042_v33, %v2142_v19  ;;  %vm4273_vm7 = vmor %vm890_vm5, %vm891_vm4 }
 0x222   :  { %v886_v12 = vmul.f32 %v4212_v14, %v885_v26  ;;  %v2022_v55 = vmul.f32 %v4220_v4, %v4186_v18  ;;  %v665_v29 = vpop.xlane.xlu2 %664  ;;  %v2020_v63 = vsel %vm4226_vm3, %v4173_v24, %v2016_v47  ;;  %vm2028_vm6 = vweird.f32 %v4220_v4 }
 0x223   :  { %3132 = vrsqrt.f32 %v4230_v50  ;;  %v4241_v49 = vadd.f32 1e-05, %v1920_v39  ;;  %v4243_v41 = vmul.f32 0.03125, %v665_v29  ;;  %v1023_v56 = vadd.f32 %v3985_v54, %v1006_v13  ;;  %vm4289_vm9 = vmor %vm2027_vm8, %vm2028_vm6 }
 0x224   :  { %v887_v42 = vmul.f32 0.5, %v886_v12  ;;  %v2023_v48 = vmul.f32 %v4220_v4, %v2022_v55  ;;  %v1802_v10 = vpop.xlane.xlu0 %1801  ;;  %v2126_v59 = vmul.f32 %v2020_v63, %v1934_v6  ;;  %vm900_vm11 = vweird.f32 %v4230_v50 }
 0x225   :  { %3134 = vrsqrt.f32 %v4241_v49  ;;  %v4249_v24 = vmul.f32 0.03125, %v1802_v10  ;;  %v1039_v35 = vmax.f32 %v1023_v56, 0.0  ;;  %v768_v58 = vmul.f32 %v4243_v41, %v4243_v41 }
 0x226   :  { %v888_v51 = vsub.f32 1.5, %v887_v42  ;;  %v2024_v28 = vmul.f32 0.5, %v2023_v48  ;;  %v713_v16 = vpop.xlane.xlu1 %712  ;;  %v2143_v1 = vmul.f32 %v4029_v31, %v2126_v59  ;;  %v2175_v56 = vmax.f32 %v2159_v62, 0.0 }
 0x227   :  { %v752_v57 = vmul.f32 0.03125, %v713_v16  ;;  %v1052_v6 = vpack.c.bf16 %v1039_v35, %v1038_v37  ;;  %v1905_v13 = vmul.f32 %v4249_v24, %v4249_v24  ;;  %v1935_v37 = vsub.f32 %v3781_v5, %v4152_v45 }
 0x228   :  { %v2025_v0 = vsub.f32 1.5, %v2024_v28  ;;  %v889_v47 = vmul.f32 %v4212_v14, %v888_v51  ;;  %v2160_v8 = vadd.f32 %v4042_v33, %v2143_v1  ;;  %v798_v28 = vsub.f32 %v3778_v3, %v4150_v30 }
 0x229   :  { %v4256_v38 = vpop.eup %3132  ;;  %v784_v26 = vsub.f32 %v752_v57, %v768_v58  ;;  %1142 = vmatmul.bf16.gmra.mxu2 %v1052_v6  ;;  %vm2037_vm14 = vweird.f32 %v4241_v49 }
 0x22a   :  { %v895_v39 = vmul.f32 %v4256_v38, %v4230_v50  ;;  %v1850_v12 = vpop.xlane.xlu2 %1849  ;;  %v2026_v29 = vmul.f32 %v4220_v4, %v2025_v0  ;;  %v2176_v19 = vmax.f32 %v2160_v8, 0.0  ;;  %v893_v51 = vsel %vm4273_vm7, %v4212_v14, %v889_v47 }
 0x22b   :  { %v4266_v55 = vpop.eup %3134  ;;  %v4269_v22 = vadd.f32 1e-05, %v784_v26  ;;  %v1889_v63 = vmul.f32 0.03125, %v1850_v12  ;;  %vm901_vm10 = vweird.f32 %v4256_v38  ;;  %v990_v62 = vmul.f32 %v893_v51, %v798_v28 }
 0x22c   :  { %v896_v42 = vmul.f32 %v4256_v38, %v895_v39  ;;  %v2032_v48 = vmul.f32 %v4266_v55, %v4241_v49  ;;  %v667_v10 = vpop.xlane.xlu0 %666  ;;  %v2189_v18 = vpack.c.bf16 %v2176_v19, %v2175_v56  ;;  %v2030_v3 = vsel %vm4289_vm9, %v4220_v4, %v2026_v29  ;;  %vm902_vm13 = vmor %vm900_vm11, %vm901_vm10 }
 0x22d   :  { %3136 = vrsqrt.f32 %v4269_v22  ;;  %v1921_v59 = vsub.f32 %v1889_v63, %v1905_v13  ;;  %v4298_v14 = vmul.f32 0.03125, %v667_v10  ;;  %vm2038_vm12 = vweird.f32 %v4266_v55 }
 0x22e   :  { %v897_v35 = vmul.f32 0.5, %v896_v42  ;;  %v2033_v58 = vmul.f32 %v4266_v55, %v2032_v48  ;;  %v1804_v57 = vpop.xlane.xlu1 %1803  ;;  %2279 = vmatmul.bf16.gmra.mxu0 %v2189_v18  ;;  %v2127_v6 = vmul.f32 %v2030_v3, %v1935_v37  ;;  %v799_v8 = vsub.f32 %v3790_v9, %v4188_v44  ;;  %vm4322_vm15 = vmor %vm2037_vm14, %vm2038_vm12 }
 0x22f   :  { %v4296_v1 = vadd.f32 1e-05, %v1921_v59  ;;  %v4306_v47 = vmul.f32 0.03125, %v1804_v57  ;;  %v769_v50 = vmul.f32 %v4298_v14, %v4298_v14  ;;  %v1007_v19 = vmul.f32 %v3949_v43, %v990_v62 }
 0x230   :  { %v898_v30 = vsub.f32 1.5, %v897_v35  ;;  %v2034_v0 = vmul.f32 0.5, %v2033_v58  ;;  %v1936_v48 = vsub.f32 %v3794_v11, %v4198_v7  ;;  %v2144_v59 = vmul.f32 %v4029_v31, %v2127_v6 }
 0x231   :  { %3138 = vrsqrt.f32 %v4296_v1  ;;  %v1906_v9 = vmul.f32 %v4306_v47, %v4306_v47  ;;  %v1024_v7 = vadd.f32 %v3985_v54, %v1007_v19  ;;  %vm910_vm2 = vweird.f32 %v4269_v22 }
 0x232   :  { %v899_v5 = vmul.f32 %v4256_v38, %v898_v30  ;;  %v2035_v45 = vsub.f32 1.5, %v2034_v0  ;;  %v715_v26 = vpop.xlane.xlu2 %714  ;;  %v2161_v62 = vadd.f32 %v4042_v33, %v2144_v59  ;;  %vm2047_vm4 = vweird.f32 %v4296_v1 }
 0x233   :  { %v4310_v4 = vpop.eup %3136  ;;  %v753_v39 = vmul.f32 0.03125, %v715_v26 }
 0x234   :  { %v2036_v13 = vmul.f32 %v4266_v55, %v2035_v45  ;;  %v905_v12 = vmul.f32 %v4310_v4, %v4269_v22  ;;  %v1852_v29 = vpop.xlane.xlu0 %1851  ;;  %v903_v63 = vsel %vm902_vm13, %v4256_v38, %v899_v5  ;;  %vm911_vm0 = vweird.f32 %v4310_v4 }
 0x235   :  { %v785_v44 = vsub.f32 %v753_v39, %v769_v50  ;;  %v1890_v49 = vmul.f32 0.03125, %v1852_v29  ;;  %v991_v42 = vmul.f32 %v903_v63, %v799_v8  ;;  %v1040_v8 = vmax.f32 %v1024_v7, 0.0  ;;  %vm4370_vm3 = vmor %vm910_vm2, %vm911_vm0 }
 0x236   :  { %v906_v10 = vmul.f32 %v4310_v4, %v905_v12  ;;  %v669_v56 = vpop.xlane.xlu1 %668  ;;  %v2040_v38 = vsel %vm4322_vm15, %v4266_v55, %v2036_v13  ;;  %v800_v22 = vsub.f32 %v3802_v15, %v4243_v41 }
 0x237   :  { %v4335_v51 = vpop.eup %3138  ;;  %v4337_v28 = vadd.f32 1e-05, %v785_v44  ;;  %v1922_v16 = vsub.f32 %v1890_v49, %v1906_v9  ;;  %v1008_v35 = vmul.f32 %v3949_v43, %v991_v42  ;;  %v2128_v18 = vmul.f32 %v2040_v38, %v1936_v48 }
 0x238   :  { %v907_v58 = vmul.f32 0.5, %v906_v10  ;;  %v2042_v11 = vmul.f32 %v4335_v51, %v4296_v1  ;;  %v4346_v55 = vmul.f32 0.03125, %v669_v56  ;;  %vm2048_vm1 = vweird.f32 %v4335_v51 }
 0x239   :  { %3140 = vrsqrt.f32 %v4337_v28  ;;  %v4344_v57 = vadd.f32 1e-05, %v1922_v16  ;;  %v1025_v0 = vadd.f32 %v3985_v54, %v1008_v35  ;;  %v2145_v45 = vmul.f32 %v4029_v31, %v2128_v18  ;;  %vm4381_vm5 = vmor %vm2047_vm4, %vm2048_vm1 }
 0x23a   :  { %v908_v37 = vsub.f32 1.5, %v907_v58  ;;  %v2043_v3 = vmul.f32 %v4335_v51, %v2042_v11  ;;  %v1806_v30 = vpop.xlane.xlu2 %1805  ;;  %v770_v39 = vmul.f32 %v4346_v55, %v4346_v55  ;;  %v2177_v9 = vmax.f32 %v2161_v62, 0.0 }
 0x23b   :  { %3142 = vrsqrt.f32 %v4344_v57  ;;  %v4352_v5 = vmul.f32 0.03125, %v1806_v30  ;;  %v1041_v50 = vmax.f32 %v1025_v0, 0.0  ;;  %v2162_v12 = vadd.f32 %v4042_v33, %v2145_v45 }
 0x23c   :  { %v2044_v26 = vmul.f32 0.5, %v2043_v3  ;;  %v717_v6 = vpop.xlane.xlu0 %716  ;;  %v909_v29 = vmul.f32 %v4310_v4, %v908_v37  ;;  %v1937_v0 = vsub.f32 %v3805_v17, %v4249_v24  ;;  %vm920_vm7 = vweird.f32 %v4337_v28 }
 0x23d   :  { %v754_v13 = vmul.f32 0.03125, %v717_v6  ;;  %v1053_v34 = vpack.c.bf16 %v1041_v50, %v1040_v8  ;;  %v1907_v49 = vmul.f32 %v4352_v5, %v4352_v5  ;;  %v2178_v10 = vmax.f32 %v2162_v12, 0.0 }
 0x23e   :  { %v2045_v63 = vsub.f32 1.5, %v2044_v26  ;;  %v1854_v19 = vpop.xlane.xlu1 %1853  ;;  %v913_v1 = vsel %vm4370_vm3, %v4310_v4, %v909_v29  ;;  %vm2057_vm10 = vweird.f32 %v4344_v57  ;;  %v1938_v16 = vsub.f32 %v3817_v23, %v4306_v47 }
 0x23f   :  { %v3141_v44 = vpop.eup %3140  ;;  %v786_v42 = vsub.f32 %v754_v13, %v770_v39  ;;  %v1891_v48 = vmul.f32 0.03125, %v1854_v19  ;;  %1147 = vmatmul.bf16.gmra.mxu2 %v1053_v34  ;;  %v2190_v11 = vpack.c.bf16 %v2178_v10, %v2177_v9  ;;  %v992_v4 = vmul.f32 %v913_v1, %v800_v22 }
 0x240   :  { %v2046_v56 = vmul.f32 %v4335_v51, %v2045_v63  ;;  %v915_v38 = vmul.f32 %v3141_v44, %v4337_v28  ;;  %vm921_vm6 = vweird.f32 %v3141_v44  ;;  %v801_v63 = vsub.f32 %v3814_v21, %v4298_v14 }
 0x241   :  { %v4366_v59 = vpop.eup %3142  ;;  %v4375_v35 = vadd.f32 1e-05, %v786_v42  ;;  %v1923_v58 = vsub.f32 %v1891_v48, %v1907_v49  ;;  %2284 = vmatmul.bf16.gmra.mxu0 %v2190_v11  ;;  %vm922_vm9 = vmor %vm920_vm7, %vm921_vm6  ;;  %v1009_v34 = vmul.f32 %v3949_v43, %v992_v4 }
 0x242   :  { %v916_v18 = vmul.f32 %v3141_v44, %v915_v38  ;;  %v2052_v37 = vmul.f32 %v4366_v59, %v4344_v57  ;;  %v671_v3 = vpop.xlane.xlu2 %670  ;;  %v2050_v41 = vsel %vm4381_vm5, %v4335_v51, %v2046_v56  ;;  %vm2058_vm8 = vweird.f32 %v4366_v59 }
 0x243   :  { %3144 = vrsqrt.f32 %v4375_v35  ;;  %v4391_v30 = vadd.f32 1e-05, %v1923_v58  ;;  %v4393_v15 = vmul.f32 0.03125, %v671_v3  ;;  %v2129_v39 = vmul.f32 %v2050_v41, %v1937_v0  ;;  %vm4420_vm11 = vmor %vm2057_vm10, %vm2058_vm8 }
 0x244   :  { %v917_v62 = vmul.f32 0.5, %v916_v18  ;;  %v2053_v45 = vmul.f32 %v4366_v59, %v2052_v37  ;;  %v1808_v26 = vpop.xlane.xlu0 %1807  ;;  %v1026_v18 = vadd.f32 %v3985_v54, %v1009_v34  ;;  %vm930_vm13 = vweird.f32 %v4375_v35 }
 0x245   :  { %3146 = vrsqrt.f32 %v4391_v30  ;;  %v771_v13 = vmul.f32 %v4393_v15, %v4393_v15  ;;  %v4404_v12 = vmul.f32 0.03125, %v1808_v26  ;;  %v2146_v48 = vmul.f32 %v4029_v31, %v2129_v39 }
 0x246   :  { %v918_v6 = vsub.f32 1.5, %v917_v62  ;;  %v2054_v8 = vmul.f32 0.5, %v2053_v45  ;;  %v719_v50 = vpop.xlane.xlu1 %718  ;;  %vm2067_vm0 = vweird.f32 %v4391_v30 }
 0x247   :  { %v755_v51 = vmul.f32 0.03125, %v719_v50  ;;  %v1908_v21 = vmul.f32 %v4404_v12, %v4404_v12  ;;  %v2163_v62 = vadd.f32 %v4042_v33, %v2146_v48 }
 0x248   :  { %v919_v29 = vmul.f32 %v3141_v44, %v918_v6  ;;  %v2055_v17 = vsub.f32 1.5, %v2054_v8  ;;  %v1042_v8 = vmax.f32 %v1026_v18, 0.0 }
 0x249   :  { %v4408_v24 = vpop.eup %3144  ;;  %v787_v19 = vsub.f32 %v755_v51, %v771_v13 }
 0x24a   :  { %v2056_v9 = vmul.f32 %v4366_v59, %v2055_v17  ;;  %v925_v49 = vmul.f32 %v4408_v24, %v4375_v35  ;;  %v1856_v28 = vpop.xlane.xlu2 %1855  ;;  %v923_v42 = vsel %vm922_vm9, %v3141_v44, %v919_v29  ;;  %vm931_vm12 = vweird.f32 %v4408_v24 }
 0x24b   :  { %v4418_v10 = vpop.eup %3146  ;;  %v4426_v14 = vadd.f32 1e-05, %v787_v19  ;;  %v1892_v57 = vmul.f32 0.03125, %v1856_v28  ;;  %v993_v38 = vmul.f32 %v923_v42, %v801_v63  ;;  %vm4457_vm14 = vmor %vm930_vm13, %vm931_vm12 }
 0x24c   :  { %v926_v44 = vmul.f32 %v4408_v24, %v925_v49  ;;  %v2062_v58 = vmul.f32 %v4418_v10, %v4391_v30  ;;  %v673_v11 = vpop.xlane.xlu0 %672  ;;  %v2060_v22 = vsel %vm4420_vm11, %v4366_v59, %v2056_v9  ;;  %v2179_v9 = vmax.f32 %v2163_v62, 0.0 }
 0x24d   :  { %3148 = vrsqrt.f32 %v4426_v14  ;;  %v1924_v7 = vsub.f32 %v1892_v57, %v1908_v21  ;;  %v1010_v23 = vmul.f32 %v3949_v43, %v993_v38  ;;  %v2130_v47 = vmul.f32 %v2060_v22, %v1938_v16 }
 0x24e   :  { %v927_v37 = vmul.f32 0.5, %v926_v44  ;;  %v2063_v3 = vmul.f32 %v4418_v10, %v2062_v58  ;;  %v1810_v1 = vpop.xlane.xlu1 %1809  ;;  %v4442_v0 = vmul.f32 0.03125, %v673_v11  ;;  %v802_v21 = vsub.f32 %v3826_v36, %v4346_v55 }
 0x24f   :  { %v4440_v41 = vadd.f32 1e-05, %v1924_v7  ;;  %v1027_v26 = vadd.f32 %v3985_v54, %v1010_v23  ;;  %v2147_v4 = vmul.f32 %v4029_v31, %v2130_v47  ;;  %v4448_v6 = vmul.f32 0.03125, %v1810_v1 }
 0x250   :  { %v928_v45 = vsub.f32 1.5, %v927_v37  ;;  %v2064_v59 = vmul.f32 0.5, %v2063_v3  ;;  %v772_v54 = vmul.f32 %v4442_v0, %v4442_v0  ;;  %vm2068_vm15 = vweird.f32 %v4418_v10 }
 0x251   :  { %3150 = vrsqrt.f32 %v4440_v41  ;;  %v1043_v39 = vmax.f32 %v1027_v26, 0.0  ;;  %v2164_v13 = vadd.f32 %v4042_v33, %v2147_v4  ;;  %v1909_v28 = vmul.f32 %v4448_v6, %v4448_v6  ;;  %vm4484_vm1 = vmor %vm2067_vm0, %vm2068_vm15 }
 0x252   :  { %v929_v43 = vmul.f32 %v4408_v24, %v928_v45  ;;  %v721_v50 = vpop.xlane.xlu2 %720  ;;  %v2065_v29 = vsub.f32 1.5, %v2064_v59  ;;  %v1939_v62 = vsub.f32 %v3830_v40, %v4352_v5  ;;  %vm940_vm3 = vweird.f32 %v4426_v14 }
 0x253   :  { %v3149_v51 = vpop.eup %3148  ;;  %v756_v17 = vmul.f32 0.03125, %v721_v50  ;;  %v1054_v34 = vpack.c.bf16 %v1043_v39, %v1042_v8  ;;  %v2180_v56 = vmax.f32 %v2164_v13, 0.0  ;;  %v803_v4 = vsub.f32 %v3838_v52, %v4393_v15  ;;  %v4502_v50 = vld [vmem:[#allocation19 + $0x1] ss:$0 sm:$0xff] }
 0x254   :  { %v935_v63 = vmul.f32 %v3149_v51, %v4426_v14  ;;  %v1858_v19 = vpop.xlane.xlu0 %1857  ;;  %v933_v38 = vsel %vm4457_vm14, %v4408_v24, %v929_v43  ;;  %v2066_v44 = vmul.f32 %v4418_v10, %v2065_v29  ;;  %vm941_vm2 = vweird.f32 %v3149_v51 }
 0x255   :  { %v788_v42 = vsub.f32 %v756_v17, %v772_v54  ;;  %v1893_v48 = vmul.f32 0.03125, %v1858_v19  ;;  %1152 = vmatmul.bf16.gmra.mxu2 %v1054_v34  ;;  %v2191_v22 = vpack.c.bf16 %v2180_v56, %v2179_v9  ;;  %v994_v24 = vmul.f32 %v933_v38, %v802_v21  ;;  %vm942_vm4 = vmor %vm940_vm3, %vm941_vm2 }
 0x256   :  { %v936_v35 = vmul.f32 %v3149_v51, %v935_v63  ;;  %v675_v57 = vpop.xlane.xlu1 %674  ;;  %v2070_v47 = vsel %vm4484_vm1, %v4418_v10, %v2066_v44  ;;  %vm2077_vm6 = vweird.f32 %v4440_v41 }
 0x257   :  { %v4469_v16 = vpop.eup %3150  ;;  %v4472_v58 = vadd.f32 1e-05, %v788_v42  ;;  %v1925_v11 = vsub.f32 %v1893_v48, %v1909_v28  ;;  %v4480_v18 = vmul.f32 0.03125, %v675_v57  ;;  %2289 = vmatmul.bf16.gmra.mxu0 %v2191_v22  ;;  %v1011_v10 = vmul.f32 %v4502_v50, %v994_v24  ;;  %v4523_v28 = vld [vmem:[#allocation19 + $0x2] ss:$0 sm:$0xff] }
 0x258   :  { %v937_v36 = vmul.f32 0.5, %v936_v35  ;;  %v2072_v55 = vmul.f32 %v4469_v16, %v4440_v41  ;;  %vm2078_vm5 = vweird.f32 %v4469_v16  ;;  %v2131_v14 = vmul.f32 %v2070_v47, %v1939_v62 }
 0x259   :  { %3152 = vrsqrt.f32 %v4472_v58  ;;  %v4478_v7 = vadd.f32 1e-05, %v1925_v11  ;;  %v773_v8 = vmul.f32 %v4480_v18, %v4480_v18  ;;  %vm4516_vm7 = vmor %vm2077_vm6, %vm2078_vm5  ;;  %v1028_v42 = vadd.f32 %v4523_v28, %v1011_v10 }
 0x25a   :  { %v938_v3 = vsub.f32 1.5, %v937_v36  ;;  %v2073_v30 = vmul.f32 %v4469_v16, %v2072_v55  ;;  %v1812_v1 = vpop.xlane.xlu2 %1811  ;;  %v1940_v41 = vsub.f32 %v3843_v61, %v4404_v12  ;;  %v2148_v44 = vmul.f32 %v4029_v31, %v2131_v14 }
 0x25b   :  { %3154 = vrsqrt.f32 %v4478_v7  ;;  %v4490_v23 = vmul.f32 0.03125, %v1812_v1  ;;  %v1044_v55 = vmax.f32 %v1028_v42, 0.0  ;;  %vm950_vm9 = vweird.f32 %v4472_v58 }
 0x25c   :  { %v939_v45 = vmul.f32 %v3149_v51, %v938_v3  ;;  %v2074_v59 = vmul.f32 0.5, %v2073_v30  ;;  %v723_v26 = vpop.xlane.xlu0 %722  ;;  %vm2087_vm12 = vweird.f32 %v4478_v7 }
 0x25d   :  { %v757_v43 = vmul.f32 0.03125, %v723_v26  ;;  %v1910_v52 = vmul.f32 %v4490_v23, %v4490_v23  ;;  %v2165_v26 = vadd.f32 %v4042_v33, %v2148_v44 }
 0x25e   :  { %v2075_v39 = vsub.f32 1.5, %v2074_v59  ;;  %v1860_v40 = vpop.xlane.xlu1 %1859  ;;  %v943_v5 = vsel %vm942_vm4, %v3149_v51, %v939_v45 }
 0x25f   :  { %v4506_v13 = vpop.eup %3152  ;;  %v789_v15 = vsub.f32 %v757_v43, %v773_v8  ;;  %v1894_v29 = vmul.f32 0.03125, %v1860_v40  ;;  %v995_v54 = vmul.f32 %v943_v5, %v803_v4 }
 0x260   :  { %v2076_v17 = vmul.f32 %v4469_v16, %v2075_v39  ;;  %v945_v63 = vmul.f32 %v4506_v13, %v4472_v58  ;;  %vm951_vm8 = vweird.f32 %v4506_v13 }
 0x261   :  { %v4514_v19 = vpop.eup %3154  ;;  %v4520_v34 = vadd.f32 1e-05, %v789_v15  ;;  %v1926_v9 = vsub.f32 %v1894_v29, %v1910_v52  ;;  %v1012_v49 = vmul.f32 %v4502_v50, %v995_v54  ;;  %vm4555_vm10 = vmor %vm950_vm9, %vm951_vm8  ;;  %v804_v54 = vsub.f32 %v3859_v20, %v4442_v0 }
 0x262   :  { %v946_v48 = vmul.f32 %v4506_v13, %v945_v63  ;;  %v2082_v56 = vmul.f32 %v4514_v19, %v4478_v7  ;;  %v677_v21 = vpop.xlane.xlu2 %676  ;;  %v2080_v35 = vsel %vm4516_vm7, %v4469_v16, %v2076_v17  ;;  %vm2088_vm11 = vweird.f32 %v4514_v19 }
 0x263   :  { %3156 = vrsqrt.f32 %v4520_v34  ;;  %v4535_v57 = vadd.f32 1e-05, %v1926_v9  ;;  %v4537_v38 = vmul.f32 0.03125, %v677_v21  ;;  %v1029_v22 = vadd.f32 %v4523_v28, %v1012_v49  ;;  %vm4581_vm13 = vmor %vm2087_vm12, %vm2088_vm11 }
 0x264   :  { %v947_v11 = vmul.f32 0.5, %v946_v48  ;;  %v2083_v61 = vmul.f32 %v4514_v19, %v2082_v56  ;;  %v679_v12 = vpop.xlane.xlu0 %678  ;;  %v2132_v36 = vmul.f32 %v2080_v35, %v1940_v41  ;;  %v2181_v9 = vmax.f32 %v2165_v26, 0.0 }
 0x265   :  { %3158 = vrsqrt.f32 %v4535_v57  ;;  %v4543_v37 = vmul.f32 0.03125, %v679_v12  ;;  %v1045_v30 = vmax.f32 %v1029_v22, 0.0  ;;  %v774_v1 = vmul.f32 %v4537_v38, %v4537_v38 }
 0x266   :  { %v948_v24 = vsub.f32 1.5, %v947_v11  ;;  %v2084_v16 = vmul.f32 0.5, %v2083_v61  ;;  %v725_v3 = vpop.xlane.xlu1 %724  ;;  %v2149_v62 = vmul.f32 %v4029_v31, %v2132_v36  ;;  %v1941_v35 = vsub.f32 %v3864_v27, %v4448_v6 }
 0x267   :  { %v758_v47 = vmul.f32 0.03125, %v725_v3  ;;  %v1055_v43 = vpack.c.bf16 %v1045_v30, %v1044_v55  ;;  %v775_v5 = vmul.f32 %v4543_v37, %v4543_v37  ;;  %vm960_vm15 = vweird.f32 %v4520_v34 }
 0x268   :  { %v949_v45 = vmul.f32 %v4506_v13, %v948_v24  ;;  %v2085_v59 = vsub.f32 1.5, %v2084_v16  ;;  %v2166_v10 = vadd.f32 %v4042_v33, %v2149_v62  ;;  %v805_v55 = vsub.f32 %v3889_v2, %v4480_v18 }
 0x269   :  { %v4551_v4 = vpop.eup %3156  ;;  %v790_v8 = vsub.f32 %v758_v47, %v774_v1  ;;  %1157 = vmatmul.bf16.gmra.mxu2 %v1055_v43  ;;  %vm2097_vm2 = vweird.f32 %v4535_v57  ;;  %v806_v42 = vsub.f32 %v3921_v53, %v4537_v38 }
 0x26a   :  { %v2086_v40 = vmul.f32 %v4514_v19, %v2085_v59  ;;  %v955_v31 = vmul.f32 %v4551_v4, %v4520_v34  ;;  %v727_v14 = vpop.xlane.xlu2 %726  ;;  %v2182_v15 = vmax.f32 %v2166_v10, 0.0  ;;  %v953_v29 = vsel %vm4555_vm10, %v4506_v13, %v949_v45 }
 0x26b   :  { %v4565_v58 = vpop.eup %3158  ;;  %v4567_v52 = vadd.f32 1e-05, %v790_v8  ;;  %v759_v33 = vmul.f32 0.03125, %v727_v14  ;;  %v996_v48 = vmul.f32 %v953_v29, %v804_v54  ;;  %vm961_vm14 = vweird.f32 %v4551_v4  ;;  %v4633_v29 = vld [vmem:[#allocation19 + $0xa] ss:$0 sm:$0xff] }
 0x26c   :  { %v956_v17 = vmul.f32 %v4551_v4, %v955_v31  ;;  %v2092_v63 = vmul.f32 %v4565_v58, %v4535_v57  ;;  %v1814_v51 = vpop.xlane.xlu0 %1813  ;;  %v2192_v0 = vpack.c.bf16 %v2182_v15, %v2181_v9  ;;  %v2090_v7 = vsel %vm4581_vm13, %v4514_v19, %v2086_v40  ;;  %vm962_vm1 = vmor %vm960_vm15, %vm961_vm14  ;;  %v4621_v57 = vld [vmem:[#allocation19 + $0x9] ss:$0 sm:$0xff] }
 0x26d   :  { %3160 = vrsqrt.f32 %v4567_v52  ;;  %v791_v49 = vsub.f32 %v759_v33, %v775_v5  ;;  %v4588_v21 = vmul.f32 0.03125, %v1814_v51  ;;  %vm2098_vm0 = vweird.f32 %v4565_v58 }
 0x26e   :  { %v957_v13 = vmul.f32 0.5, %v956_v17  ;;  %v2093_v20 = vmul.f32 %v4565_v58, %v2092_v63  ;;  %v1816_v41 = vpop.xlane.xlu1 %1815  ;;  %2294 = vmatmul.bf16.gmra.mxu0 %v2192_v0  ;;  %v1013_v36 = vmul.f32 %v4502_v50, %v996_v48  ;;  %v2133_v27 = vmul.f32 %v2090_v7, %v1941_v35  ;;  %vm2099_vm3 = vmor %vm2097_vm2, %vm2098_vm0  ;;  %v4642_v0 = vld [vmem:[#allocation19 + $0x3] ss:$0 sm:$0xff] }
 0x26f   :  { %v4586_v56 = vadd.f32 1e-05, %v791_v49  ;;  %v4599_v61 = vmul.f32 0.03125, %v1816_v41  ;;  %v1942_v34 = vsub.f32 %v3902_v25, %v4490_v23  ;;  %v1911_v24 = vmul.f32 %v4588_v21, %v4588_v21 }
 0x270   :  { %v958_v44 = vsub.f32 1.5, %v957_v13  ;;  %v2094_v11 = vmul.f32 0.5, %v2093_v20  ;;  %v1030_v45 = vadd.f32 %v4523_v28, %v1013_v36  ;;  %v2150_v26 = vmul.f32 %v4621_v57, %v2133_v27 }
 0x271   :  { %3162 = vrsqrt.f32 %v4586_v56  ;;  %v1912_v2 = vmul.f32 %v4599_v61, %v4599_v61  ;;  %vm970_vm5 = vweird.f32 %v4567_v52  ;;  %vm980_vm8 = vweird.f32 %v4586_v56 }
 0x272   :  { %v959_v12 = vmul.f32 %v4551_v4, %v958_v44  ;;  %v2095_v22 = vsub.f32 1.5, %v2094_v11  ;;  %v1862_v19 = vpop.xlane.xlu2 %1861  ;;  %v2167_v54 = vadd.f32 %v4633_v29, %v2150_v26  ;;  %v1046_v17 = vmax.f32 %v1030_v45, 0.0  ;;  %v4644_v44 = vld [vmem:[#allocation19 + $0xb] ss:$0 sm:$0xff] }
 0x273   :  { %v3161_v6 = vpop.eup %3160  ;;  %v1895_v16 = vmul.f32 0.03125, %v1862_v19  ;;  %v807_v36 = vsub.f32 %v3964_v60, %v4543_v37 }
 0x274   :  { %v2096_v3 = vmul.f32 %v4565_v58, %v2095_v22  ;;  %v965_v30 = vmul.f32 %v3161_v6, %v4567_v52  ;;  %v1864_v1 = vpop.xlane.xlu0 %1863  ;;  %v963_v47 = vsel %vm962_vm1, %v4551_v4, %v959_v12  ;;  %vm971_vm4 = vweird.f32 %v3161_v6 }
 0x275   :  { %v1927_v25 = vsub.f32 %v1895_v16, %v1911_v24  ;;  %v1896_v18 = vmul.f32 0.03125, %v1864_v1  ;;  %v997_v23 = vmul.f32 %v963_v47, %v805_v55  ;;  %vm972_vm6 = vmor %vm970_vm5, %vm971_vm4  ;;  %v2183_v41 = vmax.f32 %v2167_v54, 0.0 }
 0x276   :  { %v966_v62 = vmul.f32 %v3161_v6, %v965_v30  ;;  %v2100_v59 = vsel %vm2099_vm3, %v4565_v58, %v2096_v3 }
 0x277   :  { %v3163_v8 = vpop.eup %3162  ;;  %v4624_v4 = vadd.f32 1e-05, %v1927_v25  ;;  %v1928_v43 = vsub.f32 %v1896_v18, %v1912_v2  ;;  %v1014_v10 = vmul.f32 %v4502_v50, %v997_v23  ;;  %v2134_v39 = vmul.f32 %v2100_v59, %v1942_v34 }
 0x278   :  { %v967_v40 = vmul.f32 0.5, %v966_v62  ;;  %v975_v31 = vmul.f32 %v3163_v8, %v4586_v56  ;;  %vm981_vm7 = vweird.f32 %v3163_v8 }
 0x279   :  { %3164 = vrsqrt.f32 %v4624_v4  ;;  %v4629_v5 = vadd.f32 1e-05, %v1928_v43  ;;  %v1031_v14 = vadd.f32 %v4523_v28, %v1014_v10  ;;  %v2151_v15 = vmul.f32 %v4621_v57, %v2134_v39  ;;  %vm982_vm9 = vmor %vm980_vm8, %vm981_vm7 }
 0x27a   :  { %v968_v58 = vsub.f32 1.5, %v967_v40  ;;  %v976_v33 = vmul.f32 %v3163_v8, %v975_v31  ;;  %vm2107_vm12 = vweird.f32 %v4624_v4 }
 0x27b   :  { %3166 = vrsqrt.f32 %v4629_v5  ;;  %v1047_v63 = vmax.f32 %v1031_v14, 0.0  ;;  %v2168_v49 = vadd.f32 %v4633_v29, %v2151_v15  ;;  %vm2117_vm13 = vweird.f32 %v4629_v5 }
 0x27c   :  { %v969_v51 = vmul.f32 %v3161_v6, %v968_v58  ;;  %v977_v9 = vmul.f32 0.5, %v976_v33 }
 0x27d   :  { %v1056_v13 = vpack.c.bf16 %v1047_v63, %v1046_v17  ;;  %v2184_v48 = vmax.f32 %v2168_v49, 0.0 }
 0x27e   :  { %v978_v20 = vsub.f32 1.5, %v977_v9  ;;  %v973_v7 = vsel %vm972_vm6, %v3161_v6, %v969_v51 }
 0x27f   :  { %v3165_v35 = vpop.eup %3164  ;;  %1162 = vmatmul.bf16.gmra.mxu2 %v1056_v13  ;;  %v998_v52 = vmul.f32 %v973_v7, %v806_v42  ;;  %v2193_v22 = vpack.c.bf16 %v2184_v48, %v2183_v41  ;;  %v1133_v38 = vpop.f32.mrf.mxu2 }
 0x280   :  { %v979_v11 = vmul.f32 %v3163_v8, %v978_v20  ;;  %v2102_v12 = vmul.f32 %v3165_v35, %v4624_v4  ;;  %v2270_v19 = vpop.f32.mrf.mxu0  ;;  %v4652_v55 = vadd.f32 %v4642_v0, %v1133_v38  ;;  %vm2108_vm10 = vweird.f32 %v3165_v35 }
 0x281   :  { %v3167_v53 = vpop.eup %3166  ;;  %2299 = vmatmul.bf16.gmra.mxu0 %v2193_v22  ;;  %v4655_v34 = vadd.f32 %v4644_v44, %v2270_v19  ;;  %v1015_v16 = vmul.f32 %v4502_v50, %v998_v52  ;;  %vm2109_vm14 = vmor %vm2107_vm12, %vm2108_vm10 }
 0x282   :  { %v2103_v27 = vmul.f32 %v3165_v35, %v2102_v12  ;;  %v2112_v6 = vmul.f32 %v3167_v53, %v4629_v5  ;;  %v983_v24 = vsel %vm982_vm9, %v3163_v8, %v979_v11  ;;  %1175 = vadd.xlane.f32.xlu1 %v4652_v55  ;;  %v1207_v60 = vmul.f32 %v4652_v55, %v4652_v55 }
 0x283   :  { %v999_v37 = vmul.f32 %v983_v24, %v807_v36  ;;  %2312 = vadd.xlane.f32.xlu0 %v4655_v34  ;;  %v1032_v2 = vadd.f32 %v4523_v28, %v1015_v16  ;;  %vm2118_vm11 = vweird.f32 %v3167_v53  ;;  %v1943_v8 = vsub.f32 %v3952_v46, %v4588_v21 }
 0x284   :  { %v2104_v56 = vmul.f32 0.5, %v2103_v27  ;;  %v2113_v3 = vmul.f32 %v3167_v53, %v2112_v6  ;;  %1223 = vadd.xlane.f32.xlu2 %v1207_v60  ;;  %vm2119_vm15 = vmor %vm2117_vm13, %vm2118_vm11 }
 0x285   :  { %v1016_v47 = vmul.f32 %v4502_v50, %v999_v37  ;;  %v2344_v50 = vmul.f32 %v4655_v34, %v4655_v34  ;;  %v1048_v4 = vmax.f32 %v1032_v2, 0.0 }
 0x286   :  { %v2105_v30 = vsub.f32 1.5, %v2104_v56  ;;  %v2114_v1 = vmul.f32 0.5, %v2113_v3 }
 0x287   :  { %v1033_v23 = vadd.f32 %v4523_v28, %v1016_v47  ;;  %v1135_v62 = vpop.f32.mrf.mxu2  ;;  %v1944_v28 = vsub.f32 %v4034_v32, %v4599_v61 }
 0x288   :  { %v2106_v25 = vmul.f32 %v3165_v35, %v2105_v30  ;;  %v2115_v18 = vsub.f32 1.5, %v2114_v1  ;;  %v4668_v59 = vadd.f32 %v4642_v0, %v1135_v62  ;;  %v2272_v40 = vpop.f32.mrf.mxu0 }
 0x289   :  { %v1049_v26 = vmax.f32 %v1033_v23, 0.0  ;;  %v4682_v21 = vadd.f32 %v4644_v44, %v2272_v40 }
 0x28a   :  { %v2116_v45 = vmul.f32 %v3167_v53, %v2115_v18  ;;  %v2110_v43 = vsel %vm2109_vm14, %v3165_v35, %v2106_v25  ;;  %2360 = vadd.xlane.f32.xlu1 %v2344_v50  ;;  %v1208_v10 = vmul.f32 %v4668_v59, %v4668_v59 }
 0x28b   :  { %v1057_v31 = vpack.c.bf16 %v1049_v26, %v1048_v4  ;;  %v2135_v5 = vmul.f32 %v2110_v43, %v1943_v8  ;;  %v2345_v54 = vmul.f32 %v4682_v21, %v4682_v21 }
 0x28c   :  { %v2120_v39 = vsel %vm2119_vm15, %v3167_v53, %v2116_v45  ;;  %1225 = vadd.xlane.f32.xlu0 %v1208_v10  ;;  %1177 = vadd.xlane.f32.xlu2 %v4668_v59 }
 0x28d   :  { %v2136_v14 = vmul.f32 %v2120_v39, %v1944_v28  ;;  %v2152_v46 = vmul.f32 %v4621_v57, %v2135_v5 }
 0x28f   :  { %1167 = vmatmul.bf16.gmra.mxu2 %v1057_v31  ;;  %v2153_v32 = vmul.f32 %v4621_v57, %v2136_v14  ;;  %v2169_v61 = vadd.f32 %v4633_v29, %v2152_v46 }
 0x291   :  { %v2170_v58 = vadd.f32 %v4633_v29, %v2153_v32  ;;  %v2185_v33 = vmax.f32 %v2169_v61, 0.0 }
 0x292   :  { %2314 = vadd.xlane.f32.xlu1 %v4682_v21 }
 0x293   :  { %v2186_v15 = vmax.f32 %v2170_v58, 0.0 }
 0x294   :  { %2362 = vadd.xlane.f32.xlu2 %v2345_v54  ;;  %v2275_v63 = vpop.f32.mrf.mxu0 }
 0x295   :  { %v2194_v17 = vpack.c.bf16 %v2186_v15, %v2185_v33  ;;  %v4693_v9 = vadd.f32 %v4644_v44, %v2275_v63 }
 0x297   :  { %2304 = vmatmul.bf16.gmra.mxu0 %v2194_v17  ;;  %v2346_v13 = vmul.f32 %v4693_v9, %v4693_v9 }
 0x298   :  { %v1138_v51 = vpop.f32.mrf.mxu2 }
 0x299   :  { %v4690_v57 = vadd.f32 %v4642_v0, %v1138_v51 }
 0x29b   :  { %1179 = vadd.xlane.f32.xlu0 %v4690_v57  ;;  %v1209_v29 = vmul.f32 %v4690_v57, %v4690_v57 }
 0x29c   :  { %2316 = vadd.xlane.f32.xlu2 %v4693_v9  ;;  %v2277_v41 = vpop.f32.mrf.mxu0 }
 0x29d   :  { %1227 = vadd.xlane.f32.xlu1 %v1209_v29  ;;  %v4708_v48 = vadd.f32 %v4644_v44, %v2277_v41 }
 0x29f   :  { %v2347_v7 = vmul.f32 %v4708_v48, %v4708_v48 }
 0x2a0   :  { %v1140_v49 = vpop.f32.mrf.mxu2 }
 0x2a1   :  { %v4700_v42 = vadd.f32 %v4642_v0, %v1140_v49 }
 0x2a3   :  { %2364 = vadd.xlane.f32.xlu0 %v2346_v13  ;;  %v1210_v20 = vmul.f32 %v4700_v42, %v4700_v42 }
 0x2a5   :  { %1181 = vadd.xlane.f32.xlu1 %v4700_v42  ;;  %1229 = vadd.xlane.f32.xlu2 %v1210_v20 }
 0x2ab   :  { %2318 = vadd.xlane.f32.xlu0 %v4708_v48  ;;  %v2280_v11 = vpop.f32.mrf.mxu0 }
 0x2ac   :  { %v1143_v35 = vpop.f32.mrf.mxu2  ;;  %v4720_v22 = vadd.f32 %v4644_v44, %v2280_v11 }
 0x2ad   :  { %2366 = vadd.xlane.f32.xlu1 %v2347_v7  ;;  %v4714_v52 = vadd.f32 %v4642_v0, %v1143_v35 }
 0x2ae   :  { %v2348_v38 = vmul.f32 %v4720_v22, %v4720_v22 }
 0x2af   :  { %1183 = vadd.xlane.f32.xlu2 %v4714_v52  ;;  %v1211_v12 = vmul.f32 %v4714_v52, %v4714_v52 }
 0x2b3   :  { %1231 = vadd.xlane.f32.xlu0 %v1211_v12  ;;  %v2282_v36 = vpop.f32.mrf.mxu0 }
 0x2b4   :  { %v1145_v53 = vpop.f32.mrf.mxu2  ;;  %v4732_v6 = vadd.f32 %v4644_v44, %v2282_v36 }
 0x2b5   :  { %2320 = vadd.xlane.f32.xlu1 %v4720_v22  ;;  %v4726_v19 = vadd.f32 %v4642_v0, %v1145_v53 }
 0x2b6   :  { %v2349_v24 = vmul.f32 %v4732_v6, %v4732_v6 }
 0x2b7   :  { %2368 = vadd.xlane.f32.xlu2 %v2348_v38  ;;  %v1212_v27 = vmul.f32 %v4726_v19, %v4726_v19 }
 0x2bb   :  { %1185 = vadd.xlane.f32.xlu0 %v4726_v19 }
 0x2bd   :  { %1233 = vadd.xlane.f32.xlu1 %v1212_v27 }
 0x2be   :  { %v2285_v3 = vpop.f32.mrf.mxu0 }
 0x2bf   :  { %2322 = vadd.xlane.f32.xlu2 %v4732_v6  ;;  %v4744_v37 = vadd.f32 %v4644_v44, %v2285_v3 }
 0x2c1   :  { %v2350_v1 = vmul.f32 %v4744_v37, %v4744_v37 }
 0x2c2   :  { %v1148_v16 = vpop.f32.mrf.mxu2 }
 0x2c3   :  { %v4738_v56 = vadd.f32 %v4642_v0, %v1148_v16  ;;  %2370 = vadd.xlane.f32.xlu0 %v2349_v24 }
 0x2c5   :  { %1187 = vadd.xlane.f32.xlu1 %v4738_v56  ;;  %v1213_v60 = vmul.f32 %v4738_v56, %v4738_v56 }
 0x2c6   :  { %v2287_v2 = vpop.f32.mrf.mxu0 }
 0x2c7   :  { %1235 = vadd.xlane.f32.xlu2 %v1213_v60  ;;  %v4756_v18 = vadd.f32 %v4644_v44, %v2287_v2 }
 0x2c9   :  { %v2351_v23 = vmul.f32 %v4756_v18, %v4756_v18 }
 0x2ca   :  { %v1150_v30 = vpop.f32.mrf.mxu2 }
 0x2cb   :  { %2324 = vadd.xlane.f32.xlu0 %v4744_v37  ;;  %v4750_v47 = vadd.f32 %v4642_v0, %v1150_v30 }
 0x2cd   :  { %2372 = vadd.xlane.f32.xlu1 %v2350_v1  ;;  %v1214_v25 = vmul.f32 %v4750_v47, %v4750_v47 }
 0x2cf   :  { %1189 = vadd.xlane.f32.xlu2 %v4750_v47 }
 0x2d3   :  { %1237 = vadd.xlane.f32.xlu0 %v1214_v25 }
 0x2d4   :  { %v2290_v50 = vpop.f32.mrf.mxu0 }
 0x2d5   :  { %2326 = vadd.xlane.f32.xlu1 %v4756_v18  ;;  %v4768_v8 = vadd.f32 %v4644_v44, %v2290_v50 }
 0x2d7   :  { %2374 = vadd.xlane.f32.xlu2 %v2351_v23  ;;  %v2352_v4 = vmul.f32 %v4768_v8, %v4768_v8 }
 0x2d8   :  { %v1153_v62 = vpop.f32.mrf.mxu2 }
 0x2d9   :  { %v4762_v45 = vadd.f32 %v4642_v0, %v1153_v62 }
 0x2db   :  { %1191 = vadd.xlane.f32.xlu0 %v4762_v45  ;;  %v1215_v26 = vmul.f32 %v4762_v45, %v4762_v45 }
 0x2dc   :  { %v2292_v10 = vpop.f32.mrf.mxu0 }
 0x2dd   :  { %1239 = vadd.xlane.f32.xlu1 %v1215_v26  ;;  %v4780_v40 = vadd.f32 %v4644_v44, %v2292_v10 }
 0x2df   :  { %2328 = vadd.xlane.f32.xlu2 %v4768_v8  ;;  %v2353_v31 = vmul.f32 %v4780_v40, %v4780_v40 }
 0x2e0   :  { %v1155_v28 = vpop.f32.mrf.mxu2 }
 0x2e1   :  { %v4774_v43 = vadd.f32 %v4642_v0, %v1155_v28 }
 0x2e3   :  { %2376 = vadd.xlane.f32.xlu0 %v2352_v4  ;;  %v1216_v39 = vmul.f32 %v4774_v43, %v4774_v43 }
 0x2e5   :  { %1193 = vadd.xlane.f32.xlu1 %v4774_v43 }
 0x2e7   :  { %1241 = vadd.xlane.f32.xlu2 %v1216_v39 }
 0x2eb   :  { %2330 = vadd.xlane.f32.xlu0 %v4780_v40  ;;  %v2295_v46 = vpop.f32.mrf.mxu0 }
 0x2ec   :  { %v1158_v5 = vpop.f32.mrf.mxu2  ;;  %v4792_v61 = vadd.f32 %v4644_v44, %v2295_v46 }
 0x2ed   :  { %2378 = vadd.xlane.f32.xlu1 %v2353_v31  ;;  %v4786_v14 = vadd.f32 %v4642_v0, %v1158_v5 }
 0x2ee   :  { %v2354_v15 = vmul.f32 %v4792_v61, %v4792_v61 }
 0x2ef   :  { %1195 = vadd.xlane.f32.xlu2 %v4786_v14  ;;  %v1217_v32 = vmul.f32 %v4786_v14, %v4786_v14 }
 0x2f3   :  { %1243 = vadd.xlane.f32.xlu0 %v1217_v32  ;;  %v2297_v29 = vpop.f32.mrf.mxu0 }
 0x2f4   :  { %v1160_v58 = vpop.f32.mrf.mxu2  ;;  %v4810_v35 = vadd.f32 %v4644_v44, %v2297_v29 }
 0x2f5   :  { %2332 = vadd.xlane.f32.xlu1 %v4792_v61  ;;  %v1176_v33 = vpop.xlane.xlu1 %1175  ;;  %v4800_v63 = vadd.f32 %v4642_v0, %v1160_v58 }
 0x2f6   :  { %v4797_v54 = vmul.f32 0.03125, %v1176_v33  ;;  %v2313_v17 = vpop.xlane.xlu0 %2312  ;;  %v2355_v30 = vmul.f32 %v4810_v35, %v4810_v35 }
 0x2f7   :  { %v1224_v51 = vpop.xlane.xlu2 %1223  ;;  %2380 = vadd.xlane.f32.xlu2 %v2354_v15  ;;  %v4804_v20 = vmul.f32 0.03125, %v2313_v17  ;;  %v1218_v7 = vmul.f32 %v4800_v63, %v4800_v63 }
 0x2f8   :  { %v1287_v49 = vmul.f32 %v4797_v54, %v4797_v54  ;;  %v1271_v13 = vmul.f32 0.03125, %v1224_v51 }
 0x2f9   :  { %v2424_v53 = vmul.f32 %v4804_v20, %v4804_v20 }
 0x2fa   :  { %v1303_v41 = vsub.f32 %v1271_v13, %v1287_v49 }
 0x2fb   :  { %1197 = vadd.xlane.f32.xlu0 %v4800_v63 }
 0x2fc   :  { %v1335_v11 = vadd.f32 1e-05, %v1303_v41 }
 0x2fd   :  { %1245 = vadd.xlane.f32.xlu1 %v1218_v7  ;;  %v2361_v12 = vpop.xlane.xlu1 %2360 }
 0x2fe   :  { %3168 = vrsqrt.f32 %v1335_v11  ;;  %v2408_v38 = vmul.f32 0.03125, %v2361_v12  ;;  %v2300_v3 = vpop.f32.mrf.mxu0  ;;  %vm1357_vm1 = vweird.f32 %v1335_v11 }
 0x2ff   :  { %v1226_v36 = vpop.xlane.xlu0 %1225  ;;  %v1178_v27 = vpop.xlane.xlu2 %1177  ;;  %2334 = vadd.xlane.f32.xlu2 %v4810_v35  ;;  %v4833_v39 = vadd.f32 %v4644_v44, %v2300_v3  ;;  %v4853_v3 = vld [vmem:[#allocation19 + $0x4] ss:$0 sm:$0xff] }
 0x300   :  { %v2440_v24 = vsub.f32 %v2408_v38, %v2424_v53  ;;  %v4815_v16 = vmul.f32 0.03125, %v1178_v27  ;;  %v1272_v25 = vmul.f32 0.03125, %v1226_v36 }
 0x301   :  { %v2356_v29 = vmul.f32 %v4833_v39, %v4833_v39 }
 0x302   :  { %v1163_v60 = vpop.f32.mrf.mxu2  ;;  %v4822_v2 = vadd.f32 1e-05, %v2440_v24  ;;  %v1288_v23 = vmul.f32 %v4815_v16, %v4815_v16  ;;  %v1319_v24 = vsub.f32 %v4652_v55, %v4797_v54 }
 0x303   :  { %v4820_v1 = vadd.f32 %v4642_v0, %v1163_v60  ;;  %2382 = vadd.xlane.f32.xlu0 %v2355_v30 }
 0x304   :  { %v3169_v50 = vpop.eup %3168  ;;  %3170 = vrsqrt.f32 %v4822_v2  ;;  %v1304_v26 = vsub.f32 %v1272_v25, %v1288_v23  ;;  %vm2494_vm4 = vweird.f32 %v4822_v2 }
 0x305   :  { %v1219_v62 = vmul.f32 %v4820_v1, %v4820_v1  ;;  %1199 = vadd.xlane.f32.xlu1 %v4820_v1  ;;  %v1352_v28 = vmul.f32 %v3169_v50, %v1335_v11  ;;  %v2315_v4 = vpop.xlane.xlu1 %2314  ;;  %vm1358_vm0 = vweird.f32 %v3169_v50 }
 0x306   :  { %v4830_v10 = vadd.f32 1e-05, %v1304_v26  ;;  %v4835_v31 = vmul.f32 0.03125, %v2315_v4  ;;  %v2302_v51 = vpop.f32.mrf.mxu0  ;;  %vm1359_vm2 = vmor %vm1357_vm1, %vm1358_vm0 }
 0x307   :  { %v1353_v5 = vmul.f32 %v3169_v50, %v1352_v28  ;;  %v2363_v46 = vpop.xlane.xlu2 %2362  ;;  %1247 = vadd.xlane.f32.xlu2 %v1219_v62  ;;  %v4860_v62 = vld [vmem:[#allocation19 + $0x5] ss:$0 sm:$0xff] }
 0x308   :  { %3172 = vrsqrt.f32 %v4830_v10  ;;  %v2425_v32 = vmul.f32 %v4835_v31, %v4835_v31  ;;  %v2409_v15 = vmul.f32 0.03125, %v2363_v46  ;;  %vm1367_vm7 = vweird.f32 %v4830_v10 }
 0x309   :  { %v1354_v33 = vmul.f32 0.5, %v1353_v5 }
 0x30a   :  { %v1165_v58 = vpop.f32.mrf.mxu2  ;;  %v3171_v17 = vpop.eup %3170  ;;  %v2441_v41 = vsub.f32 %v2409_v15, %v2425_v32  ;;  %v4871_v32 = vadd.f32 %v4644_v44, %v2302_v51  ;;  %v1577_v51 = vld [vmem:[#allocation11] sm:$0xff] }
 0x30b   :  { %2336 = vadd.xlane.f32.xlu0 %v4833_v39  ;;  %v1355_v49 = vsub.f32 1.5, %v1354_v33  ;;  %v2489_v13 = vmul.f32 %v3171_v17, %v4822_v2  ;;  %v4845_v7 = vadd.f32 %v4642_v0, %v1165_v58  ;;  %vm2495_vm3 = vweird.f32 %v3171_v17 }
 0x30c   :  { %v4847_v38 = vadd.f32 1e-05, %v2441_v41  ;;  %v2456_v41 = vsub.f32 %v4655_v34, %v4804_v20  ;;  %vm2496_vm5 = vmor %vm2494_vm4, %vm2495_vm3  ;;  %v4891_v20 = vld [vmem:[#allocation19 + $0xd] ss:$0 sm:$0xff] }
 0x30d   :  { %2384 = vadd.xlane.f32.xlu1 %v2356_v29  ;;  %v1356_v12 = vmul.f32 %v3169_v50, %v1355_v49  ;;  %v2490_v53 = vmul.f32 %v3171_v17, %v2489_v13  ;;  %v1220_v54 = vmul.f32 %v4845_v7, %v4845_v7 }
 0x30e   :  { %v1180_v36 = vpop.xlane.xlu0 %1179  ;;  %v4849_v27 = vpop.eup %3172  ;;  %3174 = vrsqrt.f32 %v4847_v38  ;;  %vm2504_vm10 = vweird.f32 %v4847_v38 }
 0x30f   :  { %v4855_v60 = vmul.f32 0.03125, %v1180_v36  ;;  %v1360_v30 = vsel %vm1359_vm2, %v3169_v50, %v1356_v12  ;;  %v2491_v25 = vmul.f32 0.5, %v2490_v53  ;;  %v1362_v23 = vmul.f32 %v4849_v27, %v4830_v10  ;;  %1201 = vadd.xlane.f32.xlu2 %v4845_v7  ;;  %v2317_v28 = vpop.xlane.xlu2 %2316  ;;  %v4881_v53 = vld [vmem:[#allocation19 + $0xc] ss:$0 sm:$0xff] }
 0x310   :  { %v1228_v11 = vpop.xlane.xlu1 %1227  ;;  %v1511_v26 = vmul.f32 %v1360_v30, %v1319_v24  ;;  %v4873_v49 = vmul.f32 0.03125, %v2317_v28  ;;  %vm1368_vm6 = vweird.f32 %v4849_v27 }
 0x311   :  { %v2492_v4 = vsub.f32 1.5, %v2491_v25  ;;  %v1363_v50 = vmul.f32 %v4849_v27, %v1362_v23  ;;  %v1289_v5 = vmul.f32 %v4855_v60, %v4855_v60  ;;  %v1273_v58 = vmul.f32 0.03125, %v1228_v11  ;;  %vm1369_vm8 = vmor %vm1367_vm7, %vm1368_vm6 }
 0x312   :  { %v1168_v55 = vpop.f32.mrf.mxu2  ;;  %v1528_v46 = vmul.f32 %v4853_v3, %v1511_v26 }
 0x313   :  { %1249 = vadd.xlane.f32.xlu0 %v1220_v54  ;;  %v2493_v15 = vmul.f32 %v3171_v17, %v2492_v4  ;;  %v1364_v29 = vmul.f32 0.5, %v1363_v50  ;;  %v1305_v2 = vsub.f32 %v1273_v58, %v1289_v5  ;;  %v4887_v30 = vadd.f32 %v4642_v0, %v1168_v55 }
 0x314   :  { %v2305_v33 = vpop.f32.mrf.mxu0  ;;  %v1545_v12 = vadd.f32 %v4860_v62, %v1528_v46  ;;  %v4889_v23 = vpop.eup %3174  ;;  %v2426_v55 = vmul.f32 %v4873_v49, %v4873_v49  ;;  %v1320_v46 = vsub.f32 %v4668_v59, %v4815_v16 }
 0x315   :  { %v4876_v13 = vadd.f32 %v4644_v44, %v2305_v33  ;;  %2338 = vadd.xlane.f32.xlu1 %v4871_v32  ;;  %v2497_v36 = vsel %vm2496_vm5, %v3171_v17, %v2493_v15  ;;  %v1365_v24 = vsub.f32 1.5, %v1364_v29  ;;  %v4893_v26 = vadd.f32 1e-05, %v1305_v2 }
 0x316   :  { %v2365_v25 = vpop.xlane.xlu0 %2364  ;;  %v1561_v34 = vmax.f32 %v1545_v12, 0.0  ;;  %v2648_v11 = vmul.f32 %v2497_v36, %v2456_v41  ;;  %v2499_v17 = vmul.f32 %v4889_v23, %v4847_v38  ;;  %v1221_v41 = vmul.f32 %v4887_v30, %v4887_v30 }
 0x317   :  { %v2410_v28 = vmul.f32 0.03125, %v2365_v25  ;;  %v1366_v54 = vmul.f32 %v4849_v27, %v1365_v24  ;;  %2340 = vadd.xlane.f32.xlu2 %v4876_v13  ;;  %3176 = vrsqrt.f32 %v4893_v26  ;;  %vm2505_vm9 = vweird.f32 %v4889_v23 }
 0x318   :  { %v1182_v4 = vpop.xlane.xlu1 %1181  ;;  %v1593_v50 = vadd.f32 %v1577_v51, %v1561_v34  ;;  %v2665_v5 = vmul.f32 %v4881_v53, %v2648_v11  ;;  %v2500_v33 = vmul.f32 %v4889_v23, %v2499_v17  ;;  %v1230_v29 = vpop.xlane.xlu2 %1229  ;;  %vm2506_vm11 = vmor %vm2504_vm10, %vm2505_vm9  ;;  %vm1377_vm13 = vweird.f32 %v4893_v26 }
 0x319   :  { %v1370_v58 = vsel %vm1369_vm8, %v4849_v27, %v1366_v54  ;;  %v2442_v15 = vsub.f32 %v2410_v28, %v2426_v55  ;;  %v4913_v59 = vmul.f32 0.03125, %v1182_v4  ;;  %v1274_v25 = vmul.f32 0.03125, %v1230_v29 }
 0x31a   :  { %v1170_v10 = vpop.f32.mrf.mxu2  ;;  %1609 = vst [vmem:[#allocation20] sm:$0xff] %v1593_v50  ;;  %v2682_v12 = vadd.f32 %v4891_v20, %v2665_v5  ;;  %v1512_v2 = vmul.f32 %v1370_v58, %v1320_v46  ;;  %v2501_v51 = vmul.f32 0.5, %v2500_v33  ;;  %v1578_v5 = vld [vmem:[#allocation11 + $0x8] sm:$0xff]  ;;  %v2457_v46 = vsub.f32 %v4682_v21, %v4835_v31 }
 0x31b   :  { %v4916_v16 = vadd.f32 %v4642_v0, %v1170_v10  ;;  %1203 = vadd.xlane.f32.xlu0 %v4887_v30  ;;  %v4919_v27 = vadd.f32 1e-05, %v2442_v15  ;;  %v1290_v34 = vmul.f32 %v4913_v59, %v4913_v59 }
 0x31c   :  { %v2698_v36 = vmax.f32 %v2682_v12, 0.0  ;;  %v1529_v24 = vmul.f32 %v4853_v3, %v1512_v2  ;;  %v2502_v11 = vsub.f32 1.5, %v2501_v51  ;;  %v2307_v0 = vpop.f32.mrf.mxu0 }
 0x31d   :  { %1251 = vadd.xlane.f32.xlu1 %v1221_v41  ;;  %3178 = vrsqrt.f32 %v4919_v27  ;;  %v1222_v54 = vmul.f32 %v4916_v16, %v4916_v16  ;;  %v3177_v17 = vpop.eup %3176  ;;  %v1306_v4 = vsub.f32 %v1274_v25, %v1290_v34  ;;  %v4941_v41 = vadd.f32 %v4644_v44, %v2307_v0 }
 0x31e   :  { %v2319_v28 = vpop.xlane.xlu0 %2318  ;;  %2714 = vst [vmem:[#allocation21] sm:$0xff] %v2698_v36  ;;  %v1546_v55 = vadd.f32 %v4860_v62, %v1529_v24  ;;  %v2503_v10 = vmul.f32 %v4889_v23, %v2502_v11  ;;  %v1372_v58 = vmul.f32 %v3177_v17, %v4893_v26  ;;  %vm1378_vm12 = vweird.f32 %v3177_v17 }
 0x31f   :  { %v4929_v50 = vmul.f32 0.03125, %v2319_v28  ;;  %1253 = vadd.xlane.f32.xlu2 %v1222_v54  ;;  %v4938_v29 = vadd.f32 1e-05, %v1306_v4  ;;  %v1321_v28 = vsub.f32 %v4690_v57, %v4855_v60  ;;  %v2358_v57 = vmul.f32 %v4876_v13, %v4876_v13  ;;  %vm1379_vm14 = vmor %vm1377_vm13, %vm1378_vm12 }
 0x320   :  { %v2367_v33 = vpop.xlane.xlu1 %2366  ;;  %v1562_v15 = vmax.f32 %v1546_v55, 0.0  ;;  %v2507_v31 = vsel %vm2506_vm11, %v4889_v23, %v2503_v10  ;;  %v1373_v12 = vmul.f32 %v3177_v17, %v1372_v58  ;;  %v2357_v23 = vmul.f32 %v4871_v32, %v4871_v32 }
 0x321   :  { %v2427_v21 = vmul.f32 %v4929_v50, %v4929_v50  ;;  %v2411_v38 = vmul.f32 0.03125, %v2367_v33  ;;  %v2649_v51 = vmul.f32 %v2507_v31, %v2457_v46  ;;  %3180 = vrsqrt.f32 %v4938_v29 }
 0x322   :  { %v1594_v2 = vadd.f32 %v1578_v5, %v1562_v15  ;;  %v1184_v36 = vpop.xlane.xlu2 %1183  ;;  %v1374_v25 = vmul.f32 0.5, %v1373_v12  ;;  %v2359_v26 = vmul.f32 %v4941_v41, %v4941_v41  ;;  %vm2514_vm0 = vweird.f32 %v4919_v27 }
 0x323   :  { %2342 = vadd.xlane.f32.xlu0 %v4941_v41  ;;  %v3179_v24 = vpop.eup %3178  ;;  %v2443_v34 = vsub.f32 %v2411_v38, %v2427_v21  ;;  %v4948_v11 = vmul.f32 0.03125, %v1184_v36  ;;  %v2666_v44 = vmul.f32 %v4881_v53, %v2649_v51  ;;  %vm1387_vm3 = vweird.f32 %v4938_v29 }
 0x324   :  { %1610 = vst [vmem:[#allocation20 + $0x8] sm:$0xff] %v1594_v2  ;;  %v2509_v0 = vmul.f32 %v3179_v24, %v4919_v27  ;;  %v1375_v54 = vsub.f32 1.5, %v1374_v25  ;;  %vm2515_vm15 = vweird.f32 %v3179_v24 }
 0x325   :  { %1205 = vadd.xlane.f32.xlu1 %v4916_v16  ;;  %v4957_v55 = vadd.f32 1e-05, %v2443_v34  ;;  %v2683_v5 = vadd.f32 %v4891_v20, %v2666_v44  ;;  %v1291_v10 = vmul.f32 %v4948_v11, %v4948_v11  ;;  %vm2516_vm1 = vmor %vm2514_vm0, %vm2515_vm15 }
 0x326   :  { %v1232_v4 = vpop.xlane.xlu0 %1231  ;;  %v2510_v46 = vmul.f32 %v3179_v24, %v2509_v0  ;;  %v1376_v33 = vmul.f32 %v3177_v17, %v1375_v54 }
 0x327   :  { %v1275_v58 = vmul.f32 0.03125, %v1232_v4  ;;  %3182 = vrsqrt.f32 %v4957_v55  ;;  %2386 = vadd.xlane.f32.xlu2 %v2357_v23  ;;  %v3181_v60 = vpop.eup %3180  ;;  %v2699_v21 = vmax.f32 %v2683_v5, 0.0  ;;  %vm2524_vm6 = vweird.f32 %v4957_v55 }
 0x328   :  { %v2321_v15 = vpop.xlane.xlu1 %2320  ;;  %v2511_v31 = vmul.f32 0.5, %v2510_v46  ;;  %v1380_v2 = vsel %vm1379_vm14, %v3177_v17, %v1376_v33  ;;  %v1382_v51 = vmul.f32 %v3181_v60, %v4938_v29  ;;  %vm1388_vm2 = vweird.f32 %v3181_v60 }
 0x329   :  { %v1307_v12 = vsub.f32 %v1275_v58, %v1291_v10  ;;  %v4967_v38 = vmul.f32 0.03125, %v2321_v15  ;;  %2715 = vst [vmem:[#allocation21 + $0x8] sm:$0xff] %v2699_v21  ;;  %v1513_v36 = vmul.f32 %v1380_v2, %v1321_v28  ;;  %v2458_v28 = vsub.f32 %v4693_v9, %v4873_v49  ;;  %v1579_v21 = vld [vmem:[#allocation11 + $0x10] sm:$0xff]  ;;  %vm1389_vm4 = vmor %vm1387_vm3, %vm1388_vm2 }
 0x32a   :  { %v2512_v25 = vsub.f32 1.5, %v2511_v31  ;;  %v2369_v0 = vpop.xlane.xlu2 %2368  ;;  %v1383_v23 = vmul.f32 %v3181_v60, %v1382_v51 }
 0x32b   :  { %v4972_v34 = vadd.f32 1e-05, %v1307_v12  ;;  %v2428_v44 = vmul.f32 %v4967_v38, %v4967_v38  ;;  %2388 = vadd.xlane.f32.xlu0 %v2358_v57  ;;  %v2412_v54 = vmul.f32 0.03125, %v2369_v0  ;;  %v1530_v17 = vmul.f32 %v4853_v3, %v1513_v36 }
 0x32c   :  { %v2513_v4 = vmul.f32 %v3179_v24, %v2512_v25  ;;  %v1384_v46 = vmul.f32 0.5, %v1383_v23  ;;  %v1322_v0 = vsub.f32 %v4700_v42, %v4913_v59 }
 0x32d   :  { %3184 = vrsqrt.f32 %v4972_v34  ;;  %2390 = vadd.xlane.f32.xlu1 %v2359_v26  ;;  %v3183_v5 = vpop.eup %3182  ;;  %v2444_v10 = vsub.f32 %v2412_v54, %v2428_v44  ;;  %v1547_v33 = vadd.f32 %v4860_v62, %v1530_v17  ;;  %vm1397_vm9 = vweird.f32 %v4972_v34 }
 0x32e   :  { %v1186_v58 = vpop.xlane.xlu0 %1185  ;;  %v2517_v15 = vsel %vm2516_vm1, %v3179_v24, %v2513_v4  ;;  %v2519_v57 = vmul.f32 %v3183_v5, %v4957_v55  ;;  %v1385_v31 = vsub.f32 1.5, %v1384_v46  ;;  %vm2525_vm5 = vweird.f32 %v3183_v5 }
 0x32f   :  { %v2650_v27 = vmul.f32 %v2517_v15, %v2458_v28  ;;  %v4984_v12 = vadd.f32 1e-05, %v2444_v10  ;;  %v4986_v2 = vmul.f32 0.03125, %v1186_v58  ;;  %v1563_v9 = vmax.f32 %v1547_v33, 0.0  ;;  %vm2526_vm7 = vmor %vm2524_vm6, %vm2525_vm5 }
 0x330   :  { %v1234_v51 = vpop.xlane.xlu1 %1233  ;;  %v2520_v49 = vmul.f32 %v3183_v5, %v2519_v57  ;;  %v1386_v25 = vmul.f32 %v3181_v60, %v1385_v31  ;;  %v2459_v31 = vsub.f32 %v4708_v48, %v4929_v50 }
 0x331   :  { %v1276_v26 = vmul.f32 0.03125, %v1234_v51  ;;  %v2667_v36 = vmul.f32 %v4881_v53, %v2650_v27  ;;  %3186 = vrsqrt.f32 %v4984_v12  ;;  %v1595_v44 = vadd.f32 %v1579_v21, %v1563_v9 }
 0x332   :  { %v2521_v23 = vmul.f32 0.5, %v2520_v49  ;;  %v1292_v54 = vmul.f32 %v4986_v2, %v4986_v2  ;;  %v2323_v17 = vpop.xlane.xlu2 %2322  ;;  %v1390_v28 = vsel %vm1389_vm4, %v3181_v60, %v1386_v25  ;;  %v1323_v51 = vsub.f32 %v4714_v52, %v4948_v11 }
 0x333   :  { %v3185_v24 = vpop.eup %3184  ;;  %v2684_v4 = vadd.f32 %v4891_v20, %v2667_v36  ;;  %1611 = vst [vmem:[#allocation20 + $0x10] sm:$0xff] %v1595_v44  ;;  %v1514_v46 = vmul.f32 %v1390_v28, %v1322_v0  ;;  %v4998_v33 = vmul.f32 0.03125, %v2323_v17  ;;  %v1580_v0 = vld [vmem:[#allocation11 + $0x18] sm:$0xff]  ;;  %vm2534_vm12 = vweird.f32 %v4984_v12 }
 0x334   :  { %v1392_v29 = vmul.f32 %v3185_v24, %v4972_v34  ;;  %v2522_v10 = vsub.f32 1.5, %v2521_v23  ;;  %v1308_v58 = vsub.f32 %v1276_v26, %v1292_v54  ;;  %vm1398_vm8 = vweird.f32 %v3185_v24 }
 0x335   :  { %v2700_v42 = vmax.f32 %v2684_v4, 0.0  ;;  %v1531_v57 = vmul.f32 %v4853_v3, %v1514_v46  ;;  %v2429_v44 = vmul.f32 %v4998_v33, %v4998_v33  ;;  %vm1399_vm10 = vmor %vm1397_vm9, %vm1398_vm8 }
 0x336   :  { %v1393_v59 = vmul.f32 %v3185_v24, %v1392_v29  ;;  %v2371_v15 = vpop.xlane.xlu0 %2370  ;;  %v2523_v21 = vmul.f32 %v3183_v5, %v2522_v10  ;;  %v5002_v27 = vadd.f32 1e-05, %v1308_v58 }
 0x337   :  { %v3187_v60 = vpop.eup %3186  ;;  %2716 = vst [vmem:[#allocation21 + $0x10] sm:$0xff] %v2700_v42  ;;  %v2413_v49 = vmul.f32 0.03125, %v2371_v15  ;;  %v1548_v36 = vadd.f32 %v4860_v62, %v1531_v57 }
 0x338   :  { %v1394_v9 = vmul.f32 0.5, %v1393_v59  ;;  %v1188_v26 = vpop.xlane.xlu1 %1187  ;;  %v2527_v25 = vsel %vm2526_vm7, %v3183_v5, %v2523_v21  ;;  %v2529_v55 = vmul.f32 %v3187_v60, %v4984_v12  ;;  %3188 = vrsqrt.f32 %v5002_v27 }
 0x339   :  { %v2651_v23 = vmul.f32 %v2527_v25, %v2459_v31  ;;  %v1564_v48 = vmax.f32 %v1548_v36, 0.0  ;;  %v2445_v52 = vsub.f32 %v2413_v49, %v2429_v44  ;;  %v5014_v11 = vmul.f32 0.03125, %v1188_v26 }
 0x33a   :  { %v1395_v54 = vsub.f32 1.5, %v1394_v9  ;;  %v2530_v50 = vmul.f32 %v3187_v60, %v2529_v55  ;;  %v1236_v17 = vpop.xlane.xlu2 %1235  ;;  %vm2535_vm11 = vweird.f32 %v3187_v60  ;;  %vm1407_vm15 = vweird.f32 %v5002_v27 }
 0x33b   :  { %v2668_v4 = vmul.f32 %v4881_v53, %v2651_v23  ;;  %v1277_v28 = vmul.f32 0.03125, %v1236_v17  ;;  %v1596_v29 = vadd.f32 %v1580_v0, %v1564_v48  ;;  %v5018_v10 = vadd.f32 1e-05, %v2445_v52  ;;  %vm2536_vm13 = vmor %vm2534_vm12, %vm2535_vm11  ;;  %v1581_v52 = vld [vmem:[#allocation11 + $0x20] sm:$0xff] }
 0x33c   :  { %v1396_v5 = vmul.f32 %v3185_v24, %v1395_v54  ;;  %v2531_v46 = vmul.f32 0.5, %v2530_v50  ;;  %v1293_v58 = vmul.f32 %v5014_v11, %v5014_v11 }
 0x33d   :  { %v2685_v42 = vadd.f32 %v4891_v20, %v2668_v4  ;;  %1612 = vst [vmem:[#allocation20 + $0x18] sm:$0xff] %v1596_v29  ;;  %3190 = vrsqrt.f32 %v5018_v10  ;;  %vm2544_vm2 = vweird.f32 %v5018_v10 }
 0x33e   :  { %v1400_v59 = vsel %vm1399_vm10, %v3185_v24, %v1396_v5  ;;  %v2325_v15 = vpop.xlane.xlu0 %2324  ;;  %v2532_v21 = vsub.f32 1.5, %v2531_v46  ;;  %v3189_v34 = vpop.eup %3188  ;;  %v1309_v9 = vsub.f32 %v1277_v28, %v1293_v58 }
 0x33f   :  { %v1515_v57 = vmul.f32 %v1400_v59, %v1323_v51  ;;  %v2701_v31 = vmax.f32 %v2685_v42, 0.0  ;;  %v5024_v49 = vmul.f32 0.03125, %v2325_v15  ;;  %v1402_v24 = vmul.f32 %v3189_v34, %v5002_v27 }
 0x340   :  { %v2373_v26 = vpop.xlane.xlu1 %2372  ;;  %v2533_v25 = vmul.f32 %v3187_v60, %v2532_v21  ;;  %v2460_v51 = vsub.f32 %v4720_v22, %v4967_v38  ;;  %v5031_v55 = vadd.f32 1e-05, %v1309_v9  ;;  %vm1408_vm14 = vweird.f32 %v3189_v34 }
 0x341   :  { %v1532_v36 = vmul.f32 %v4853_v3, %v1515_v57  ;;  %2717 = vst [vmem:[#allocation21 + $0x18] sm:$0xff] %v2701_v31  ;;  %v2430_v44 = vmul.f32 %v5024_v49, %v5024_v49  ;;  %v2414_v0 = vmul.f32 0.03125, %v2373_v26  ;;  %v1403_v48 = vmul.f32 %v3189_v34, %v1402_v24  ;;  %vm1409_vm0 = vmor %vm1407_vm15, %vm1408_vm14 }
 0x342   :  { %v2537_v54 = vsel %vm2536_vm13, %v3187_v60, %v2533_v25  ;;  %v1190_v50 = vpop.xlane.xlu2 %1189  ;;  %3192 = vrsqrt.f32 %v5031_v55  ;;  %v1324_v24 = vsub.f32 %v4726_v19, %v4986_v2  ;;  %vm1417_vm5 = vweird.f32 %v5031_v55 }
 0x343   :  { %v1549_v23 = vadd.f32 %v4860_v62, %v1532_v36  ;;  %v2652_v12 = vmul.f32 %v2537_v54, %v2460_v51  ;;  %v2446_v17 = vsub.f32 %v2414_v0, %v2430_v44  ;;  %v3191_v4 = vpop.eup %3190  ;;  %v1404_v22 = vmul.f32 0.5, %v1403_v48 }
 0x344   :  { %v5037_v38 = vmul.f32 0.03125, %v1190_v50  ;;  %v2539_v29 = vmul.f32 %v3191_v4, %v5018_v10  ;;  %vm2545_vm1 = vweird.f32 %v3191_v4 }
 0x345   :  { %v1565_v5 = vmax.f32 %v1549_v23, 0.0  ;;  %v2669_v28 = vmul.f32 %v4881_v53, %v2652_v12  ;;  %v5041_v46 = vadd.f32 1e-05, %v2446_v17  ;;  %v1405_v42 = vsub.f32 1.5, %v1404_v22  ;;  %vm2546_vm3 = vmor %vm2544_vm2, %vm2545_vm1 }
 0x346   :  { %v1238_v58 = vpop.xlane.xlu0 %1237  ;;  %v2540_v15 = vmul.f32 %v3191_v4, %v2539_v29  ;;  %v1294_v31 = vmul.f32 %v5037_v38, %v5037_v38  ;;  %v2461_v22 = vsub.f32 %v4732_v6, %v4998_v33 }
 0x347   :  { %v1597_v60 = vadd.f32 %v1581_v52, %v1565_v5  ;;  %v2686_v59 = vadd.f32 %v4891_v20, %v2669_v28  ;;  %3194 = vrsqrt.f32 %v5041_v46  ;;  %v1406_v21 = vmul.f32 %v3189_v34, %v1405_v42 }
 0x348   :  { %v2327_v57 = vpop.xlane.xlu1 %2326  ;;  %v1278_v9 = vmul.f32 0.03125, %v1238_v58  ;;  %v3193_v36 = vpop.eup %3192  ;;  %v2541_v51 = vmul.f32 0.5, %v2540_v15  ;;  %v1582_v15 = vld [vmem:[#allocation11 + $0x28] sm:$0xff]  ;;  %vm2554_vm8 = vweird.f32 %v5041_v46 }
 0x349   :  { %1613 = vst [vmem:[#allocation20 + $0x20] sm:$0xff] %v1597_v60  ;;  %v5048_v26 = vmul.f32 0.03125, %v2327_v57  ;;  %v2702_v25 = vmax.f32 %v2686_v59, 0.0  ;;  %v1410_v27 = vsel %vm1409_vm0, %v3189_v34, %v1406_v21  ;;  %v1412_v44 = vmul.f32 %v3193_v36, %v5031_v55 }
 0x34a   :  { %v1310_v0 = vsub.f32 %v1278_v9, %v1294_v31  ;;  %v2375_v23 = vpop.xlane.xlu2 %2374  ;;  %v1516_v54 = vmul.f32 %v1410_v27, %v1324_v24  ;;  %v2542_v48 = vsub.f32 1.5, %v2541_v51  ;;  %vm1418_vm4 = vweird.f32 %v3193_v36 }
 0x34b   :  { %2718 = vst [vmem:[#allocation21 + $0x20] sm:$0xff] %v2702_v25  ;;  %v2431_v50 = vmul.f32 %v5048_v26, %v5048_v26  ;;  %v1413_v52 = vmul.f32 %v3193_v36, %v1412_v44  ;;  %v2415_v17 = vmul.f32 0.03125, %v2375_v23  ;;  %vm1419_vm6 = vmor %vm1417_vm5, %vm1418_vm4 }
 0x34c   :  { %v5055_v12 = vadd.f32 1e-05, %v1310_v0  ;;  %v1533_v19 = vmul.f32 %v4853_v3, %v1516_v54  ;;  %v2543_v2 = vmul.f32 %v3191_v4, %v2542_v48  ;;  %v1325_v0 = vsub.f32 %v4738_v56, %v5014_v11 }
 0x34d   :  { %v3195_v5 = vpop.eup %3194  ;;  %v1414_v28 = vmul.f32 0.5, %v1413_v52  ;;  %v2447_v42 = vsub.f32 %v2415_v17, %v2431_v50 }
 0x34e   :  { %v1192_v34 = vpop.xlane.xlu0 %1191  ;;  %v2549_v29 = vmul.f32 %v3195_v5, %v5041_v46  ;;  %3196 = vrsqrt.f32 %v5055_v12  ;;  %v1550_v58 = vadd.f32 %v4860_v62, %v1533_v19  ;;  %v2547_v60 = vsel %vm2546_vm3, %v3191_v4, %v2543_v2 }
 0x34f   :  { %v2653_v57 = vmul.f32 %v2547_v60, %v2461_v22  ;;  %v1415_v21 = vsub.f32 1.5, %v1414_v28  ;;  %v5064_v31 = vmul.f32 0.03125, %v1192_v34  ;;  %v5067_v6 = vadd.f32 1e-05, %v2447_v42 }
 0x350   :  { %v1240_v59 = vpop.xlane.xlu1 %1239  ;;  %v2550_v10 = vmul.f32 %v3195_v5, %v2549_v29  ;;  %v1566_v9 = vmax.f32 %v1550_v58, 0.0  ;;  %vm2555_vm7 = vweird.f32 %v3195_v5  ;;  %vm1427_vm11 = vweird.f32 %v5055_v12 }
 0x351   :  { %v1279_v33 = vmul.f32 0.03125, %v1240_v59  ;;  %v2670_v25 = vmul.f32 %v4881_v53, %v2653_v57  ;;  %v1416_v24 = vmul.f32 %v3193_v36, %v1415_v21  ;;  %v1295_v4 = vmul.f32 %v5064_v31, %v5064_v31  ;;  %vm2556_vm9 = vmor %vm2554_vm8, %vm2555_vm7 }
 0x352   :  { %v2551_v51 = vmul.f32 0.5, %v2550_v10  ;;  %v2329_v27 = vpop.xlane.xlu2 %2328  ;;  %v1598_v44 = vadd.f32 %v1582_v15, %v1566_v9  ;;  %3198 = vrsqrt.f32 %v5067_v6  ;;  %vm2564_vm14 = vweird.f32 %v5067_v6 }
 0x353   :  { %v2687_v23 = vadd.f32 %v4891_v20, %v2670_v25  ;;  %v1420_v54 = vsel %vm1419_vm6, %v3193_v36, %v1416_v24  ;;  %v1311_v50 = vsub.f32 %v1279_v33, %v1295_v4  ;;  %v5079_v19 = vmul.f32 0.03125, %v2329_v27 }
 0x354   :  { %v3197_v55 = vpop.eup %3196  ;;  %v2552_v48 = vsub.f32 1.5, %v2551_v51  ;;  %1614 = vst [vmem:[#allocation20 + $0x28] sm:$0xff] %v1598_v44  ;;  %v1517_v52 = vmul.f32 %v1420_v54, %v1325_v0  ;;  %v2462_v36 = vsub.f32 %v4744_v37, %v5024_v49  ;;  %v1583_v37 = vld [vmem:[#allocation11 + $0x30] sm:$0xff] }
 0x355   :  { %v1422_v17 = vmul.f32 %v3197_v55, %v5055_v12  ;;  %v2703_v11 = vmax.f32 %v2687_v23, 0.0  ;;  %v5081_v34 = vadd.f32 1e-05, %v1311_v50  ;;  %v2432_v46 = vmul.f32 %v5079_v19, %v5079_v19 }
 0x356   :  { %v2377_v56 = vpop.xlane.xlu0 %2376  ;;  %v2553_v2 = vmul.f32 %v3195_v5, %v2552_v48  ;;  %v1534_v28 = vmul.f32 %v4853_v3, %v1517_v52  ;;  %vm1428_vm10 = vweird.f32 %v3197_v55  ;;  %v1326_v50 = vsub.f32 %v4750_v47, %v5037_v38 }
 0x357   :  { %v2416_v22 = vmul.f32 0.03125, %v2377_v56  ;;  %v1423_v29 = vmul.f32 %v3197_v55, %v1422_v17  ;;  %2719 = vst [vmem:[#allocation21 + $0x28] sm:$0xff] %v2703_v11  ;;  %3200 = vrsqrt.f32 %v5081_v34  ;;  %vm1429_vm12 = vmor %vm1427_vm11, %vm1428_vm10  ;;  %vm1437_vm1 = vweird.f32 %v5081_v34 }
 0x358   :  { %v1194_v58 = vpop.xlane.xlu1 %1193  ;;  %v2557_v60 = vsel %vm2556_vm9, %v3195_v5, %v2553_v2  ;;  %v3199_v59 = vpop.eup %3198  ;;  %v1551_v15 = vadd.f32 %v4860_v62, %v1534_v28 }
 0x359   :  { %v5090_v42 = vmul.f32 0.03125, %v1194_v58  ;;  %v2654_v57 = vmul.f32 %v2557_v60, %v2462_v36  ;;  %v1424_v21 = vmul.f32 0.5, %v1423_v29  ;;  %v2448_v10 = vsub.f32 %v2416_v22, %v2432_v46 }
 0x35a   :  { %v2559_v49 = vmul.f32 %v3199_v59, %v5067_v6  ;;  %v1242_v33 = vpop.xlane.xlu2 %1241  ;;  %v1567_v25 = vmax.f32 %v1551_v15, 0.0  ;;  %vm2565_vm13 = vweird.f32 %v3199_v59 }
 0x35b   :  { %v1296_v9 = vmul.f32 %v5090_v42, %v5090_v42  ;;  %v2671_v5 = vmul.f32 %v4881_v53, %v2654_v57  ;;  %v1425_v24 = vsub.f32 1.5, %v1424_v21  ;;  %v5097_v51 = vadd.f32 1e-05, %v2448_v10  ;;  %vm2566_vm15 = vmor %vm2564_vm14, %vm2565_vm13 }
 0x35c   :  { %v2560_v4 = vmul.f32 %v3199_v59, %v2559_v49  ;;  %v1280_v27 = vmul.f32 0.03125, %v1242_v33  ;;  %v1599_v44 = vadd.f32 %v1583_v37, %v1567_v25  ;;  %v2463_v57 = vsub.f32 %v4756_v18, %v5048_v26  ;;  %v1584_v25 = vld [vmem:[#allocation11 + $0x38] sm:$0xff] }
 0x35d   :  { %v2688_v0 = vadd.f32 %v4891_v20, %v2671_v5  ;;  %v1426_v23 = vmul.f32 %v3197_v55, %v1425_v24  ;;  %3202 = vrsqrt.f32 %v5097_v51  ;;  %v3201_v48 = vpop.eup %3200  ;;  %v1327_v33 = vsub.f32 %v4762_v45, %v5064_v31 }
 0x35e   :  { %v2331_v54 = vpop.xlane.xlu0 %2330  ;;  %v2561_v52 = vmul.f32 0.5, %v2560_v4  ;;  %v1312_v17 = vsub.f32 %v1280_v27, %v1296_v9  ;;  %1615 = vst [vmem:[#allocation20 + $0x30] sm:$0xff] %v1599_v44  ;;  %v1432_v2 = vmul.f32 %v3201_v48, %v5081_v34  ;;  %vm1438_vm0 = vweird.f32 %v3201_v48 }
 0x35f   :  { %v5105_v56 = vmul.f32 0.03125, %v2331_v54  ;;  %v2704_v12 = vmax.f32 %v2688_v0, 0.0  ;;  %v1430_v11 = vsel %vm1429_vm12, %v3197_v55, %v1426_v23  ;;  %vm1439_vm2 = vmor %vm1437_vm1, %vm1438_vm0  ;;  %vm2574_vm4 = vweird.f32 %v5097_v51 }
 0x360   :  { %v2379_v22 = vpop.xlane.xlu1 %2378  ;;  %v1518_v28 = vmul.f32 %v1430_v11, %v1326_v50  ;;  %v2562_v36 = vsub.f32 1.5, %v2561_v52  ;;  %v5108_v29 = vadd.f32 1e-05, %v1312_v17  ;;  %v1433_v38 = vmul.f32 %v3201_v48, %v1432_v2 }
 0x361   :  { %v2433_v47 = vmul.f32 %v5105_v56, %v5105_v56  ;;  %2720 = vst [vmem:[#allocation21 + $0x30] sm:$0xff] %v2704_v12  ;;  %v2417_v46 = vmul.f32 0.03125, %v2379_v22 }
 0x362   :  { %v1535_v58 = vmul.f32 %v4853_v3, %v1518_v28  ;;  %v2563_v60 = vmul.f32 %v3199_v59, %v2562_v36  ;;  %3204 = vrsqrt.f32 %v5108_v29  ;;  %v1196_v55 = vpop.xlane.xlu2 %1195  ;;  %v1434_v21 = vmul.f32 0.5, %v1433_v38 }
 0x363   :  { %v3203_v15 = vpop.eup %3202  ;;  %v2449_v10 = vsub.f32 %v2417_v46, %v2433_v47  ;;  %v5118_v37 = vmul.f32 0.03125, %v1196_v55  ;;  %vm1447_vm7 = vweird.f32 %v5108_v29 }
 0x364   :  { %v1552_v49 = vadd.f32 %v4860_v62, %v1535_v58  ;;  %v2567_v9 = vsel %vm2566_vm15, %v3199_v59, %v2563_v60  ;;  %v2569_v6 = vmul.f32 %v3203_v15, %v5097_v51  ;;  %v1435_v24 = vsub.f32 1.5, %v1434_v21 }
 0x365   :  { %v2655_v5 = vmul.f32 %v2567_v9, %v2463_v57  ;;  %v5124_v4 = vadd.f32 1e-05, %v2449_v10  ;;  %v1297_v44 = vmul.f32 %v5118_v37, %v5118_v37  ;;  %vm2575_vm3 = vweird.f32 %v3203_v15 }
 0x366   :  { %v1244_v18 = vpop.xlane.xlu0 %1243  ;;  %v1568_v26 = vmax.f32 %v1552_v49, 0.0  ;;  %v2570_v27 = vmul.f32 %v3203_v15, %v2569_v6  ;;  %v1436_v23 = vmul.f32 %v3201_v48, %v1435_v24  ;;  %v2464_v57 = vsub.f32 %v4768_v8, %v5079_v19  ;;  %vm2576_vm5 = vmor %vm2574_vm4, %vm2575_vm3 }
 0x367   :  { %v1281_v0 = vmul.f32 0.03125, %v1244_v18  ;;  %v2672_v59 = vmul.f32 %v4881_v53, %v2655_v5  ;;  %3206 = vrsqrt.f32 %v5124_v4  ;;  %vm2584_vm10 = vweird.f32 %v5124_v4 }
 0x368   :  { %v2333_v45 = vpop.xlane.xlu1 %2332  ;;  %v3205_v31 = vpop.eup %3204  ;;  %v1600_v54 = vadd.f32 %v1584_v25, %v1568_v26  ;;  %v2571_v50 = vmul.f32 0.5, %v2570_v27  ;;  %v1440_v11 = vsel %vm1439_vm2, %v3201_v48, %v1436_v23  ;;  %v1585_v25 = vld [vmem:[#allocation11 + $0x40] sm:$0xff]  ;;  %v1328_v23 = vsub.f32 %v4774_v43, %v5090_v42 }
 0x369   :  { %v1313_v52 = vsub.f32 %v1281_v0, %v1297_v44  ;;  %v5131_v17 = vmul.f32 0.03125, %v2333_v45  ;;  %v2689_v12 = vadd.f32 %v4891_v20, %v2672_v59  ;;  %v1442_v2 = vmul.f32 %v3205_v31, %v5108_v29 }
 0x36a   :  { %1616 = vst [vmem:[#allocation20 + $0x38] sm:$0xff] %v1600_v54  ;;  %v1519_v22 = vmul.f32 %v1440_v11, %v1327_v33  ;;  %v2572_v28 = vsub.f32 1.5, %v2571_v50  ;;  %v2381_v47 = vpop.xlane.xlu2 %2380  ;;  %vm1448_vm6 = vweird.f32 %v3205_v31 }
 0x36b   :  { %v5135_v34 = vadd.f32 1e-05, %v1313_v52  ;;  %v2434_v36 = vmul.f32 %v5131_v17, %v5131_v17  ;;  %v2705_v38 = vmax.f32 %v2689_v12, 0.0  ;;  %v1443_v46 = vmul.f32 %v3205_v31, %v1442_v2  ;;  %vm1449_vm8 = vmor %vm1447_vm7, %vm1448_vm6 }
 0x36c   :  { %v2418_v58 = vmul.f32 0.03125, %v2381_v47  ;;  %v1536_v60 = vmul.f32 %v4853_v3, %v1519_v22  ;;  %v2573_v55 = vmul.f32 %v3203_v15, %v2572_v28 }
 0x36d   :  { %3208 = vrsqrt.f32 %v5135_v34  ;;  %v3207_v48 = vpop.eup %3206  ;;  %2721 = vst [vmem:[#allocation21 + $0x38] sm:$0xff] %v2705_v38  ;;  %v1444_v21 = vmul.f32 0.5, %v1443_v46  ;;  %vm1457_vm13 = vweird.f32 %v5135_v34 }
 0x36e   :  { %v2450_v10 = vsub.f32 %v2418_v58, %v2434_v36  ;;  %v1198_v49 = vpop.xlane.xlu0 %1197  ;;  %v1553_v9 = vadd.f32 %v4860_v62, %v1536_v60  ;;  %v2577_v33 = vsel %vm2576_vm5, %v3203_v15, %v2573_v55  ;;  %v2579_v6 = vmul.f32 %v3207_v48, %v5124_v4 }
 0x36f   :  { %v2656_v51 = vmul.f32 %v2577_v33, %v2464_v57  ;;  %v1445_v5 = vsub.f32 1.5, %v1444_v21  ;;  %v5149_v18 = vmul.f32 0.03125, %v1198_v49  ;;  %vm2585_vm9 = vweird.f32 %v3207_v48 }
 0x370   :  { %v5147_v24 = vadd.f32 1e-05, %v2450_v10  ;;  %v1246_v26 = vpop.xlane.xlu1 %1245  ;;  %v1569_v8 = vmax.f32 %v1553_v9, 0.0  ;;  %v2580_v19 = vmul.f32 %v3207_v48, %v2579_v6  ;;  %v2465_v58 = vsub.f32 %v4780_v40, %v5105_v56  ;;  %vm2586_vm11 = vmor %vm2584_vm10, %vm2585_vm9  ;;  %v1586_v9 = vld [vmem:[#allocation11 + $0x48] sm:$0xff] }
 0x371   :  { %v1282_v27 = vmul.f32 0.03125, %v1246_v26  ;;  %v2673_v44 = vmul.f32 %v4881_v53, %v2656_v51  ;;  %v1446_v0 = vmul.f32 %v3205_v31, %v1445_v5  ;;  %v1298_v54 = vmul.f32 %v5149_v18, %v5149_v18 }
 0x372   :  { %3210 = vrsqrt.f32 %v5147_v24  ;;  %v1601_v59 = vadd.f32 %v1585_v25, %v1569_v8  ;;  %v2581_v45 = vmul.f32 0.5, %v2580_v19  ;;  %v2335_v50 = vpop.xlane.xlu2 %2334  ;;  %v1329_v60 = vsub.f32 %v4786_v14, %v5118_v37 }
 0x373   :  { %v3209_v15 = vpop.eup %3208  ;;  %v2690_v52 = vadd.f32 %v4891_v20, %v2673_v44  ;;  %v1450_v12 = vsel %vm1449_vm8, %v3205_v31, %v1446_v0  ;;  %v1314_v22 = vsub.f32 %v1282_v27, %v1298_v54  ;;  %v5161_v28 = vmul.f32 0.03125, %v2335_v50 }
 0x374   :  { %v1452_v29 = vmul.f32 %v3209_v15, %v5135_v34  ;;  %1617 = vst [vmem:[#allocation20 + $0x40] sm:$0xff] %v1601_v59  ;;  %v1520_v11 = vmul.f32 %v1450_v12, %v1328_v23  ;;  %v2582_v2 = vsub.f32 1.5, %v2581_v45  ;;  %vm1458_vm12 = vweird.f32 %v3209_v15 }
 0x375   :  { %v2706_v43 = vmax.f32 %v2690_v52, 0.0  ;;  %v5165_v46 = vadd.f32 1e-05, %v1314_v22  ;;  %v2435_v49 = vmul.f32 %v5161_v28, %v5161_v28  ;;  %vm1459_vm14 = vmor %vm1457_vm13, %vm1458_vm12  ;;  %v5189_v52 = vld [vmem:[#allocation19 + $0x4] ss:$0 sm:$0xff]  ;;  %vm2594_vm0 = vweird.f32 %v5147_v24 }
 0x376   :  { %v1453_v42 = vmul.f32 %v3209_v15, %v1452_v29  ;;  %v2383_v36 = vpop.xlane.xlu0 %2382  ;;  %v1537_v47 = vmul.f32 %v4853_v3, %v1520_v11  ;;  %v2583_v38 = vmul.f32 %v3207_v48, %v2582_v2 }
 0x377   :  { %2722 = vst [vmem:[#allocation21 + $0x40] sm:$0xff] %v2706_v43  ;;  %v2419_v57 = vmul.f32 0.03125, %v2383_v36  ;;  %3212 = vrsqrt.f32 %v5165_v46  ;;  %v5200_v43 = vld [vmem:[#allocation19 + $0x5] ss:$0 sm:$0xff]  ;;  %vm1467_vm3 = vweird.f32 %v5165_v46 }
 0x378   :  { %v3211_v31 = vpop.eup %3210  ;;  %v1454_v55 = vmul.f32 0.5, %v1453_v42  ;;  %v1200_v21 = vpop.xlane.xlu1 %1199  ;;  %v1554_v3 = vadd.f32 %v4860_v62, %v1537_v47  ;;  %v2587_v10 = vsel %vm2586_vm11, %v3207_v48, %v2583_v38  ;;  %v1587_v38 = vld [vmem:[#allocation11 + $0x50] sm:$0xff] }
 0x379   :  { %v2589_v4 = vmul.f32 %v3211_v31, %v5147_v24  ;;  %v2657_v33 = vmul.f32 %v2587_v10, %v2465_v58  ;;  %v2451_v14 = vsub.f32 %v2419_v57, %v2435_v49  ;;  %v5177_v37 = vmul.f32 0.03125, %v1200_v21  ;;  %v5206_v21 = vld [vmem:[#allocation19 + $0xc] ss:$0 sm:$0xff] }
 0x37a   :  { %v1455_v6 = vsub.f32 1.5, %v1454_v55  ;;  %v1570_v40 = vmax.f32 %v1554_v3, 0.0  ;;  %v1248_v25 = vpop.xlane.xlu2 %1247  ;;  %vm2595_vm15 = vweird.f32 %v3211_v31 }
 0x37b   :  { %v2590_v56 = vmul.f32 %v3211_v31, %v2589_v4  ;;  %v2674_v62 = vmul.f32 %v4881_v53, %v2657_v33  ;;  %v1283_v51 = vmul.f32 0.03125, %v1248_v25  ;;  %v5181_v8 = vadd.f32 1e-05, %v2451_v14  ;;  %vm2596_vm1 = vmor %vm2594_vm0, %vm2595_vm15  ;;  %v5212_v33 = vld [vmem:[#allocation19 + $0xd] ss:$0 sm:$0xff] }
 0x37c   :  { %v1456_v48 = vmul.f32 %v3209_v15, %v1455_v6  ;;  %v1602_v5 = vadd.f32 %v1586_v9, %v1570_v40  ;;  %v1299_v19 = vmul.f32 %v5177_v37, %v5177_v37 }
 0x37d   :  { %v2591_v26 = vmul.f32 0.5, %v2590_v56  ;;  %v2691_v27 = vadd.f32 %v4891_v20, %v2674_v62  ;;  %3214 = vrsqrt.f32 %v5181_v8  ;;  %v3213_v53 = vpop.eup %3212  ;;  %vm2604_vm6 = vweird.f32 %v5181_v8 }
 0x37e   :  { %v1460_v44 = vsel %vm1459_vm14, %v3209_v15, %v1456_v48  ;;  %v2337_v0 = vpop.xlane.xlu0 %2336  ;;  %1618 = vst [vmem:[#allocation20 + $0x48] sm:$0xff] %v1602_v5  ;;  %v1315_v45 = vsub.f32 %v1283_v51, %v1299_v19  ;;  %v1462_v20 = vmul.f32 %v3213_v53, %v5165_v46  ;;  %v2466_v15 = vsub.f32 %v4792_v61, %v5131_v17 }
 0x37f   :  { %v1521_v59 = vmul.f32 %v1460_v44, %v1329_v60  ;;  %v2592_v23 = vsub.f32 1.5, %v2591_v26  ;;  %v2707_v34 = vmax.f32 %v2691_v27, 0.0  ;;  %v5187_v54 = vmul.f32 0.03125, %v2337_v0 }
 0x380   :  { %v2385_v50 = vpop.xlane.xlu1 %2384  ;;  %v5196_v11 = vadd.f32 1e-05, %v1315_v45  ;;  %v1463_v47 = vmul.f32 %v3213_v53, %v1462_v20  ;;  %vm1468_vm2 = vweird.f32 %v3213_v53  ;;  %v1330_v5 = vsub.f32 %v4800_v63, %v5149_v18 }
 0x381   :  { %v1538_v12 = vmul.f32 %v5189_v52, %v1521_v59  ;;  %v2593_v29 = vmul.f32 %v3211_v31, %v2592_v23  ;;  %2723 = vst [vmem:[#allocation21 + $0x48] sm:$0xff] %v2707_v34  ;;  %v2436_v2 = vmul.f32 %v5187_v54, %v5187_v54  ;;  %v2420_v22 = vmul.f32 0.03125, %v2385_v50  ;;  %vm1469_vm4 = vmor %vm1467_vm3, %vm1468_vm2 }
 0x382   :  { %v1202_v24 = vpop.xlane.xlu2 %1201  ;;  %3216 = vrsqrt.f32 %v5196_v11  ;;  %v1464_v55 = vmul.f32 0.5, %v1463_v47  ;;  %v2467_v18 = vsub.f32 %v4810_v35, %v5161_v28  ;;  %vm1477_vm9 = vweird.f32 %v5196_v11 }
 0x383   :  { %v1555_v42 = vadd.f32 %v5200_v43, %v1538_v12  ;;  %v2597_v36 = vsel %vm2596_vm1, %v3211_v31, %v2593_v29  ;;  %v2452_v60 = vsub.f32 %v2420_v22, %v2436_v2  ;;  %v3215_v61 = vpop.eup %3214  ;;  %v5204_v57 = vmul.f32 0.03125, %v1202_v24  ;;  %v1588_v22 = vld [vmem:[#allocation11 + $0x58] sm:$0xff] }
 0x384   :  { %v2658_v58 = vmul.f32 %v2597_v36, %v2466_v15  ;;  %v2599_v10 = vmul.f32 %v3215_v61, %v5181_v8  ;;  %v1465_v9 = vsub.f32 1.5, %v1464_v55  ;;  %vm2605_vm5 = vweird.f32 %v3215_v61 }
 0x385   :  { %v1571_v17 = vmax.f32 %v1555_v42, 0.0  ;;  %v5210_v4 = vadd.f32 1e-05, %v2452_v60  ;;  %v1300_v25 = vmul.f32 %v5204_v57, %v5204_v57  ;;  %vm2606_vm7 = vmor %vm2604_vm6, %vm2605_vm5 }
 0x386   :  { %v2675_v3 = vmul.f32 %v5206_v21, %v2658_v58  ;;  %v1250_v31 = vpop.xlane.xlu0 %1249  ;;  %v2600_v40 = vmul.f32 %v3215_v61, %v2599_v10  ;;  %v1466_v14 = vmul.f32 %v3213_v53, %v1465_v9 }
 0x387   :  { %v1603_v49 = vadd.f32 %v1587_v38, %v1571_v17  ;;  %3218 = vrsqrt.f32 %v5210_v4  ;;  %v1284_v62 = vmul.f32 0.03125, %v1250_v31  ;;  %vm2614_vm12 = vweird.f32 %v5210_v4 }
 0x388   :  { %v2692_v6 = vadd.f32 %v5212_v33, %v2675_v3  ;;  %v2339_v56 = vpop.xlane.xlu1 %2338  ;;  %v3217_v48 = vpop.eup %3216  ;;  %v2601_v26 = vmul.f32 0.5, %v2600_v40  ;;  %v1470_v19 = vsel %vm1469_vm4, %v3213_v53, %v1466_v14 }
 0x389   :  { %1619 = vst [vmem:[#allocation20 + $0x50] sm:$0xff] %v1603_v49  ;;  %v1472_v27 = vmul.f32 %v3217_v48, %v5196_v11  ;;  %v1316_v44 = vsub.f32 %v1284_v62, %v1300_v25  ;;  %v1522_v59 = vmul.f32 %v1470_v19, %v1330_v5  ;;  %vm1478_vm8 = vweird.f32 %v3217_v48 }
 0x38a   :  { %v2708_v51 = vmax.f32 %v2692_v6, 0.0  ;;  %v5222_v0 = vpop.xlane.xlu2 %2340  ;;  %v2602_v46 = vsub.f32 1.5, %v2601_v26  ;;  %vm1479_vm10 = vmor %vm1477_vm9, %vm1478_vm8  ;;  %v5239_v55 = vmul.f32 0.03125, %v2339_v56  ;;  %v2468_v56 = vsub.f32 %v4833_v39, %v5187_v54 }
 0x38b   :  { %v1473_v23 = vmul.f32 %v3217_v48, %v1472_v27  ;;  %v5224_v34 = vadd.f32 1e-05, %v1316_v44  ;;  %v1539_v50 = vmul.f32 %v5189_v52, %v1522_v59  ;;  %v1589_v59 = vld [vmem:[#allocation11 + $0x60] sm:$0xff]  ;;  %v5258_v39 = vmul.f32 0.03125, %v5222_v0 }
 0x38c   :  { %2724 = vst [vmem:[#allocation21 + $0x50] sm:$0xff] %v2708_v51  ;;  %v2603_v12 = vmul.f32 %v3215_v61, %v2602_v46  ;;  %v2437_v26 = vmul.f32 %v5239_v55, %v5239_v55 }
 0x38d   :  { %v3219_v45 = vpop.eup %3218  ;;  %v1474_v53 = vmul.f32 0.5, %v1473_v23  ;;  %3220 = vrsqrt.f32 %v5224_v34  ;;  %v1556_v20 = vadd.f32 %v5200_v43, %v1539_v50  ;;  %vm1487_vm15 = vweird.f32 %v5224_v34 }
 0x38e   :  { %v1204_v63 = vpop.xlane.xlu0 %1203  ;;  %v2609_v29 = vmul.f32 %v3219_v45, %v5210_v4  ;;  %v2607_v15 = vsel %vm2606_vm7, %v3215_v61, %v2603_v12  ;;  %v1331_v61 = vsub.f32 %v4820_v1, %v5177_v37  ;;  %vm2615_vm11 = vweird.f32 %v3219_v45 }
 0x38f   :  { %v2659_v42 = vmul.f32 %v2607_v15, %v2467_v18  ;;  %v1475_v36 = vsub.f32 1.5, %v1474_v53  ;;  %v1572_v8 = vmax.f32 %v1556_v20, 0.0  ;;  %v5233_v24 = vmul.f32 0.03125, %v1204_v63  ;;  %vm2616_vm13 = vmor %vm2614_vm12, %vm2615_vm11 }
 0x390   :  { %v1252_v2 = vpop.xlane.xlu1 %1251  ;;  %v2610_v47 = vmul.f32 %v3219_v45, %v2609_v29 }
 0x391   :  { %v1285_v38 = vmul.f32 0.03125, %v1252_v2  ;;  %v2676_v35 = vmul.f32 %v5206_v21, %v2659_v42  ;;  %v1476_v28 = vmul.f32 %v3217_v48, %v1475_v36  ;;  %v1604_v17 = vadd.f32 %v1588_v22, %v1572_v8 }
 0x392   :  { %v2611_v58 = vmul.f32 0.5, %v2610_v47  ;;  %v1254_v60 = vpop.xlane.xlu2 %1253  ;;  %v1301_v3 = vmul.f32 %v5233_v24, %v5233_v24  ;;  %v1332_v2 = vsub.f32 %v4845_v7, %v5204_v57 }
 0x393   :  { %v3221_v10 = vpop.eup %3220  ;;  %v2693_v31 = vadd.f32 %v5212_v33, %v2676_v35  ;;  %v1480_v49 = vsel %vm1479_vm10, %v3217_v48, %v1476_v28  ;;  %1620 = vst [vmem:[#allocation20 + $0x58] sm:$0xff] %v1604_v17  ;;  %v1286_v54 = vmul.f32 0.03125, %v1254_v60 }
 0x394   :  { %v2612_v9 = vsub.f32 1.5, %v2611_v58  ;;  %v1523_v11 = vmul.f32 %v1480_v49, %v1331_v61  ;;  %v1482_v6 = vmul.f32 %v3221_v10, %v5224_v34  ;;  %v1317_v40 = vsub.f32 %v1285_v38, %v1301_v3 }
 0x395   :  { %v2709_v25 = vmax.f32 %v2693_v31, 0.0  ;;  %vm1488_vm14 = vweird.f32 %v3221_v10  ;;  %v2438_v38 = vmul.f32 %v5258_v39, %v5258_v39 }
 0x396   :  { %v2343_v14 = vpop.xlane.xlu0 %2342  ;;  %v2613_v1 = vmul.f32 %v3219_v45, %v2612_v9  ;;  %v1540_v37 = vmul.f32 %v5189_v52, %v1523_v11  ;;  %v1483_v62 = vmul.f32 %v3221_v10, %v1482_v6  ;;  %v5249_v48 = vadd.f32 1e-05, %v1317_v40  ;;  %vm1489_vm0 = vmor %vm1487_vm15, %vm1488_vm14  ;;  %v1590_v11 = vld [vmem:[#allocation11 + $0x68] sm:$0xff] }
 0x397   :  { %2725 = vst [vmem:[#allocation21 + $0x58] sm:$0xff] %v2709_v25  ;;  %v5268_v22 = vmul.f32 0.03125, %v2343_v14 }
 0x398   :  { %v1206_v51 = vpop.xlane.xlu1 %1205  ;;  %v2617_v5 = vsel %vm2616_vm13, %v3219_v45, %v2613_v1  ;;  %v1557_v27 = vadd.f32 %v5200_v43, %v1540_v37  ;;  %v1484_v44 = vmul.f32 0.5, %v1483_v62  ;;  %3222 = vrsqrt.f32 %v5249_v48 }
 0x399   :  { %v5253_v19 = vmul.f32 0.03125, %v1206_v51  ;;  %v2660_v4 = vmul.f32 %v2617_v5, %v2468_v56  ;;  %v2439_v61 = vmul.f32 %v5268_v22, %v5268_v22  ;;  %vm1497_vm2 = vweird.f32 %v5249_v48 }
 0x39a   :  { %v2387_v23 = vpop.xlane.xlu2 %2386  ;;  %v1573_v45 = vmax.f32 %v1557_v27, 0.0  ;;  %v1485_v12 = vsub.f32 1.5, %v1484_v44  ;;  %v1333_v5 = vsub.f32 %v4887_v30, %v5233_v24 }
 0x39b   :  { %v1302_v46 = vmul.f32 %v5253_v19, %v5253_v19  ;;  %v2677_v50 = vmul.f32 %v5206_v21, %v2660_v4  ;;  %v2421_v63 = vmul.f32 0.03125, %v2387_v23 }
 0x39c   :  { %v1605_v53 = vadd.f32 %v1589_v59, %v1573_v45  ;;  %v1486_v20 = vmul.f32 %v3221_v10, %v1485_v12 }
 0x39d   :  { %v1318_v18 = vsub.f32 %v1286_v54, %v1302_v46  ;;  %v2694_v29 = vadd.f32 %v5212_v33, %v2677_v50  ;;  %v2453_v15 = vsub.f32 %v2421_v63, %v2437_v26  ;;  %v1334_v63 = vsub.f32 %v4916_v16, %v5253_v19 }
 0x39e   :  { %v2389_v0 = vpop.xlane.xlu0 %2388  ;;  %v3223_v47 = vpop.eup %3222  ;;  %1621 = vst [vmem:[#allocation20 + $0x60] sm:$0xff] %v1605_v53  ;;  %v1490_v34 = vsel %vm1489_vm0, %v3221_v10, %v1486_v20  ;;  %v1591_v53 = vld [vmem:[#allocation11 + $0x70] sm:$0xff] }
 0x39f   :  { %v1350_v42 = vadd.f32 1e-05, %v1318_v18  ;;  %v2422_v36 = vmul.f32 0.03125, %v2389_v0  ;;  %v2710_v8 = vmax.f32 %v2694_v29, 0.0  ;;  %v2485_v35 = vadd.f32 1e-05, %v2453_v15 }
 0x3a0   :  { %v2391_v28 = vpop.xlane.xlu1 %2390  ;;  %v1524_v58 = vmul.f32 %v1490_v34, %v1332_v2  ;;  %v1492_v60 = vmul.f32 %v3223_v47, %v5249_v48  ;;  %vm1498_vm1 = vweird.f32 %v3223_v47  ;;  %v2469_v0 = vsub.f32 %v4871_v32, %v5239_v55 }
 0x3a1   :  { %3224 = vrsqrt.f32 %v1350_v42  ;;  %2726 = vst [vmem:[#allocation21 + $0x60] sm:$0xff] %v2710_v8  ;;  %v2454_v7 = vsub.f32 %v2422_v36, %v2438_v38  ;;  %v2423_v3 = vmul.f32 0.03125, %v2391_v28  ;;  %vm1499_vm3 = vmor %vm1497_vm2, %vm1498_vm1  ;;  %vm1507_vm6 = vweird.f32 %v1350_v42 }
 0x3a2   :  { %3226 = vrsqrt.f32 %v2485_v35  ;;  %v1541_v57 = vmul.f32 %v5189_v52, %v1524_v58  ;;  %v1493_v17 = vmul.f32 %v3223_v47, %v1492_v60  ;;  %vm2624_vm8 = vweird.f32 %v2485_v35 }
 0x3a3   :  { %v5276_v10 = vadd.f32 1e-05, %v2454_v7  ;;  %v2455_v9 = vsub.f32 %v2423_v3, %v2439_v61  ;;  %v2470_v32 = vsub.f32 %v4876_v13, %v5258_v39 }
 0x3a4   :  { %v1558_v31 = vadd.f32 %v5200_v43, %v1541_v57  ;;  %v1494_v49 = vmul.f32 0.5, %v1493_v17  ;;  %v1592_v57 = vld [vmem:[#allocation11 + $0x78] sm:$0xff] }
 0x3a5   :  { %3228 = vrsqrt.f32 %v5276_v10  ;;  %v5280_v25 = vadd.f32 1e-05, %v2455_v9  ;;  %vm2634_vm11 = vweird.f32 %v5276_v10 }
 0x3a6   :  { %v1574_v40 = vmax.f32 %v1558_v31, 0.0  ;;  %v1495_v14 = vsub.f32 1.5, %v1494_v49 }
 0x3a7   :  { %v3225_v6 = vpop.eup %3224  ;;  %3230 = vrsqrt.f32 %v5280_v25  ;;  %vm2644_vm14 = vweird.f32 %v5280_v25 }
 0x3a8   :  { %v3227_v1 = vpop.eup %3226  ;;  %v1502_v37 = vmul.f32 %v3225_v6, %v1350_v42  ;;  %v1606_v56 = vadd.f32 %v1590_v11, %v1574_v40  ;;  %v1496_v62 = vmul.f32 %v3223_v47, %v1495_v14  ;;  %vm1508_vm4 = vweird.f32 %v3225_v6 }
 0x3a9   :  { %v2619_v51 = vmul.f32 %v3227_v1, %v2485_v35  ;;  %vm2625_vm5 = vweird.f32 %v3227_v1  ;;  %vm1509_vm7 = vmor %vm1507_vm6, %vm1508_vm4 }
 0x3aa   :  { %v1503_v26 = vmul.f32 %v3225_v6, %v1502_v37  ;;  %1622 = vst [vmem:[#allocation20 + $0x68] sm:$0xff] %v1606_v56  ;;  %v1500_v27 = vsel %vm1499_vm3, %v3223_v47, %v1496_v62  ;;  %vm2626_vm9 = vmor %vm2624_vm8, %vm2625_vm5 }
 0x3ab   :  { %v2620_v4 = vmul.f32 %v3227_v1, %v2619_v51  ;;  %v3229_v44 = vpop.eup %3228  ;;  %v1525_v59 = vmul.f32 %v1500_v27, %v1333_v5 }
 0x3ac   :  { %v1504_v54 = vmul.f32 0.5, %v1503_v26  ;;  %v2629_v23 = vmul.f32 %v3229_v44, %v5276_v10  ;;  %vm2635_vm10 = vweird.f32 %v3229_v44 }
 0x3ad   :  { %v2621_v46 = vmul.f32 0.5, %v2620_v4  ;;  %v1542_v45 = vmul.f32 %v5189_v52, %v1525_v59  ;;  %v3231_v24 = vpop.eup %3230  ;;  %vm2636_vm12 = vmor %vm2634_vm11, %vm2635_vm10 }
 0x3ae   :  { %v1505_v48 = vsub.f32 1.5, %v1504_v54  ;;  %v2630_v30 = vmul.f32 %v3229_v44, %v2629_v23  ;;  %v2639_v15 = vmul.f32 %v3231_v24, %v5280_v25  ;;  %vm2645_vm13 = vweird.f32 %v3231_v24 }
 0x3af   :  { %v2622_v50 = vsub.f32 1.5, %v2621_v46  ;;  %v1559_v12 = vadd.f32 %v5200_v43, %v1542_v45  ;;  %vm2646_vm15 = vmor %vm2644_vm14, %vm2645_vm13 }
 0x3b0   :  { %v1506_v18 = vmul.f32 %v3225_v6, %v1505_v48  ;;  %v2631_v20 = vmul.f32 0.5, %v2630_v30  ;;  %v2640_v19 = vmul.f32 %v3231_v24, %v2639_v15 }
 0x3b1   :  { %v2623_v29 = vmul.f32 %v3227_v1, %v2622_v50  ;;  %v1575_v2 = vmax.f32 %v1559_v12, 0.0 }
 0x3b2   :  { %v1510_v36 = vsel %vm1509_vm7, %v3225_v6, %v1506_v18  ;;  %v2632_v16 = vsub.f32 1.5, %v2631_v20  ;;  %v2641_v28 = vmul.f32 0.5, %v2640_v19 }
 0x3b3   :  { %v1526_v47 = vmul.f32 %v1510_v36, %v1334_v63  ;;  %v2627_v8 = vsel %vm2626_vm9, %v3227_v1, %v2623_v29  ;;  %v1607_v42 = vadd.f32 %v1591_v53, %v1575_v2 }
 0x3b4   :  { %v2661_v34 = vmul.f32 %v2627_v8, %v2469_v0  ;;  %v2633_v35 = vmul.f32 %v3229_v44, %v2632_v16  ;;  %v2642_v7 = vsub.f32 1.5, %v2641_v28 }
 0x3b5   :  { %v1543_v38 = vmul.f32 %v5189_v52, %v1526_v47  ;;  %1623 = vst [vmem:[#allocation20 + $0x70] sm:$0xff] %v1607_v42 }
 0x3b6   :  { %v2678_v55 = vmul.f32 %v5206_v21, %v2661_v34  ;;  %v2637_v60 = vsel %vm2636_vm12, %v3229_v44, %v2633_v35  ;;  %v2643_v39 = vmul.f32 %v3231_v24, %v2642_v7 }
 0x3b7   :  { %v1560_v58 = vadd.f32 %v5200_v43, %v1543_v38  ;;  %v2662_v52 = vmul.f32 %v2637_v60, %v2470_v32  ;;  %v2471_v43 = vsub.f32 %v4941_v41, %v5268_v22 }
 0x3b8   :  { %v2695_v17 = vadd.f32 %v5212_v33, %v2678_v55  ;;  %v2647_v31 = vsel %vm2646_vm15, %v3231_v24, %v2643_v39 }
 0x3b9   :  { %v1576_v13 = vmax.f32 %v1560_v58, 0.0  ;;  %v2679_v3 = vmul.f32 %v5206_v21, %v2662_v52  ;;  %v2663_v9 = vmul.f32 %v2647_v31, %v2471_v43 }
 0x3ba   :  { %v2711_v61 = vmax.f32 %v2695_v17, 0.0 }
 0x3bb   :  { %v1608_v10 = vadd.f32 %v1592_v57, %v1576_v13  ;;  %v2696_v49 = vadd.f32 %v5212_v33, %v2679_v3  ;;  %v2680_v6 = vmul.f32 %v5206_v21, %v2663_v9 }
 0x3bc   :  { %2727 = vst [vmem:[#allocation21 + $0x68] sm:$0xff] %v2711_v61 }
 0x3bd   :  { %1624 = vst [vmem:[#allocation20 + $0x78] sm:$0xff] %v1608_v10  ;;  %v2712_v11 = vmax.f32 %v2696_v49, 0.0  ;;  %v2697_v41 = vadd.f32 %v5212_v33, %v2680_v6 }
 0x3be   :  { %2742 = dma.vmem_to_hbm [thread:$0]  %s2735_s27, 2048, %s2737_s12, [#allocation5], %s3536_s29, %s3536_s29, %s3537_s2  }
 0x3bf   :  { %2728 = vst [vmem:[#allocation21 + $0x70] sm:$0xff] %v2712_v11  ;;  %v2713_v22 = vmax.f32 %v2697_v41, 0.0 }
 0x3c1   :  { %2729 = vst [vmem:[#allocation21 + $0x78] sm:$0xff] %v2713_v22 }
 0x3c2   :  { %2755 = dma.vmem_to_hbm [thread:$0]  %s2748_s4, 2048, %s2750_s14, [#allocation22], %s3536_s29, %s3536_s29, %s3537_s2  }
 0x3c3   :  { %3528 = dma.done.wait [#allocation5], 2048  }
 0x3c4   :  { %3529 = vsyncadd [#allocation5], 4294965248 }
 0x3c5   :  { %3530 = dma.done.wait [#allocation22], 2048  }
 0x3c6   :  { %3531 = vsyncadd [#allocation22], 4294965248 }
 0x3c7   :  { %2764 = vsyncpa [#allocation4], 1 }
 0x3c8   :  { %2765 = vsyncpa [#allocation9], 1 }
 0x3c9   :  { %2766 = vsyncpa [#allocation12], 1 }
 0x3ca   :  { %2767 = vsyncpa [#allocation15], 1 }
 0x3cb   :  { %2768 = vsyncpa [#allocation18], 1 }
 0x3cc   :  { %2769 = vsyncpa [#allocation5], 1 }
 0x3cd   :  { %2770 = vsyncpa [#allocation22], 1 }
 0x3ce   :  { %2771 = vsyncpa [#allocation6], 1 }

</bundles_post_ra>
